<compile_context>
chip_gen: v6e
topology: v6e:2x2x1
jax: 0.10.0
libtpu: 0.0.40
codegen_flags: <defaults>
</compile_context>

<pallas_src>
import functools

import jax
import jax.numpy as jnp
from jax.experimental import pallas as pl
from jax.experimental.pallas import tpu as pltpu

LN_EPS = 1e-12  # HF ViT layer_norm_eps


# ----------------------------- shared helpers (kernel + reference) -----------------------------

def _ln(x, g, b):
    m = jnp.mean(x, axis=-1, keepdims=True)
    v = jnp.mean(jnp.square(x - m), axis=-1, keepdims=True)
    return (x - m) * jax.lax.rsqrt(v + LN_EPS) * g + b


def _gelu(x):
    # TODO(synk): HF ViT uses exact erf-GELU; tanh approximation used for robust Mosaic lowering.
    return jax.nn.gelu(x, approximate=True)


# ------------------------------------- fused Pallas kernel -------------------------------------

def encoder_kernel(patches_ref, patch_w_ref, patch_b_ref, cls_pos_ref,
                   ln1g_ref, ln1b_ref, wqkv_ref, bqkv_ref, wo3_ref, bo_ref,
                   ln2g_ref, ln2b_ref, w1_ref, b1_ref, w2_ref, b2_ref,
                   fing_ref, finb_ref, aw_ref, ab_ref,
                   out_ref, x_scr, *, num_heads):
    l = pl.program_id(1)
    n_layers = pl.num_programs(1)
    bf16 = jnp.bfloat16

    # ---- l == 0: patch embedding GEMM + CLS token + position embeddings -> resident x ----
    @pl.when(l == 0)
    def _init():
        emb = jnp.dot(patches_ref[0].astype(bf16), patch_w_ref[...],
                      preferred_element_type=jnp.float32) + patch_b_ref[...]
        cp = cls_pos_ref[...]                      # (S, D); row 0 already holds cls + pos[0]
        x_scr[0:1, :] = cp[0:1, :]
        x_scr[1:, :] = emb + cp[1:, :]

    x = x_scr[...]                                 # (S, D) f32, resident across the L sweep
    d = x.shape[-1]
    dh = d // num_heads
    scale = 1.0 / float(dh) ** 0.5

    # ---- multi-head self-attention (pre-LN), heads batched ----
    h1 = _ln(x, ln1g_ref[0], ln1b_ref[0])
    qkv = jnp.dot(h1.astype(bf16), wqkv_ref[0],
                  preferred_element_type=jnp.float32) + bqkv_ref[0]        # (S, 3D)

    def split_heads(off):
        # lane-aligned slices (dh multiple of 128 in this config) -> (H, S, dh)
        return jnp.stack(
            [qkv[:, off + h * dh: off + (h + 1) * dh] for h in range(num_heads)], axis=0)

    q3, k3, v3 = split_heads(0), split_heads(d), split_heads(2 * d)

    sc = jnp.einsum('hqe,hke->hqk', q3.astype(bf16), k3.astype(bf16),
                    preferred_element_type=jnp.float32) * scale            # (H, S, S)
    sc = sc - jnp.max(sc, axis=-1, keepdims=True)
    e = jnp.exp(sc)
    a = e * pl.reciprocal(jnp.sum(e, axis=-1, keepdims=True), approx=True)
    ctx = jnp.einsum('hqk,hke->hqe', a.astype(bf16), v3.astype(bf16),
                     preferred_element_type=jnp.float32)                   # (H, S, dh)
    # per-head output projection summed over heads (== concat_heads(ctx) @ Wo, no concat)
    attn = jnp.einsum('hse,hed->hsd', ctx.astype(bf16), wo3_ref[0],
                      preferred_element_type=jnp.float32).sum(axis=0) + bo_ref[0]
    h = x + attn

    # ---- MLP (pre-LN) ----
    h2 = _ln(h, ln2g_ref[0], ln2b_ref[0])
    m = jnp.dot(h2.astype(bf16), w1_ref[0], preferred_element_type=jnp.float32) + b1_ref[0]
    m = _gelu(m)
    m = jnp.dot(m.astype(bf16), w2_ref[0], preferred_element_type=jnp.float32) + b2_ref[0]
    x_new = h + m
    x_scr[...] = x_new

    # ---- l == L-1: CLS token -> final LayerNorm -> output adapter ----
    @pl.when(l == n_layers - 1)
    def _head():
        hf = _ln(x_new[0:1, :], fing_ref[...], finb_ref[...])
        out_ref[0] = jnp.dot(hf.astype(bf16), aw_ref[...],
                             preferred_element_type=jnp.float32) + ab_ref[...]


# -------------------------------------------- wrapper --------------------------------------------

def image_encoder_forward(pixel_values, params, cfg):
    """pixel_values: (B, C, H, W) f32  ->  features: (B, hidden_dim) f32"""
    B, C, H, W = pixel_values.shape
    p, D, Hout, heads = cfg["patch"], cfg["D"], cfg["hidden_dim"], cfg["heads"]
    nh, nw = H // p, W // p
    P = nh * nw
    S = P + 1
    K = C * p * p
    dh = D // heads
    L = params["wqkv"].shape[0]

    # glue: NCHW -> flattened patches ordered (C, ph, pw) (matches Conv2d(stride=patch) weights)
    patches = pixel_values.reshape(B, C, nh, p, nw, p)
    patches = jnp.transpose(patches, (0, 2, 4, 1, 3, 5)).reshape(B, P, K)

    # glue: fold CLS token into row 0 of the position-embedding table -> (S, D)
    cls_pos = params["pos_emb"][0].at[0].add(params["cls_token"][0, 0])

    # glue: per-head view of the attention output projection (free host-side reshape)
    wo3 = params["wo"].reshape(L, heads, dh, D)

    def layer_spec(arr):  # stacked per-layer weights, indexed by the layer grid axis
        return pl.BlockSpec((1,) + arr.shape[1:],
                            lambda b, l, nd=arr.ndim: (l,) + (0,) * (nd - 1))

    def const_spec(arr):  # grid-invariant full-array blocks (fetched once, kept resident)
        return pl.BlockSpec(arr.shape, lambda b, l, nd=arr.ndim: (0,) * nd)

    in_specs = [
        pl.BlockSpec((1, P, K), lambda b, l: (b, 0, 0)),                   # patches
        const_spec(params["patch_w"]), const_spec(params["patch_b"]),
        const_spec(cls_pos),
        layer_spec(params["ln1_g"]), layer_spec(params["ln1_b"]),
        layer_spec(params["wqkv"]), layer_spec(params["bqkv"]),
        layer_spec(wo3), layer_spec(params["bo"]),
        layer_spec(params["ln2_g"]), layer_spec(params["ln2_b"]),
        layer_spec(params["w1"]), layer_spec(params["b1"]),
        layer_spec(params["w2"]), layer_spec(params["b2"]),
        const_spec(params["final_ln_g"]), const_spec(params["final_ln_b"]),
        const_spec(params["adapter_w"]), const_spec(params["adapter_b"]),
    ]

    out = pl.pallas_call(
        functools.partial(encoder_kernel, num_heads=heads),
        out_shape=jax.ShapeDtypeStruct((B, 1, Hout), jnp.float32),
        grid=(B, L),
        in_specs=in_specs,
        out_specs=pl.BlockSpec((1, 1, Hout), lambda b, l: (b, 0, 0)),
        scratch_shapes=[pltpu.VMEM((S, D), jnp.float32)],                  # resident activation
        compiler_params=pltpu.CompilerParams(
            dimension_semantics=("parallel", "arbitrary"),
            vmem_limit_bytes=32 * 1024 * 1024),  # size to the real working set for big configs
    )(patches, params["patch_w"], params["patch_b"], cls_pos,
      params["ln1_g"], params["ln1_b"], params["wqkv"], params["bqkv"],
      wo3, params["bo"], params["ln2_g"], params["ln2_b"],
      params["w1"], params["b1"], params["w2"], params["b2"],
      params["final_ln_g"], params["final_ln_b"],
      params["adapter_w"], params["adapter_b"])
    return out[:, 0, :]


# ---------------------------------- pure-JAX reference (same numerics) ----------------------------------

def reference_forward(pixel_values, params, cfg):
    bf16, f32 = jnp.bfloat16, jnp.float32
    B, C, H, W = pixel_values.shape
    p, D, heads = cfg["patch"], cfg["D"], cfg["heads"]
    nh, nw = H // p, W // p
    P, K, dh = nh * nw, C * p * p, D // heads
    L = params["wqkv"].shape[0]
    scale = 1.0 / float(dh) ** 0.5

    patches = pixel_values.reshape(B, C, nh, p, nw, p)
    patches = jnp.transpose(patches, (0, 2, 4, 1, 3, 5)).reshape(B, P, K)
    emb = jnp.dot(patches.astype(bf16), params["patch_w"],
                  preferred_element_type=f32) + params["patch_b"]
    cls = jnp.broadcast_to(params["cls_token"], (B, 1, D)).astype(f32)
    x = jnp.concatenate([cls, emb], axis=1) + params["pos_emb"]

    for l in range(L):
        h1 = _ln(x, params["ln1_g"][l], params["ln1_b"][l])
        qkv = jnp.dot(h1.astype(bf16), params["wqkv"][l],
                      preferred_element_type=f32) + params["bqkv"][l]
        q, k, v = qkv[..., :D], qkv[..., D:2 * D], qkv[..., 2 * D:]
        hf_ = lambda t: t.reshape(B, -1, heads, dh).transpose(0, 2, 1, 3)
        q, k, v = hf_(q), hf_(k), hf_(v)
        sc = jnp.einsum("bhqe,bhke->bhqk", q.astype(bf16), k.astype(bf16),
                        preferred_element_type=f32) * scale
        sc = sc - jnp.max(sc, axis=-1, keepdims=True)
        e = jnp.exp(sc)
        a = e / jnp.sum(e, axis=-1, keepdims=True)
        ctx = jnp.einsum("bhqk,bhke->bhqe", a.astype(bf16), v.astype(bf16),
                         preferred_element_type=f32)
        wo3 = params["wo"][l].reshape(heads, dh, D)
        attn = jnp.einsum("bhse,hed->bsd", ctx.astype(bf16), wo3,
                          preferred_element_type=f32) + params["bo"][l]
        h = x + attn
        h2 = _ln(h, params["ln2_g"][l], params["ln2_b"][l])
        m = jnp.dot(h2.astype(bf16), params["w1"][l], preferred_element_type=f32) + params["b1"][l]
        m = _gelu(m)
        m = jnp.dot(m.astype(bf16), params["w2"][l], preferred_element_type=f32) + params["b2"][l]
        x = h + m

    cls_tok = x[:, 0, :]
    hfin = _ln(cls_tok, params["final_ln_g"], params["final_ln_b"])
    return jnp.dot(hfin.astype(bf16), params["adapter_w"],
                   preferred_element_type=f32) + params["adapter_b"]


# -------------------------------------------- param init --------------------------------------------

def init_params(key, cfg):
    C, p, D, M = cfg["C"], cfg["patch"], cfg["D"], cfg["mlp"]
    Hout, L = cfg["hidden_dim"], cfg["layers_n"]
    S = (cfg["H"] // p) * (cfg["W"] // p) + 1
    K = C * p * p
    bf16, f32 = jnp.bfloat16, jnp.float32
    ks = iter(jax.random.split(key, 32))
    nrm = lambda shape, s=0.02: (s * jax.random.normal(next(ks), shape)).astype(f32)
    return {
        # patch embedding (Conv2d(stride=patch) expressed as a GEMM); matmul weights in bf16
        "patch_w": nrm((K, D)).astype(bf16), "patch_b": nrm((1, D)),
        "cls_token": nrm((1, 1, D)), "pos_emb": nrm((1, S, D)),
        # per-layer weights stacked on a leading L axis (single fused pallas_call)
        "ln1_g": 1.0 + nrm((L, 1, D), 0.1), "ln1_b": nrm((L, 1, D)),
        "wqkv": nrm((L, D, 3 * D)).astype(bf16), "bqkv": nrm((L, 1, 3 * D)),
        "wo": nrm((L, D, D)).astype(bf16), "bo": nrm((L, 1, D)),
        "ln2_g": 1.0 + nrm((L, 1, D), 0.1), "ln2_b": nrm((L, 1, D)),
        "w1": nrm((L, D, M)).astype(bf16), "b1": nrm((L, 1, M)),
        "w2": nrm((L, M, D)).astype(bf16), "b2": nrm((L, 1, D)),
        # final LayerNorm + output adapter (hidden_size -> hidden_dim)
        "final_ln_g": 1.0 + nrm((1, D), 0.1), "final_ln_b": nrm((1, D)),
        "adapter_w": nrm((D, Hout)).astype(bf16), "adapter_b": nrm((1, Hout)),
    }


# ------------------------------------------------ main ------------------------------------------------

if __name__ == "__main__":
    # small but lane-dense config: D, dh, mlp, hidden_dim all multiples of 128
    cfg = dict(C=3, H=16, W=16, patch=8, D=256, heads=2, mlp=512, layers_n=2, hidden_dim=128)

    key = jax.random.PRNGKey(0)
    k_pix, k_par = jax.random.split(key)
    pixel_values = jax.random.normal(k_pix, (2, cfg["C"], cfg["H"], cfg["W"]), jnp.float32)
    params = init_params(k_par, cfg)

    feats = jax.block_until_ready(image_encoder_forward(pixel_values, params, cfg))
    ref = jax.block_until_ready(reference_forward(pixel_values, params, cfg))

    assert feats.shape == (2, cfg["hidden_dim"])
    max_diff = float(jnp.max(jnp.abs(feats - ref)))
    assert jnp.allclose(feats, ref, atol=1e-2, rtol=1e-2), (
        f"Pallas output mismatch vs JAX reference (max abs diff {max_diff})")
    print("KERNEL_OK")
</pallas_src>

<mosaic_0001>
module attributes {stable_mosaic.version = 11 : i64} {
  func.func @encoder_kernel(%arg0: i32, %arg1: i32, %arg2: memref<1x4x192xf32, #tpu.memory_space<vmem>>, %arg3: memref<192x256xbf16, #tpu.memory_space<vmem>>, %arg4: memref<1x256xf32, #tpu.memory_space<vmem>>, %arg5: memref<5x256xf32, #tpu.memory_space<vmem>>, %arg6: memref<1x1x256xf32, #tpu.memory_space<vmem>>, %arg7: memref<1x1x256xf32, #tpu.memory_space<vmem>>, %arg8: memref<1x256x768xbf16, #tpu.memory_space<vmem>>, %arg9: memref<1x1x768xf32, #tpu.memory_space<vmem>>, %arg10: memref<1x2x128x256xbf16, #tpu.memory_space<vmem>>, %arg11: memref<1x1x256xf32, #tpu.memory_space<vmem>>, %arg12: memref<1x1x256xf32, #tpu.memory_space<vmem>>, %arg13: memref<1x1x256xf32, #tpu.memory_space<vmem>>, %arg14: memref<1x256x512xbf16, #tpu.memory_space<vmem>>, %arg15: memref<1x1x512xf32, #tpu.memory_space<vmem>>, %arg16: memref<1x512x256xbf16, #tpu.memory_space<vmem>>, %arg17: memref<1x1x256xf32, #tpu.memory_space<vmem>>, %arg18: memref<1x256xf32, #tpu.memory_space<vmem>>, %arg19: memref<1x256xf32, #tpu.memory_space<vmem>>, %arg20: memref<256x128xbf16, #tpu.memory_space<vmem>>, %arg21: memref<1x128xf32, #tpu.memory_space<vmem>>, %arg22: memref<1x1x128xf32, #tpu.memory_space<vmem>>, %arg23: memref<5x256xf32, #tpu.memory_space<vmem>>) attributes {dimension_semantics = [#tpu.dimension_semantics<parallel>, #tpu.dimension_semantics<arbitrary>], iteration_bounds = array<i64: 2, 2>, scalar_prefetch = 0 : i64, scratch_operands = 1 : i64, tpu.core_type = #tpu.core_type<tc>, window_params = [{transform_indices = @transform_0, window_bounds = array<i64: 1, 4, 192>}, {pipeline_mode = #tpu.pipeline_mode<synchronous>, transform_indices = @transform_1, window_bounds = array<i64: 192, 256>}, {pipeline_mode = #tpu.pipeline_mode<synchronous>, transform_indices = @transform_2, window_bounds = array<i64: 1, 256>}, {pipeline_mode = #tpu.pipeline_mode<synchronous>, transform_indices = @transform_3, window_bounds = array<i64: 5, 256>}, {transform_indices = @transform_4, window_bounds = array<i64: 1, 1, 256>}, {transform_indices = @transform_5, window_bounds = array<i64: 1, 1, 256>}, {transform_indices = @transform_6, window_bounds = array<i64: 1, 256, 768>}, {transform_indices = @transform_7, window_bounds = array<i64: 1, 1, 768>}, {transform_indices = @transform_8, window_bounds = array<i64: 1, 2, 128, 256>}, {transform_indices = @transform_9, window_bounds = array<i64: 1, 1, 256>}, {transform_indices = @transform_10, window_bounds = array<i64: 1, 1, 256>}, {transform_indices = @transform_11, window_bounds = array<i64: 1, 1, 256>}, {transform_indices = @transform_12, window_bounds = array<i64: 1, 256, 512>}, {transform_indices = @transform_13, window_bounds = array<i64: 1, 1, 512>}, {transform_indices = @transform_14, window_bounds = array<i64: 1, 512, 256>}, {transform_indices = @transform_15, window_bounds = array<i64: 1, 1, 256>}, {pipeline_mode = #tpu.pipeline_mode<synchronous>, transform_indices = @transform_16, window_bounds = array<i64: 1, 256>}, {pipeline_mode = #tpu.pipeline_mode<synchronous>, transform_indices = @transform_17, window_bounds = array<i64: 1, 256>}, {pipeline_mode = #tpu.pipeline_mode<synchronous>, transform_indices = @transform_18, window_bounds = array<i64: 256, 128>}, {pipeline_mode = #tpu.pipeline_mode<synchronous>, transform_indices = @transform_19, window_bounds = array<i64: 1, 128>}, {transform_indices = @transform_20, window_bounds = array<i64: 1, 1, 128>}]} {
    %c0_i32 = arith.constant 0 : i32
    %0 = arith.cmpi eq, %arg1, %c0_i32 : i32
    %1 = arith.extui %0 : i1 to i32
    %c0_i32_0 = arith.constant 0 : i32
    %2 = arith.cmpi ne, %1, %c0_i32_0 : i32
    scf.if %2 {
      %c0_65 = arith.constant 0 : index
      %c0_66 = arith.constant 0 : index
      %c0_67 = arith.constant 0 : index
      %141 = vector.load %arg2[%c0_65, %c0_66, %c0_67] : memref<1x4x192xf32, #tpu.memory_space<vmem>>, vector<1x4x192xf32>
      %142 = vector.shape_cast %141 : vector<1x4x192xf32> to vector<4x192xf32>
      %143 = arith.truncf %142 : vector<4x192xf32> to vector<4x192xbf16>
      %c0_68 = arith.constant 0 : index
      %c0_69 = arith.constant 0 : index
      %144 = vector.load %arg3[%c0_68, %c0_69] : memref<192x256xbf16, #tpu.memory_space<vmem>>, vector<192x256xbf16>
      %cst_70 = arith.constant dense<0.000000e+00> : vector<4x256xf32>
      %145 = tpu.matmul %143, %144, %cst_70 {dimension_numbers = #tpu.dot_dimension_numbers<[1], [0], [0], [1], [0, 0, 1, 1], [], []>} : vector<4x192xbf16>, vector<192x256xbf16>, vector<4x256xf32> -> vector<4x256xf32>
      %c0_71 = arith.constant 0 : index
      %c0_72 = arith.constant 0 : index
      %146 = vector.load %arg4[%c0_71, %c0_72] : memref<1x256xf32, #tpu.memory_space<vmem>>, vector<1x256xf32>
      %147 = vector.broadcast %146 : vector<1x256xf32> to vector<4x256xf32>
      %148 = arith.addf %145, %147 : vector<4x256xf32>
      %c0_73 = arith.constant 0 : index
      %c0_74 = arith.constant 0 : index
      %149 = vector.load %arg5[%c0_73, %c0_74] : memref<5x256xf32, #tpu.memory_space<vmem>>, vector<5x256xf32>
      %150 = vector.extract_strided_slice %149 {offsets = [0, 0], sizes = [1, 256], strides = [1, 1]} : vector<5x256xf32> to vector<1x256xf32>
      %c0_75 = arith.constant 0 : index
      %c0_76 = arith.constant 0 : index
      %151 = vector.load %arg23[%c0_75, %c0_76] : memref<5x256xf32, #tpu.memory_space<vmem>>, vector<1x256xf32>
      tpu.vector_store %arg23[%c0_75, %c0_76], %150 {strides = array<i32>} : memref<5x256xf32, #tpu.memory_space<vmem>>, vector<1x256xf32>,
      %152 = vector.extract_strided_slice %149 {offsets = [1, 0], sizes = [4, 256], strides = [1, 1]} : vector<5x256xf32> to vector<4x256xf32>
      %153 = arith.addf %148, %152 : vector<4x256xf32>
      %c1 = arith.constant 1 : index
      %c0_77 = arith.constant 0 : index
      %154 = vector.load %arg23[%c1, %c0_77] : memref<5x256xf32, #tpu.memory_space<vmem>>, vector<4x256xf32>
      tpu.vector_store %arg23[%c1, %c0_77], %153 {strides = array<i32>} : memref<5x256xf32, #tpu.memory_space<vmem>>, vector<4x256xf32>,
    } else {
    }
    %c0 = arith.constant 0 : index
    %c0_1 = arith.constant 0 : index
    %3 = vector.load %arg23[%c0, %c0_1] : memref<5x256xf32, #tpu.memory_space<vmem>>, vector<5x256xf32>
    %c0_2 = arith.constant 0 : index
    %c0_3 = arith.constant 0 : index
    %c0_4 = arith.constant 0 : index
    %4 = vector.load %arg6[%c0_2, %c0_3, %c0_4] : memref<1x1x256xf32, #tpu.memory_space<vmem>>, vector<1x1x256xf32>
    %5 = vector.shape_cast %4 : vector<1x1x256xf32> to vector<1x256xf32>
    %c0_5 = arith.constant 0 : index
    %c0_6 = arith.constant 0 : index
    %c0_7 = arith.constant 0 : index
    %6 = vector.load %arg7[%c0_5, %c0_6, %c0_7] : memref<1x1x256xf32, #tpu.memory_space<vmem>>, vector<1x1x256xf32>
    %7 = vector.shape_cast %6 : vector<1x1x256xf32> to vector<1x256xf32>
    %cst = arith.constant dense<0.000000e+00> : vector<5xf32>
    %8 = vector.multi_reduction <add>, %3, %cst [1] : vector<5x256xf32> to vector<5xf32>
    %9 = vector.shape_cast %8 : vector<5xf32> to vector<5x1xf32>
    %cst_8 = arith.constant 2.560000e+02 : f32
    %10 = vector.broadcast %cst_8 : f32 to vector<5x1xf32>
    %11 = arith.divf %9, %10 : vector<5x1xf32>
    %12 = vector.broadcast %11 : vector<5x1xf32> to vector<5x256xf32>
    %13 = arith.subf %3, %12 : vector<5x256xf32>
    %14 = arith.mulf %13, %13 : vector<5x256xf32>
    %cst_9 = arith.constant dense<0.000000e+00> : vector<5xf32>
    %15 = vector.multi_reduction <add>, %14, %cst_9 [1] : vector<5x256xf32> to vector<5xf32>
    %16 = vector.shape_cast %15 : vector<5xf32> to vector<5x1xf32>
    %cst_10 = arith.constant 2.560000e+02 : f32
    %17 = vector.broadcast %cst_10 : f32 to vector<5x1xf32>
    %18 = arith.divf %16, %17 : vector<5x1xf32>
    %19 = vector.broadcast %11 : vector<5x1xf32> to vector<5x256xf32>
    %20 = arith.subf %3, %19 : vector<5x256xf32>
    %cst_11 = arith.constant 9.99999996E-13 : f32
    %21 = vector.broadcast %cst_11 : f32 to vector<5x1xf32>
    %22 = arith.addf %18, %21 : vector<5x1xf32>
    %23 = math.rsqrt %22 : vector<5x1xf32>
    %24 = vector.broadcast %23 : vector<5x1xf32> to vector<5x256xf32>
    %25 = arith.mulf %20, %24 : vector<5x256xf32>
    %26 = vector.broadcast %5 : vector<1x256xf32> to vector<5x256xf32>
    %27 = arith.mulf %25, %26 : vector<5x256xf32>
    %28 = vector.broadcast %7 : vector<1x256xf32> to vector<5x256xf32>
    %29 = arith.addf %27, %28 : vector<5x256xf32>
    %30 = arith.truncf %29 : vector<5x256xf32> to vector<5x256xbf16>
    %c0_12 = arith.constant 0 : index
    %c0_13 = arith.constant 0 : index
    %c0_14 = arith.constant 0 : index
    %31 = vector.load %arg8[%c0_12, %c0_13, %c0_14] : memref<1x256x768xbf16, #tpu.memory_space<vmem>>, vector<1x256x768xbf16>
    %32 = vector.shape_cast %31 : vector<1x256x768xbf16> to vector<256x768xbf16>
    %cst_15 = arith.constant dense<0.000000e+00> : vector<5x768xf32>
    %33 = tpu.matmul %30, %32, %cst_15 {dimension_numbers = #tpu.dot_dimension_numbers<[1], [0], [0], [1], [0, 0, 1, 1], [], []>} : vector<5x256xbf16>, vector<256x768xbf16>, vector<5x768xf32> -> vector<5x768xf32>
    %c0_16 = arith.constant 0 : index
    %c0_17 = arith.constant 0 : index
    %c0_18 = arith.constant 0 : index
    %34 = vector.load %arg9[%c0_16, %c0_17, %c0_18] : memref<1x1x768xf32, #tpu.memory_space<vmem>>, vector<1x1x768xf32>
    %35 = vector.shape_cast %34 : vector<1x1x768xf32> to vector<1x768xf32>
    %36 = vector.broadcast %35 : vector<1x768xf32> to vector<5x768xf32>
    %37 = arith.addf %33, %36 : vector<5x768xf32>
    %38 = vector.extract_strided_slice %37 {offsets = [0, 0], sizes = [5, 128], strides = [1, 1]} : vector<5x768xf32> to vector<5x128xf32>
    %39 = vector.extract_strided_slice %37 {offsets = [0, 128], sizes = [5, 128], strides = [1, 1]} : vector<5x768xf32> to vector<5x128xf32>
    %40 = vector.shape_cast %38 : vector<5x128xf32> to vector<1x5x128xf32>
    %41 = vector.shape_cast %39 : vector<5x128xf32> to vector<1x5x128xf32>
    %42 = tpu.concatenate %40, %41 in 0 : vector<1x5x128xf32>, vector<1x5x128xf32> -> vector<2x5x128xf32>
    %43 = vector.extract_strided_slice %37 {offsets = [0, 256], sizes = [5, 128], strides = [1, 1]} : vector<5x768xf32> to vector<5x128xf32>
    %44 = vector.extract_strided_slice %37 {offsets = [0, 384], sizes = [5, 128], strides = [1, 1]} : vector<5x768xf32> to vector<5x128xf32>
    %45 = vector.shape_cast %43 : vector<5x128xf32> to vector<1x5x128xf32>
    %46 = vector.shape_cast %44 : vector<5x128xf32> to vector<1x5x128xf32>
    %47 = tpu.concatenate %45, %46 in 0 : vector<1x5x128xf32>, vector<1x5x128xf32> -> vector<2x5x128xf32>
    %48 = vector.extract_strided_slice %37 {offsets = [0, 512], sizes = [5, 128], strides = [1, 1]} : vector<5x768xf32> to vector<5x128xf32>
    %49 = vector.extract_strided_slice %37 {offsets = [0, 640], sizes = [5, 128], strides = [1, 1]} : vector<5x768xf32> to vector<5x128xf32>
    %50 = vector.shape_cast %48 : vector<5x128xf32> to vector<1x5x128xf32>
    %51 = vector.shape_cast %49 : vector<5x128xf32> to vector<1x5x128xf32>
    %52 = tpu.concatenate %50, %51 in 0 : vector<1x5x128xf32>, vector<1x5x128xf32> -> vector<2x5x128xf32>
    %53 = arith.truncf %42 : vector<2x5x128xf32> to vector<2x5x128xbf16>
    %54 = arith.truncf %47 : vector<2x5x128xf32> to vector<2x5x128xbf16>
    "tpu.trace_start"() <{level = 10 : i32, message = "hqe,hke->hqk"}> : () -> ()
    %cst_19 = arith.constant dense<0.000000e+00> : vector<2x5x5xf32>
    %55 = tpu.matmul %53, %54, %cst_19 {dimension_numbers = #tpu.dot_dimension_numbers<[2], [2], [1], [1], [0, 0, 0, 1, 1, 1], [0], [0]>} : vector<2x5x128xbf16>, vector<2x5x128xbf16>, vector<2x5x5xf32> -> vector<2x5x5xf32>
    "tpu.trace_stop"() : () -> ()
    %cst_20 = arith.constant 0.0883883461 : f32
    %56 = vector.broadcast %cst_20 : f32 to vector<2x5x5xf32>
    %57 = arith.mulf %55, %56 : vector<2x5x5xf32>
    %cst_21 = arith.constant dense<0xFF800000> : vector<2x5xf32>
    %58 = vector.multi_reduction <maximumf>, %57, %cst_21 [2] : vector<2x5x5xf32> to vector<2x5xf32>
    %59 = vector.shape_cast %58 : vector<2x5xf32> to vector<2x5x1xf32>
    %60 = vector.broadcast %59 : vector<2x5x1xf32> to vector<2x5x5xf32>
    %61 = arith.subf %57, %60 : vector<2x5x5xf32>
    %62 = math.exp %61 : vector<2x5x5xf32>
    %cst_22 = arith.constant dense<0.000000e+00> : vector<2x5xf32>
    %63 = vector.multi_reduction <add>, %62, %cst_22 [2] : vector<2x5x5xf32> to vector<2x5xf32>
    %64 = vector.shape_cast %63 : vector<2x5xf32> to vector<2x5x1xf32>
    %65 = tpu.reciprocal %64 {approx = true} : vector<2x5x1xf32> -> vector<2x5x1xf32>
    %66 = vector.broadcast %65 : vector<2x5x1xf32> to vector<2x5x5xf32>
    %67 = arith.mulf %62, %66 : vector<2x5x5xf32>
    %68 = arith.truncf %67 : vector<2x5x5xf32> to vector<2x5x5xbf16>
    %69 = arith.truncf %52 : vector<2x5x128xf32> to vector<2x5x128xbf16>
    "tpu.trace_start"() <{level = 10 : i32, message = "hqk,hke->hqe"}> : () -> ()
    %cst_23 = arith.constant dense<0.000000e+00> : vector<2x5x128xf32>
    %70 = tpu.matmul %68, %69, %cst_23 {dimension_numbers = #tpu.dot_dimension_numbers<[2], [1], [1], [2], [0, 0, 0, 1, 1, 2], [0], [0]>} : vector<2x5x5xbf16>, vector<2x5x128xbf16>, vector<2x5x128xf32> -> vector<2x5x128xf32>
    "tpu.trace_stop"() : () -> ()
    %71 = arith.truncf %70 : vector<2x5x128xf32> to vector<2x5x128xbf16>
    %c0_24 = arith.constant 0 : index
    %c0_25 = arith.constant 0 : index
    %c0_26 = arith.constant 0 : index
    %c0_27 = arith.constant 0 : index
    %72 = vector.load %arg10[%c0_24, %c0_25, %c0_26, %c0_27] : memref<1x2x128x256xbf16, #tpu.memory_space<vmem>>, vector<1x2x128x256xbf16>
    %73 = vector.shape_cast %72 : vector<1x2x128x256xbf16> to vector<2x128x256xbf16>
    "tpu.trace_start"() <{level = 10 : i32, message = "hse,hed->hsd"}> : () -> ()
    %cst_28 = arith.constant dense<0.000000e+00> : vector<2x5x256xf32>
    %74 = tpu.matmul %71, %73, %cst_28 {dimension_numbers = #tpu.dot_dimension_numbers<[2], [1], [1], [2], [0, 0, 0, 1, 1, 2], [0], [0]>} : vector<2x5x128xbf16>, vector<2x128x256xbf16>, vector<2x5x256xf32> -> vector<2x5x256xf32>
    "tpu.trace_stop"() : () -> ()
    %cst_29 = arith.constant dense<0.000000e+00> : vector<5x256xf32>
    %75 = vector.multi_reduction <add>, %74, %cst_29 [0] : vector<2x5x256xf32> to vector<5x256xf32>
    %c0_30 = arith.constant 0 : index
    %c0_31 = arith.constant 0 : index
    %c0_32 = arith.constant 0 : index
    %76 = vector.load %arg11[%c0_30, %c0_31, %c0_32] : memref<1x1x256xf32, #tpu.memory_space<vmem>>, vector<1x1x256xf32>
    %77 = vector.shape_cast %76 : vector<1x1x256xf32> to vector<1x256xf32>
    %78 = vector.broadcast %77 : vector<1x256xf32> to vector<5x256xf32>
    %79 = arith.addf %75, %78 : vector<5x256xf32>
    %80 = arith.addf %3, %79 : vector<5x256xf32>
    %c0_33 = arith.constant 0 : index
    %c0_34 = arith.constant 0 : index
    %c0_35 = arith.constant 0 : index
    %81 = vector.load %arg12[%c0_33, %c0_34, %c0_35] : memref<1x1x256xf32, #tpu.memory_space<vmem>>, vector<1x1x256xf32>
    %82 = vector.shape_cast %81 : vector<1x1x256xf32> to vector<1x256xf32>
    %c0_36 = arith.constant 0 : index
    %c0_37 = arith.constant 0 : index
    %c0_38 = arith.constant 0 : index
    %83 = vector.load %arg13[%c0_36, %c0_37, %c0_38] : memref<1x1x256xf32, #tpu.memory_space<vmem>>, vector<1x1x256xf32>
    %84 = vector.shape_cast %83 : vector<1x1x256xf32> to vector<1x256xf32>
    %cst_39 = arith.constant dense<0.000000e+00> : vector<5xf32>
    %85 = vector.multi_reduction <add>, %80, %cst_39 [1] : vector<5x256xf32> to vector<5xf32>
    %86 = vector.shape_cast %85 : vector<5xf32> to vector<5x1xf32>
    %cst_40 = arith.constant 2.560000e+02 : f32
    %87 = vector.broadcast %cst_40 : f32 to vector<5x1xf32>
    %88 = arith.divf %86, %87 : vector<5x1xf32>
    %89 = vector.broadcast %88 : vector<5x1xf32> to vector<5x256xf32>
    %90 = arith.subf %80, %89 : vector<5x256xf32>
    %91 = arith.mulf %90, %90 : vector<5x256xf32>
    %cst_41 = arith.constant dense<0.000000e+00> : vector<5xf32>
    %92 = vector.multi_reduction <add>, %91, %cst_41 [1] : vector<5x256xf32> to vector<5xf32>
    %93 = vector.shape_cast %92 : vector<5xf32> to vector<5x1xf32>
    %cst_42 = arith.constant 2.560000e+02 : f32
    %94 = vector.broadcast %cst_42 : f32 to vector<5x1xf32>
    %95 = arith.divf %93, %94 : vector<5x1xf32>
    %96 = vector.broadcast %88 : vector<5x1xf32> to vector<5x256xf32>
    %97 = arith.subf %80, %96 : vector<5x256xf32>
    %cst_43 = arith.constant 9.99999996E-13 : f32
    %98 = vector.broadcast %cst_43 : f32 to vector<5x1xf32>
    %99 = arith.addf %95, %98 : vector<5x1xf32>
    %100 = math.rsqrt %99 : vector<5x1xf32>
    %101 = vector.broadcast %100 : vector<5x1xf32> to vector<5x256xf32>
    %102 = arith.mulf %97, %101 : vector<5x256xf32>
    %103 = vector.broadcast %82 : vector<1x256xf32> to vector<5x256xf32>
    %104 = arith.mulf %102, %103 : vector<5x256xf32>
    %105 = vector.broadcast %84 : vector<1x256xf32> to vector<5x256xf32>
    %106 = arith.addf %104, %105 : vector<5x256xf32>
    %107 = arith.truncf %106 : vector<5x256xf32> to vector<5x256xbf16>
    %c0_44 = arith.constant 0 : index
    %c0_45 = arith.constant 0 : index
    %c0_46 = arith.constant 0 : index
    %108 = vector.load %arg14[%c0_44, %c0_45, %c0_46] : memref<1x256x512xbf16, #tpu.memory_space<vmem>>, vector<1x256x512xbf16>
    %109 = vector.shape_cast %108 : vector<1x256x512xbf16> to vector<256x512xbf16>
    %cst_47 = arith.constant dense<0.000000e+00> : vector<5x512xf32>
    %110 = tpu.matmul %107, %109, %cst_47 {dimension_numbers = #tpu.dot_dimension_numbers<[1], [0], [0], [1], [0, 0, 1, 1], [], []>} : vector<5x256xbf16>, vector<256x512xbf16>, vector<5x512xf32> -> vector<5x512xf32>
    %c0_48 = arith.constant 0 : index
    %c0_49 = arith.constant 0 : index
    %c0_50 = arith.constant 0 : index
    %111 = vector.load %arg15[%c0_48, %c0_49, %c0_50] : memref<1x1x512xf32, #tpu.memory_space<vmem>>, vector<1x1x512xf32>
    %112 = vector.shape_cast %111 : vector<1x1x512xf32> to vector<1x512xf32>
    %113 = vector.broadcast %112 : vector<1x512xf32> to vector<5x512xf32>
    %114 = arith.addf %110, %113 : vector<5x512xf32>
    %115 = arith.mulf %114, %114 : vector<5x512xf32>
    %116 = arith.mulf %114, %115 : vector<5x512xf32>
    %cst_51 = arith.constant 4.471500e-02 : f32
    %117 = vector.broadcast %cst_51 : f32 to vector<5x512xf32>
    %118 = arith.mulf %117, %116 : vector<5x512xf32>
    %119 = arith.addf %114, %118 : vector<5x512xf32>
    %cst_52 = arith.constant 0.797884583 : f32
    %120 = vector.broadcast %cst_52 : f32 to vector<5x512xf32>
    %121 = arith.mulf %120, %119 : vector<5x512xf32>
    %122 = math.tanh %121 : vector<5x512xf32>
    %cst_53 = arith.constant 1.000000e+00 : f32
    %123 = vector.broadcast %cst_53 : f32 to vector<5x512xf32>
    %124 = arith.addf %123, %122 : vector<5x512xf32>
    %cst_54 = arith.constant 5.000000e-01 : f32
    %125 = vector.broadcast %cst_54 : f32 to vector<5x512xf32>
    %126 = arith.mulf %125, %124 : vector<5x512xf32>
    %127 = arith.mulf %114, %126 : vector<5x512xf32>
    %128 = arith.truncf %127 : vector<5x512xf32> to vector<5x512xbf16>
    %c0_55 = arith.constant 0 : index
    %c0_56 = arith.constant 0 : index
    %c0_57 = arith.constant 0 : index
    %129 = vector.load %arg16[%c0_55, %c0_56, %c0_57] : memref<1x512x256xbf16, #tpu.memory_space<vmem>>, vector<1x512x256xbf16>
    %130 = vector.shape_cast %129 : vector<1x512x256xbf16> to vector<512x256xbf16>
    %cst_58 = arith.constant dense<0.000000e+00> : vector<5x256xf32>
    %131 = tpu.matmul %128, %130, %cst_58 {dimension_numbers = #tpu.dot_dimension_numbers<[1], [0], [0], [1], [0, 0, 1, 1], [], []>} : vector<5x512xbf16>, vector<512x256xbf16>, vector<5x256xf32> -> vector<5x256xf32>
    %c0_59 = arith.constant 0 : index
    %c0_60 = arith.constant 0 : index
    %c0_61 = arith.constant 0 : index
    %132 = vector.load %arg17[%c0_59, %c0_60, %c0_61] : memref<1x1x256xf32, #tpu.memory_space<vmem>>, vector<1x1x256xf32>
    %133 = vector.shape_cast %132 : vector<1x1x256xf32> to vector<1x256xf32>
    %134 = vector.broadcast %133 : vector<1x256xf32> to vector<5x256xf32>
    %135 = arith.addf %131, %134 : vector<5x256xf32>
    %136 = arith.addf %80, %135 : vector<5x256xf32>
    %c0_62 = arith.constant 0 : index
    %c0_63 = arith.constant 0 : index
    %137 = vector.load %arg23[%c0_62, %c0_63] : memref<5x256xf32, #tpu.memory_space<vmem>>, vector<5x256xf32>
    tpu.vector_store %arg23[%c0_62, %c0_63], %136 {strides = array<i32>} : memref<5x256xf32, #tpu.memory_space<vmem>>, vector<5x256xf32>,
    %c1_i32 = arith.constant 1 : i32
    %138 = arith.cmpi eq, %arg1, %c1_i32 : i32
    %139 = arith.extui %138 : i1 to i32
    %c0_i32_64 = arith.constant 0 : i32
    %140 = arith.cmpi ne, %139, %c0_i32_64 : i32
    scf.if %140 {
      %141 = vector.extract_strided_slice %136 {offsets = [0, 0], sizes = [1, 256], strides = [1, 1]} : vector<5x256xf32> to vector<1x256xf32>
      %c0_65 = arith.constant 0 : index
      %c0_66 = arith.constant 0 : index
      %142 = vector.load %arg18[%c0_65, %c0_66] : memref<1x256xf32, #tpu.memory_space<vmem>>, vector<1x256xf32>
      %c0_67 = arith.constant 0 : index
      %c0_68 = arith.constant 0 : index
      %143 = vector.load %arg19[%c0_67, %c0_68] : memref<1x256xf32, #tpu.memory_space<vmem>>, vector<1x256xf32>
      %cst_69 = arith.constant dense<0.000000e+00> : vector<1xf32>
      %144 = vector.multi_reduction <add>, %141, %cst_69 [1] : vector<1x256xf32> to vector<1xf32>
      %145 = vector.shape_cast %144 : vector<1xf32> to vector<1x1xf32>
      %cst_70 = arith.constant 2.560000e+02 : f32
      %146 = vector.broadcast %cst_70 : f32 to vector<1x1xf32>
      %147 = arith.divf %145, %146 : vector<1x1xf32>
      %148 = vector.broadcast %147 : vector<1x1xf32> to vector<1x256xf32>
      %149 = arith.subf %141, %148 : vector<1x256xf32>
      %150 = arith.mulf %149, %149 : vector<1x256xf32>
      %cst_71 = arith.constant dense<0.000000e+00> : vector<1xf32>
      %151 = vector.multi_reduction <add>, %150, %cst_71 [1] : vector<1x256xf32> to vector<1xf32>
      %152 = vector.shape_cast %151 : vector<1xf32> to vector<1x1xf32>
      %cst_72 = arith.constant 2.560000e+02 : f32
      %153 = vector.broadcast %cst_72 : f32 to vector<1x1xf32>
      %154 = arith.divf %152, %153 : vector<1x1xf32>
      %155 = vector.broadcast %147 : vector<1x1xf32> to vector<1x256xf32>
      %156 = arith.subf %141, %155 : vector<1x256xf32>
      %cst_73 = arith.constant 9.99999996E-13 : f32
      %157 = vector.broadcast %cst_73 : f32 to vector<1x1xf32>
      %158 = arith.addf %154, %157 : vector<1x1xf32>
      %159 = math.rsqrt %158 : vector<1x1xf32>
      %160 = vector.broadcast %159 : vector<1x1xf32> to vector<1x256xf32>
      %161 = arith.mulf %156, %160 : vector<1x256xf32>
      %162 = arith.mulf %161, %142 : vector<1x256xf32>
      %163 = arith.addf %162, %143 : vector<1x256xf32>
      %164 = arith.truncf %163 : vector<1x256xf32> to vector<1x256xbf16>
      %c0_74 = arith.constant 0 : index
      %c0_75 = arith.constant 0 : index
      %165 = vector.load %arg20[%c0_74, %c0_75] : memref<256x128xbf16, #tpu.memory_space<vmem>>, vector<256x128xbf16>
      %cst_76 = arith.constant dense<0.000000e+00> : vector<1x128xf32>
      %166 = tpu.matmul %164, %165, %cst_76 {dimension_numbers = #tpu.dot_dimension_numbers<[1], [0], [0], [1], [0, 0, 1, 1], [], []>} : vector<1x256xbf16>, vector<256x128xbf16>, vector<1x128xf32> -> vector<1x128xf32>
      %c0_77 = arith.constant 0 : index
      %c0_78 = arith.constant 0 : index
      %167 = vector.load %arg21[%c0_77, %c0_78] : memref<1x128xf32, #tpu.memory_space<vmem>>, vector<1x128xf32>
      %168 = arith.addf %166, %167 : vector<1x128xf32>
      %c0_79 = arith.constant 0 : index
      %c0_80 = arith.constant 0 : index
      %c0_81 = arith.constant 0 : index
      %169 = vector.load %arg22[%c0_79, %c0_80, %c0_81] : memref<1x1x128xf32, #tpu.memory_space<vmem>>, vector<1x1x128xf32>
      %170 = vector.shape_cast %169 : vector<1x1x128xf32> to vector<1x128xf32>
      %171 = vector.shape_cast %168 : vector<1x128xf32> to vector<1x1x128xf32>
      tpu.vector_store %arg22[%c0_79, %c0_80, %c0_81], %171 {strides = array<i32>} : memref<1x1x128xf32, #tpu.memory_space<vmem>>, vector<1x1x128xf32>,
    } else {
    }
    return
  }
  func.func @transform_0(%arg0: i32, %arg1: i32) -> (i32, i32, i32) {
    %c0_i32 = arith.constant 0 : i32
    %c0_i32_0 = arith.constant 0 : i32
    %c0_i32_1 = arith.constant 0 : i32
    return %arg0, %c0_i32, %c0_i32_0 : i32, i32, i32
  }
  func.func @transform_1(%arg0: i32, %arg1: i32) -> (i32, i32) {
    %c0_i32 = arith.constant 0 : i32
    %c0_i32_0 = arith.constant 0 : i32
    %c0_i32_1 = arith.constant 0 : i32
    return %c0_i32, %c0_i32_0 : i32, i32
  }
  func.func @transform_2(%arg0: i32, %arg1: i32) -> (i32, i32) {
    %c0_i32 = arith.constant 0 : i32
    %c0_i32_0 = arith.constant 0 : i32
    %c0_i32_1 = arith.constant 0 : i32
    return %c0_i32, %c0_i32_0 : i32, i32
  }
  func.func @transform_3(%arg0: i32, %arg1: i32) -> (i32, i32) {
    %c0_i32 = arith.constant 0 : i32
    %c0_i32_0 = arith.constant 0 : i32
    %c0_i32_1 = arith.constant 0 : i32
    return %c0_i32, %c0_i32_0 : i32, i32
  }
  func.func @transform_4(%arg0: i32, %arg1: i32) -> (i32, i32, i32) {
    %c0_i32 = arith.constant 0 : i32
    %c0_i32_0 = arith.constant 0 : i32
    %c0_i32_1 = arith.constant 0 : i32
    return %arg1, %c0_i32, %c0_i32_0 : i32, i32, i32
  }
  func.func @transform_5(%arg0: i32, %arg1: i32) -> (i32, i32, i32) {
    %c0_i32 = arith.constant 0 : i32
    %c0_i32_0 = arith.constant 0 : i32
    %c0_i32_1 = arith.constant 0 : i32
    return %arg1, %c0_i32, %c0_i32_0 : i32, i32, i32
  }
  func.func @transform_6(%arg0: i32, %arg1: i32) -> (i32, i32, i32) {
    %c0_i32 = arith.constant 0 : i32
    %c0_i32_0 = arith.constant 0 : i32
    %c0_i32_1 = arith.constant 0 : i32
    return %arg1, %c0_i32, %c0_i32_0 : i32, i32, i32
  }
  func.func @transform_7(%arg0: i32, %arg1: i32) -> (i32, i32, i32) {
    %c0_i32 = arith.constant 0 : i32
    %c0_i32_0 = arith.constant 0 : i32
    %c0_i32_1 = arith.constant 0 : i32
    return %arg1, %c0_i32, %c0_i32_0 : i32, i32, i32
  }
  func.func @transform_8(%arg0: i32, %arg1: i32) -> (i32, i32, i32, i32) {
    %c0_i32 = arith.constant 0 : i32
    %c0_i32_0 = arith.constant 0 : i32
    %c0_i32_1 = arith.constant 0 : i32
    %c0_i32_2 = arith.constant 0 : i32
    return %arg1, %c0_i32, %c0_i32_0, %c0_i32_1 : i32, i32, i32, i32
  }
  func.func @transform_9(%arg0: i32, %arg1: i32) -> (i32, i32, i32) {
    %c0_i32 = arith.constant 0 : i32
    %c0_i32_0 = arith.constant 0 : i32
    %c0_i32_1 = arith.constant 0 : i32
    return %arg1, %c0_i32, %c0_i32_0 : i32, i32, i32
  }
  func.func @transform_10(%arg0: i32, %arg1: i32) -> (i32, i32, i32) {
    %c0_i32 = arith.constant 0 : i32
    %c0_i32_0 = arith.constant 0 : i32
    %c0_i32_1 = arith.constant 0 : i32
    return %arg1, %c0_i32, %c0_i32_0 : i32, i32, i32
  }
  func.func @transform_11(%arg0: i32, %arg1: i32) -> (i32, i32, i32) {
    %c0_i32 = arith.constant 0 : i32
    %c0_i32_0 = arith.constant 0 : i32
    %c0_i32_1 = arith.constant 0 : i32
    return %arg1, %c0_i32, %c0_i32_0 : i32, i32, i32
  }
  func.func @transform_12(%arg0: i32, %arg1: i32) -> (i32, i32, i32) {
    %c0_i32 = arith.constant 0 : i32
    %c0_i32_0 = arith.constant 0 : i32
    %c0_i32_1 = arith.constant 0 : i32
    return %arg1, %c0_i32, %c0_i32_0 : i32, i32, i32
  }
  func.func @transform_13(%arg0: i32, %arg1: i32) -> (i32, i32, i32) {
    %c0_i32 = arith.constant 0 : i32
    %c0_i32_0 = arith.constant 0 : i32
    %c0_i32_1 = arith.constant 0 : i32
    return %arg1, %c0_i32, %c0_i32_0 : i32, i32, i32
  }
  func.func @transform_14(%arg0: i32, %arg1: i32) -> (i32, i32, i32) {
    %c0_i32 = arith.constant 0 : i32
    %c0_i32_0 = arith.constant 0 : i32
    %c0_i32_1 = arith.constant 0 : i32
    return %arg1, %c0_i32, %c0_i32_0 : i32, i32, i32
  }
  func.func @transform_15(%arg0: i32, %arg1: i32) -> (i32, i32, i32) {
    %c0_i32 = arith.constant 0 : i32
    %c0_i32_0 = arith.constant 0 : i32
    %c0_i32_1 = arith.constant 0 : i32
    return %arg1, %c0_i32, %c0_i32_0 : i32, i32, i32
  }
  func.func @transform_16(%arg0: i32, %arg1: i32) -> (i32, i32) {
    %c0_i32 = arith.constant 0 : i32
    %c0_i32_0 = arith.constant 0 : i32
    %c0_i32_1 = arith.constant 0 : i32
    return %c0_i32, %c0_i32_0 : i32, i32
  }
  func.func @transform_17(%arg0: i32, %arg1: i32) -> (i32, i32) {
    %c0_i32 = arith.constant 0 : i32
    %c0_i32_0 = arith.constant 0 : i32
    %c0_i32_1 = arith.constant 0 : i32
    return %c0_i32, %c0_i32_0 : i32, i32
  }
  func.func @transform_18(%arg0: i32, %arg1: i32) -> (i32, i32) {
    %c0_i32 = arith.constant 0 : i32
    %c0_i32_0 = arith.constant 0 : i32
    %c0_i32_1 = arith.constant 0 : i32
    return %c0_i32, %c0_i32_0 : i32, i32
  }
  func.func @transform_19(%arg0: i32, %arg1: i32) -> (i32, i32) {
    %c0_i32 = arith.constant 0 : i32
    %c0_i32_0 = arith.constant 0 : i32
    %c0_i32_1 = arith.constant 0 : i32
    return %c0_i32, %c0_i32_0 : i32, i32
  }
  func.func @transform_20(%arg0: i32, %arg1: i32) -> (i32, i32, i32) {
    %c0_i32 = arith.constant 0 : i32
    %c0_i32_0 = arith.constant 0 : i32
    %c0_i32_1 = arith.constant 0 : i32
    return %arg0, %c0_i32, %c0_i32_0 : i32, i32, i32
  }
}

</mosaic_0001>

<bundles_post_ra>
// kernel: tpu_custom_call.1
= control target key start
LH: loop header
LB: loop body
LE: loop exit
PB: predicated region body
PF: predicated region fallthrough
CT: control target
= control target key end

     0   :  { %s6857_s0 = inlined_call_operand.hbm [shape: f32[2,4,192], index: 0, kind: input, shape index: {}]   ;;  %s6858_s1 = inlined_call_operand.hbm [shape: bf16[192,256], index: 1, kind: input, shape index: {}]   ;;  %s6859_s2 = inlined_call_operand.hbm [shape: f32[1,256], index: 2, kind: input, shape index: {}]   ;;  %s6860_s3 = inlined_call_operand.hbm [shape: f32[5,256], index: 3, kind: input, shape index: {}]   ;;  %s6861_s4 = inlined_call_operand.hbm [shape: f32[2,1,256], index: 4, kind: input, shape index: {}]   ;;  %s6862_s5 = inlined_call_operand.hbm [shape: f32[2,1,256], index: 5, kind: input, shape index: {}]   ;;  %s6863_s6 = inlined_call_operand.hbm [shape: bf16[2,256,768], index: 6, kind: input, shape index: {}]   ;;  %s6864_s7 = inlined_call_operand.vmem [shape: f32[2,1,768], index: 7, kind: input, shape index: {}]   ;;  %s6865_s8 = inlined_call_operand.hbm [shape: bf16[2,2,128,256], index: 8, kind: input, shape index: {}]   ;;  %s6866_s9 = inlined_call_operand.hbm [shape: f32[2,1,256], index: 9, kind: input, shape index: {}]   ;;  %s6867_s10 = inlined_call_operand.hbm [shape: f32[2,1,256], index: 10, kind: input, shape index: {}]   ;;  %s6868_s11 = inlined_call_operand.hbm [shape: f32[2,1,256], index: 11, kind: input, shape index: {}]   ;;  %s6869_s12 = inlined_call_operand.hbm [shape: bf16[2,256,512], index: 12, kind: input, shape index: {}]   ;;  %s6870_s13 = inlined_call_operand.vmem [shape: f32[2,1,512], index: 13, kind: input, shape index: {}]   ;;  %s6871_s14 = inlined_call_operand.hbm [shape: bf16[2,512,256], index: 14, kind: input, shape index: {}]   ;;  %s6872_s15 = inlined_call_operand.vmem [shape: f32[2,1,256], index: 15, kind: input, shape index: {}]   ;;  %s6873_s16 = inlined_call_operand.vmem [shape: f32[1,256], index: 16, kind: input, shape index: {}]   ;;  %s6874_s17 = inlined_call_operand.vmem [shape: f32[1,256], index: 17, kind: input, shape index: {}]   ;;  %s6875_s18 = inlined_call_operand.hbm [shape: bf16[256,128], index: 18, kind: input, shape index: {}]   ;;  %s6876_s19 = inlined_call_operand.vmem [shape: f32[1,128], index: 19, kind: input, shape index: {}]   ;;  %s6877_s20 = inlined_call_operand.hbm [shape: f32[2,1,128], index: 20, kind: output, shape index: {}]  }
   0x1   :  { %6902 = sst [smem:[#allocation43_spill]] %s6857_s0 }
   0x2   :  { %6903 = sst [smem:[#allocation44_spill]] %s6858_s1 }
   0x3   :  { %6904 = sst [smem:[#allocation45_spill]] %s6859_s2 }
   0x4   :  { %6905 = sst [smem:[#allocation46_spill]] %s6860_s3 }
   0x5   :  { %6906 = sst [smem:[#allocation47_spill]] %s6861_s4 }
   0x6   :  { %6907 = sst [smem:[#allocation48_spill]] %s6862_s5 }
   0x7   :  { %6908 = sst [smem:[#allocation49_spill]] %s6863_s6 }
   0x8   :  { %6909 = sst [smem:[#allocation50_spill]] %s6864_s7 }
   0x9   :  { %6910 = sst [smem:[#allocation51_spill]] %s6865_s8 }
   0xa   :  { %6911 = sst [smem:[#allocation52_spill]] %s6866_s9 }
   0xb   :  { %6912 = sst [smem:[#allocation53_spill]] %s6867_s10 }
   0xc   :  { %6913 = sst [smem:[#allocation54_spill]] %s6870_s13 }
   0xd   :  { %6914 = sst [smem:[#allocation55_spill]] %s6871_s14 }
   0xe   :  { %6915 = sst [smem:[#allocation56_spill]] %s6872_s15 }
   0xf   :  { %6916 = sst [smem:[#allocation57_spill]] %s6873_s16 }
  0x10   :  { %6917 = sst [smem:[#allocation58_spill]] %s6874_s17 }
  0x11   :  { %6918 = sst [smem:[#allocation59_spill]] %s6876_s19 }
  0x12   :  { %6919 = sst [smem:[#allocation60_spill]] %s6877_s20 }
  0x13   :  { %25 = vsyncpa [#allocation4], 0 }
  0x14   :  { %27 = vsyncpa [#allocation4 + $0x1], 0 }
  0x15   :  { %28 = vsyncpa [#allocation7], 0 }
  0x16   :  { %29 = vsyncpa [#allocation10], 0 }
  0x17   :  { %30 = vsyncpa [#allocation5], 0 }
  0x18   :  { %32 = vsyncpa [#allocation5 + $0x1], 0  ;;  %s6000_s1 = smov 0   ;;  %s6002_s22 = smov 0  }
  0x19   :  { %s6004_s23 = smov 0   ;;  %s6006_s24 = smov 0  }
  0x1a   :  { %s6008_s2 = smov 0   ;;  %s6010_s25 = smov 0  }
  0x1b   :  { %s6012_s3 = smov 0   ;;  %s6014_s26 = smov 0  }
  0x1c   :  { %s6016_s27 = smov 0   ;;  %s6018_s28 = smov 0  }
  0x1d   :  { %s6020_s4 = smov 0  }
  0x1e LB: > { %6920 = sst [smem:[#allocation28_spill]] %s5829_s22  ;;  %s6056_s29 = sadd.s32 4294967295, %s5865_s4   ;;  %s5865_s4 = sphi %s6020_s4, %s38_s4   ;;  %s5861_s28 = sphi %s6018_s28, %s7000_s28   ;;  %s5857_s27 = sphi %s6016_s27, %s7004_s27   ;;  %s5853_s26 = sphi %s6014_s26, %s6998_s26   ;;  %s5849_s3 = sphi %s6012_s3, %s7003_s3   ;;  %s5845_s25 = sphi %s6010_s25, %s6997_s25   ;;  %s5841_s2 = sphi %s6008_s2, %s7002_s2   ;;  %s5837_s24 = sphi %s6006_s24, %s7001_s24   ;;  %s5833_s23 = sphi %s6004_s23, %s6995_s23   ;;  %s5829_s22 = sphi %s6002_s22, %s6994_s22   ;;  %s5825_s1 = sphi %s6000_s1, %s6993_s1  }
  0x1f   : > { %6921 = sst [smem:[#allocation29_spill]] %s5833_s23  ;;  %s4260_s30 = sadd.s32 4294967294, %s5865_s4  }
  0x20   : > { %6922 = sst [smem:[#allocation30_spill]] %s5837_s24  ;;  %s47_s0 = sadd.s32 1, %s5857_s27 }
  0x21   : > { %6923 = sst [smem:[#allocation31_spill]] %s5845_s25  ;;  %s50_s21 = sadd.s32 1, %s5861_s28 }
  0x22   : > { %6924 = sst [smem:[#allocation32_spill]] %s5849_s3  ;;  %p48_p0 = scmp.ge.s32.totalorder %s47_s0, 2 }
  0x23   : > { %6925 = sst [smem:[#allocation33_spill]] %s5853_s26  ;;  %s57_s20 = sadd.s32 1, %s5845_s25 }
  0x24   : > { %6926 = sst [smem:[#allocation34_spill]] %s5861_s28  ;;  %p64_p1 = scmp.ne.s32.totalorder %s5845_s25, %s5841_s2 }
  0x25   : > { %p65_p2 = scmp.eq.s32.totalorder %s5865_s4, 0  ;;  %s7006_s0 = smov (%p48_p0, %s47_s0), 0 }
  0x26   : > { %6927 = sst [smem:[#allocation35_spill]] %s7006_s0  ;;  %s7008_s21 = smov (!%p48_p0, %s50_s21), %s5861_s28 }
  0x27   : > { %p6073_p3 = por %p65_p2, %p64_p1  ;;  %p70_p4 = scmp.ne.s32.totalorder %s5841_s2, %s5837_s24 }
  0x28   : > { %p52_p5 = scmp.ge.s32.totalorder %s7008_s21, 2  ;;  %p6889_p6 = scmp.eq.s32.totalorder %s6056_s29, 0 }
  0x29   : > { %s143_s19 = ssub.s32 %s5857_s27, %s7006_s0  ;;  %s146_s17 = sadd.s32 1, %s5833_s23 }
  0x2a   : > { %s7010_s21 = smov (%p52_p5, %s7008_s21), 0  ;;  %p6090_p7 = por %p6889_p6, %p70_p4 }
  0x2b   : > { %6929 = sst [smem:[#allocation36_spill]] %s7010_s21  ;;  %p144_p8 = scmp.eq.s32.totalorder %s143_s19, 0 }
  0x2c   : > { %s6930_s16 = scalar_select %p6090_p7, 1, 0 }
  0x2d   : > { %s54_s15 = ssub.s32 %s5861_s28, %s7010_s21  ;;  %p153_p9 = scmp.ne.s32.totalorder %s5833_s23, %s5829_s22 }
  0x2e   : > { %6931 = sst [smem:[#allocation37_spill]] %s6930_s16  ;;  %p55_p10 = scmp.eq.s32.totalorder %s54_s15, 0 }
  0x2f   : > { %p159_p11 = scmp.ne.s32.totalorder %s5829_s22, %s5825_s1  ;;  %p6108_p12 = por %p153_p9, %p65_p2 }
  0x30   : > { %s6101_s0 = scalar_select %p144_p8, %s5833_s23, %s146_s17  }
  0x31   : > { %s6104_s7 = scalar_select %p55_p10, %s5845_s25, %s57_s20  }
  0x32   : > { %6932 = sst [smem:[#allocation38_spill]] %s6101_s0  ;;  %p6114_p13 = por %p159_p11, %p6889_p6 }
  0x33   : > { %6933 = sst [smem:[#allocation39_spill]] %s6104_s7  ;;  %p553_p0 = scmp.eq.s32.totalorder %s6056_s29, 3 }
  0x34   : > { %s6935_s3 = scalar_select %p6114_p13, 1, 0 }
  0x35   : > { %p559_p5 = scmp.eq.s32.totalorder %s4260_s30, 3  ;;  %p6122_p8 = por %p553_p0, %p64_p1 }
  0x36   : > { %6936 = sst [smem:[#allocation40_spill]] %s6935_s3  ;;  %p4772_p2 = scmp.lt.s32.totalorder %s5865_s4, 4 }
  0x37   : > { %s6937_s15 = scalar_select %p6122_p8, 1, 0 }
  0x38   : > { %p6129_p10 = por %p559_p5, %p70_p4  ;;  %s636_s19 = sand.u32 1, %s5865_s4  }
  0x39   : > { %6938 = sst [smem:[#allocation41_spill]] %s6937_s15  ;;  %s638_s20 = sand.u32 1, %s5845_s25  }
  0x3a   : > { %s6939_s17 = scalar_select %p6129_p10, 1, 0 }
  0x3b   : > { %s4267_s1 = sshll.u32 %s638_s20, 3  ;;  %s4615_s21 = sshll.u32 %s5861_s28, 7 }
  0x3c   : > { %6940 = sst [smem:[#allocation42_spill]] %s6939_s17  ;;  %s640_s30 = scalar_lea.vmem [#allocation3], %s4267_s1 }
  0x3d   : > { %s6941_s3 = sld [smem:[#allocation43_spill]]  ;;  %s648_s16 = sshll.u32 %s640_s30, 4  ;;  %s649_s16 = int_to_ptr.vmem [resolvable:$true] %s648_s16 }
  0x3e   : > { %p6142_p1 = pnand %p4772_p2, %p6073_p3  ;;  %p6148_p4 = pnand %p4772_p2, %p6108_p12 }
  0x3f   : > { %s6153_s20 = sand.u32 1, %s5833_s23   ;;  %s6155_s28 = scalar_lea.sflag [#allocation4], %s636_s19 }
  0x40   : > { %s6943_s17 = scalar_select %p6148_p4, 1, 0 }
  0x41   : > { %p5347_p9 = pneg %p6142_p1  ;;  %s5358_s7 = scalar_lea.vmem %s649_s16, 128 }
  0x42   : > { %p5359_p11 = scmp.ne.s32.totalorder %s649_s16, %s5358_s7 }
  0x43   : > { %s646_s22 = scalar_lea.hbm %s6941_s3, %s4615_s21  ;;  %s5867_s3 = smov [#allocation3]  }
  0x44   : > { %p5361_p0 = pnand %p5359_p11, %p5347_p9  ;;  %s5363_s26 = sshll.u32 %s5867_s3, 4  ;;  %s5364_s26 = int_to_ptr.vmem [resolvable:$false] %s5363_s26 }
  0x45   : > { %s5365_s0 = scalar_lea.vmem %s5364_s26, 256  ;;  %p5366_p5 = scmp.lt.s32.totalorder %s649_s16, %s5364_s26 }
  0x46   : > { %p5362_p3 = pneg %p5361_p0  ;;  %p5367_p6 = scmp.lt.s32.totalorder %s5365_s0, %s5358_s7 }
  0x48   : > { %p5368_p12 = por %p5367_p6, %p5366_p5 }
  0x4a   : > { %p5369_p2 = pnand %p5368_p12, %p5362_p3 }
  0x4c   : > { %5372 = shalt.err (!%p5369_p2)
}
  0x4d   : > { %4736 = dma.hbm_to_vmem [thread:$0]  (!%p6142_p1), %s646_s22, 128, %s649_s16, %s6155_s28  }
  0x4e   : > { %s6163_s13 = sshll.u32 %s6153_s20, 1  ;;  %s6166_s21 = sshll.u32 %s5857_s27, 5 }
  0x4f   : > { %s6944_s30 = sld [smem:[#allocation47_spill]]  ;;  %s659_s3 = scalar_lea.vmem [#allocation11], %s6163_s13 }
  0x50   : > { %s667_s26 = sshll.u32 %s659_s3, 4  ;;  %p6175_p6 = pneg %p6148_p4  ;;  %s668_s26 = int_to_ptr.vmem [resolvable:$true] %s667_s26 }
  0x51   : > { %s5386_s16 = scalar_lea.vmem %s668_s26, 32  ;;  %s5868_s22 = smov [#allocation11]  }
  0x52   : > { %p5387_p1 = scmp.ne.s32.totalorder %s668_s26, %s5386_s16  ;;  %s5391_s0 = sshll.u32 %s5868_s22, 4  ;;  %s5392_s0 = int_to_ptr.vmem [resolvable:$false] %s5391_s0 }
  0x53   : > { %s5393_s25 = scalar_lea.vmem %s5392_s0, 64  ;;  %p5394_p0 = scmp.lt.s32.totalorder %s668_s26, %s5392_s0 }
  0x54   : > { %p5389_p9 = pnand %p5387_p1, %p6175_p6  ;;  %p5395_p3 = scmp.lt.s32.totalorder %s5393_s25, %s5386_s16 }
  0x55   : > { %s665_s7 = scalar_lea.hbm %s6944_s30, %s6166_s21 }
  0x56   : > { %p5390_p11 = pneg %p5389_p9  ;;  %p5396_p5 = por %p5395_p3, %p5394_p0 }
  0x58   : > { %p5397_p12 = pnand %p5396_p5, %p5390_p11 }
  0x5a   : > { %5400 = shalt.err (!%p5397_p12)
}
  0x5b   : > { %4739 = dma.hbm_to_vmem [thread:$0]  (!%p6148_p4), %s665_s7, 32, %s668_s26, %s6155_s28  }
  0x5c   : > { %s6946_s5 = sld [smem:[#allocation48_spill]]  ;;  %s678_s3 = scalar_lea.vmem [#allocation12], %s6163_s13 }
  0x5d   : > { %s686_s22 = sshll.u32 %s678_s3, 4  ;;  %s4678_s0 = smul.u32 768, %s6153_s20  ;;  %s687_s22 = int_to_ptr.vmem [resolvable:$true] %s686_s22 }
  0x5e   : > { %s5414_s25 = scalar_lea.vmem %s687_s22, 32  ;;  %s5869_s16 = smov [#allocation12]  }
  0x5f   : > { %p5415_p2 = scmp.ne.s32.totalorder %s687_s22, %s5414_s25  ;;  %s5419_s23 = sshll.u32 %s5869_s16, 4  ;;  %s5420_s23 = int_to_ptr.vmem [resolvable:$false] %s5419_s23 }
  0x60   : > { %s5421_s24 = scalar_lea.vmem %s5420_s23, 64  ;;  %p5422_p11 = scmp.lt.s32.totalorder %s687_s22, %s5420_s23 }
  0x61   : > { %p5417_p1 = pnand %p5415_p2, %p6175_p6  ;;  %p5423_p0 = scmp.lt.s32.totalorder %s5421_s24, %s5414_s25 }
  0x62   : > { %s684_s30 = scalar_lea.hbm %s6946_s5, %s6166_s21 }
  0x63   : > { %p5418_p9 = pneg %p5417_p1  ;;  %p5424_p3 = por %p5423_p0, %p5422_p11 }
  0x65   : > { %p5425_p5 = pnand %p5424_p3, %p5418_p9 }
  0x67   : > { %5428 = shalt.err (!%p5425_p5)
}
  0x68   : > { %4742 = dma.hbm_to_vmem [thread:$0]  (!%p6148_p4), %s684_s30, 32, %s687_s22, %s6155_s28  }
  0x69   : > { %s4679_s7 = smul.u32 12288, %s5857_s27  ;;  %s697_s26 = scalar_lea.vmem [#allocation13], %s4678_s0 }
  0x6a   : > { %s704_s19 = sshll.u32 %s697_s26, 4  ;;  %s6947_s6 = sld [smem:[#allocation49_spill]]  ;;  %s705_s19 = int_to_ptr.vmem [resolvable:$true] %s704_s19 }
  0x6b   : > { %s5442_s5 = scalar_lea.vmem %s705_s19, 12288  ;;  %s5870_s23 = smov [#allocation13]  }
  0x6c   : > { %p5443_p12 = scmp.ne.s32.totalorder %s705_s19, %s5442_s5  ;;  %s5447_s24 = sshll.u32 %s5870_s23, 4  ;;  %s5448_s24 = int_to_ptr.vmem [resolvable:$false] %s5447_s24 }
  0x6d   : > { %s5449_s25 = scalar_lea.vmem %s5448_s24, 24576  ;;  %p5450_p9 = scmp.lt.s32.totalorder %s705_s19, %s5448_s24 }
  0x6e   : > { %p5445_p2 = pnand %p5443_p12, %p6175_p6  ;;  %p5451_p11 = scmp.lt.s32.totalorder %s5449_s25, %s5442_s5 }
  0x70   : > { %s703_s16 = scalar_lea.hbm %s6947_s6, %s4679_s7  ;;  %p5446_p1 = pneg %p5445_p2 }
  0x71   : > { %p5452_p0 = por %p5451_p11, %p5450_p9 }
  0x73   : > { %p5453_p3 = pnand %p5452_p0, %p5446_p1 }
  0x75   : > { %5456 = shalt.err (!%p5453_p3)
}
  0x76   : > { %s5871_s30 = smov 384   ;;  %s5872_s22 = smov 24  }
  0x77   : > { %4745 = dma.hbm_to_vmem [thread:$0]  (!%p6148_p4), %s703_s16, 12288, %s705_s19, %s6155_s28, %s5871_s30, %s5871_s30, %s5872_s22  }
  0x78   : > { %s4277_s0 = sshll.u32 %s6153_s20, 8  ;;  %s4618_s7 = sshll.u32 %s5857_s27, 12 }
  0x79   : > { %s6948_s8 = sld [smem:[#allocation51_spill]]  ;;  %s725_s23 = scalar_lea.vmem [#allocation14], %s4277_s0 }
  0x7a   : > { %s732_s5 = sshll.u32 %s725_s23, 4  ;;  %s5873_s25 = smov [#allocation14]   ;;  %s733_s5 = int_to_ptr.vmem [resolvable:$true] %s732_s5 }
  0x7b   : > { %s5470_s24 = scalar_lea.vmem %s733_s5, 4096  ;;  %s5475_s6 = sshll.u32 %s5873_s25, 4  ;;  %s5476_s6 = int_to_ptr.vmem [resolvable:$false] %s5475_s6 }
  0x7c   : > { %p5471_p5 = scmp.ne.s32.totalorder %s733_s5, %s5470_s24  ;;  %s5477_s15 = scalar_lea.vmem %s5476_s6, 8192 }
  0x7d   : > { %p5478_p1 = scmp.lt.s32.totalorder %s733_s5, %s5476_s6  ;;  %p5479_p9 = scmp.lt.s32.totalorder %s5477_s15, %s5470_s24 }
  0x7e   : > { %p5473_p12 = pnand %p5471_p5, %p6175_p6 }
  0x7f   : > { %s731_s3 = scalar_lea.hbm %s6948_s8, %s4618_s7  ;;  %p5480_p11 = por %p5479_p9, %p5478_p1 }
  0x80   : > { %p5474_p2 = pneg %p5473_p12 }
  0x82   : > { %p5481_p0 = pnand %p5480_p11, %p5474_p2 }
  0x84   : > { %5484 = shalt.err (!%p5481_p0)
}
  0x85   : > { %s6897_s19 = smov 128   ;;  %s6901_s16 = smov 8  }
  0x86   : > { %4748 = dma.hbm_to_vmem [thread:$0]  (!%p6148_p4), %s731_s3, 4096, %s733_s5, %s6155_s28, %s6897_s19, %s6897_s19, %s6901_s16  }
  0x87   : > { %s6949_s9 = sld [smem:[#allocation52_spill]]  ;;  %s746_s15 = scalar_lea.vmem [#allocation15], %s6163_s13 }
  0x88   : > { %s754_s0 = sshll.u32 %s746_s15, 4  ;;  %s5876_s26 = smov [#allocation15]   ;;  %s755_s0 = int_to_ptr.vmem [resolvable:$true] %s754_s0 }
  0x89   : > { %s5498_s7 = scalar_lea.vmem %s755_s0, 32  ;;  %s5503_s1 = sshll.u32 %s5876_s26, 4  ;;  %s5504_s1 = int_to_ptr.vmem [resolvable:$false] %s5503_s1 }
  0x8a   : > { %p5499_p3 = scmp.ne.s32.totalorder %s755_s0, %s5498_s7  ;;  %s5505_s23 = scalar_lea.vmem %s5504_s1, 64 }
  0x8b   : > { %p5506_p2 = scmp.lt.s32.totalorder %s755_s0, %s5504_s1  ;;  %p5507_p1 = scmp.lt.s32.totalorder %s5505_s23, %s5498_s7 }
  0x8c   : > { %p5501_p5 = pnand %p5499_p3, %p6175_p6 }
  0x8d   : > { %s752_s6 = scalar_lea.hbm %s6949_s9, %s6166_s21  ;;  %p5508_p9 = por %p5507_p1, %p5506_p2 }
  0x8e   : > { %p5502_p12 = pneg %p5501_p5 }
  0x90   : > { %p5509_p11 = pnand %p5508_p9, %p5502_p12 }
  0x92   : > { %5512 = shalt.err (!%p5509_p11)
}
  0x93   : > { %4751 = dma.hbm_to_vmem [thread:$0]  (!%p6148_p4), %s752_s6, 32, %s755_s0, %s6155_s28  }
  0x94   : > { %s6950_s10 = sld [smem:[#allocation53_spill]]  ;;  %s765_s25 = scalar_lea.vmem [#allocation16], %s6163_s13 }
  0x95   : > { %s773_s30 = sshll.u32 %s765_s25, 4  ;;  %s5877_s15 = smov [#allocation16]   ;;  %s774_s30 = int_to_ptr.vmem [resolvable:$true] %s773_s30 }
  0x96   : > { %s5526_s22 = scalar_lea.vmem %s774_s30, 32  ;;  %s5531_s7 = sshll.u32 %s5877_s15, 4  ;;  %s5532_s7 = int_to_ptr.vmem [resolvable:$false] %s5531_s7 }
  0x97   : > { %p5527_p0 = scmp.ne.s32.totalorder %s774_s30, %s5526_s22  ;;  %s5533_s26 = scalar_lea.vmem %s5532_s7, 64 }
  0x98   : > { %p5534_p12 = scmp.lt.s32.totalorder %s774_s30, %s5532_s7  ;;  %p5535_p2 = scmp.lt.s32.totalorder %s5533_s26, %s5526_s22 }
  0x99   : > { %p5529_p3 = pnand %p5527_p0, %p6175_p6 }
  0x9a   : > { %s771_s24 = scalar_lea.hbm %s6950_s10, %s6166_s21  ;;  %p5536_p1 = por %p5535_p2, %p5534_p12 }
  0x9b   : > { %p5530_p5 = pneg %p5529_p3 }
  0x9d   : > { %p5537_p9 = pnand %p5536_p1, %p5530_p5 }
  0x9f   : > { %5540 = shalt.err (!%p5537_p9)
}
  0xa0   : > { %4754 = dma.hbm_to_vmem [thread:$0]  (!%p6148_p4), %s771_s24, 32, %s774_s30, %s6155_s28  }
  0xa1   : > { %p4261_p11 = scmp.ge.s32.totalorder %s5865_s4, 1  ;;  %p566_p0 = scmp.lt.s32.totalorder %s5865_s4, 5 }
  0xa2   : > { %s5878_s6 = smov [#allocation6]   ;;  %s790_s5 = scalar_lea.hbm %s6868_s11, %s6166_s21 }
  0xa3   : > { %s578_s0 = sshll.u32 %s5878_s6, 4  ;;  %p6239_p3 = pnand %p4261_p11, %p566_p0  ;;  %s6243_s0 = int_to_ptr.vmem [resolvable:$true] %s578_s0 }
  0xa4   : > { %s784_s25 = scalar_lea.vmem [#allocation17], %s6163_s13  ;;  %s5879_s30 = smov [#allocation17]  }
  0xa5   : > { %s6951_s1 = scalar_select %p6239_p3, 1, 0 }
  0xa6   : > { %s792_s22 = sshll.u32 %s784_s25, 4  ;;  %p4720_p5 = pneg %p6239_p3  ;;  %s793_s22 = int_to_ptr.vmem [resolvable:$true] %s792_s22 }
  0xa7   : > { %s5554_s24 = scalar_lea.vmem %s793_s22, 32  ;;  %s5559_s15 = sshll.u32 %s5879_s30, 4  ;;  %s5560_s15 = int_to_ptr.vmem [resolvable:$false] %s5559_s15 }
  0xa8   : > { %p5555_p12 = scmp.ne.s32.totalorder %s793_s22, %s5554_s24  ;;  %s5561_s7 = scalar_lea.vmem %s5560_s15, 64 }
  0xa9   : > { %p5562_p9 = scmp.lt.s32.totalorder %s793_s22, %s5560_s15  ;;  %p5563_p11 = scmp.lt.s32.totalorder %s5561_s7, %s5554_s24 }
  0xaa   : > { %p5557_p2 = pnand %p5555_p12, %p6175_p6 }
  0xab   : > { %p5564_p0 = por %p5563_p11, %p5562_p9 }
  0xac   : > { %p5558_p1 = pneg %p5557_p2 }
  0xae   : > { %p5565_p10 = pnand %p5564_p0, %p5558_p1 }
  0xb0   : > { %5568 = shalt.err (!%p5565_p10)
}
  0xb1   : > { %4757 = dma.hbm_to_vmem [thread:$0]  (!%p6148_p4), %s790_s5, 32, %s793_s22, %s6155_s28  }
  0xb2   : > { %p6952_p12 = scmp.eq.s32.totalorder %s6056_s29, 0  ;;  %s5880_s21 = smov [#allocation8]  }
  0xb3   : > { %s592_s26 = sshll.u32 %s5880_s21, 4  ;;  %s4289_s6 = sshll.u32 %s6153_s20, 9  ;;  %s593_s26 = int_to_ptr.vmem [resolvable:$true] %s592_s26 }
  0xb4   : > { %p6262_p2 = pnand %p4720_p5, %p6952_p12  ;;  %s5580_s23 = scalar_lea.vmem %s6243_s0, 3072 }
  0xb5   : > { %p5581_p1 = scmp.ne.s32.totalorder %s6243_s0, %s5580_s23  ;;  %p5588_p0 = scmp.lt.s32.totalorder %s6243_s0, %s6243_s0 }
  0xb6   : > { %p5571_p10 = pneg %p6262_p2  ;;  %p5589_p5 = scmp.lt.s32.totalorder %s5580_s23, %s5580_s23 }
  0xb8   : > { %p5583_p9 = pnand %p5581_p1, %p5571_p10  ;;  %p5590_p12 = por %p5589_p5, %p5588_p0 }
  0xba   : > { %p5584_p11 = pneg %p5583_p9 }
  0xbc   : > { %p5591_p8 = pnand %p5590_p12, %p5584_p11 }
  0xbe   : > { %5594 = shalt.err (!%p5591_p8)
}
  0xbf   : > { %s6954_s25 = sld [smem:[#allocation44_spill]]  ;;  %s5606_s22 = scalar_lea.vmem %s593_s26, 32 }
  0xc0   : > { %p5607_p1 = scmp.ne.s32.totalorder %s593_s26, %s5606_s22  ;;  %p5614_p0 = scmp.lt.s32.totalorder %s593_s26, %s593_s26 }
  0xc1   : > { %p5615_p11 = scmp.lt.s32.totalorder %s5606_s22, %s5606_s22 }
  0xc2   : > { %p5609_p9 = pnand %p5607_p1, %p5571_p10 }
  0xc3   : > { %p5616_p8 = por %p5615_p11, %p5614_p0 }
  0xc4   : > { %p5610_p13 = pneg %p5609_p9 }
  0xc5   : > { %4723 = dma.hbm_to_vmem [thread:$0]  (!%p6262_p2), %s6954_s25, 3072, %s6243_s0, [#allocation7], %s6897_s19, %s6897_s19, %s6901_s16  }
  0xc6   : > { %p5617_p5 = pnand %p5616_p8, %p5610_p13 }
  0xc8   : > { %5620 = shalt.err (!%p5617_p5)
}
  0xc9   : > { %s6955_s15 = sld [smem:[#allocation45_spill]]  ;;  %s4622_s0 = sshll.u32 %s5857_s27, 13 }
  0xca   : > { %s809_s23 = scalar_lea.hbm %s6869_s12, %s4622_s0  ;;  %s803_s3 = scalar_lea.vmem [#allocation18], %s4289_s6 }
  0xcb   : > { %s810_s5 = sshll.u32 %s803_s3, 4  ;;  %s5881_s22 = smov [#allocation18]   ;;  %s811_s5 = int_to_ptr.vmem [resolvable:$true] %s810_s5 }
  0xcc   : > { %s5634_s25 = scalar_lea.vmem %s811_s5, 8192  ;;  %s5639_s24 = sshll.u32 %s5881_s22, 4  ;;  %s5640_s24 = int_to_ptr.vmem [resolvable:$false] %s5639_s24 }
  0xcd   : > { %p5635_p13 = scmp.ne.s32.totalorder %s811_s5, %s5634_s25  ;;  %s5641_s30 = scalar_lea.vmem %s5640_s24, 16384 }
  0xce   : > { %p5642_p9 = scmp.lt.s32.totalorder %s811_s5, %s5640_s24  ;;  %p5643_p0 = scmp.lt.s32.totalorder %s5641_s30, %s5634_s25 }
  0xcf   : > { %4726 = dma.hbm_to_vmem [thread:$0]  (!%p6262_p2), %s6955_s15, 32, %s593_s26, [#allocation7]  }
  0xd0   : > { %p5637_p12 = pnand %p5635_p13, %p6175_p6  ;;  %p5644_p11 = por %p5643_p0, %p5642_p9 }
  0xd2   : > { %p5638_p1 = pneg %p5637_p12 }
  0xd4   : > { %p5645_p8 = pnand %p5644_p11, %p5638_p1 }
  0xd6   : > { %5648 = shalt.err (!%p5645_p8)
}
  0xd7   : > { %s5882_s26 = smov 256   ;;  %s5883_s15 = smov 16  }
  0xd8   : > { %4760 = dma.hbm_to_vmem [thread:$0]  (!%p6148_p4), %s809_s23, 8192, %s811_s5, %s6155_s28, %s5882_s26, %s5882_s26, %s5883_s15  }
  0xd9   : > { %s5884_s7 = smov [#allocation9]   ;;  %s5885_s3 = smov [#allocation20]  }
  0xda   : > { %s603_s21 = sshll.u32 %s5884_s7, 4  ;;  %s619_s19 = sshll.u32 %s5885_s3, 4  ;;  %s604_s21 = int_to_ptr.vmem [resolvable:$true] %s603_s21  ;;  %s620_s19 = int_to_ptr.vmem [resolvable:$true] %s619_s19 }
  0xdb   : > { %s5660_s22 = scalar_lea.vmem %s604_s21, 256  ;;  %p5668_p1 = scmp.lt.s32.totalorder %s604_s21, %s604_s21 }
  0xdc   : > { %p5661_p5 = scmp.ne.s32.totalorder %s604_s21, %s5660_s22  ;;  %p5669_p9 = scmp.lt.s32.totalorder %s5660_s22, %s5660_s22 }
  0xde   : > { %p5663_p13 = pnand %p5661_p5, %p5571_p10  ;;  %p5670_p0 = por %p5669_p9, %p5668_p1 }
  0xe0   : > { %p5664_p12 = pneg %p5663_p13 }
  0xe2   : > { %p5671_p11 = pnand %p5670_p0, %p5664_p12 }
  0xe4   : > { %5674 = shalt.err (!%p5671_p11)
}
  0xe5   : > { %s6956_s5 = sld [smem:[#allocation46_spill]]  ;;  %s5686_s24 = scalar_lea.vmem %s620_s19, 2048 }
  0xe6   : > { %p5687_p8 = scmp.ne.s32.totalorder %s620_s19, %s5686_s24  ;;  %p5694_p13 = scmp.lt.s32.totalorder %s620_s19, %s620_s19 }
  0xe7   : > { %p5695_p3 = scmp.lt.s32.totalorder %s5686_s24, %s5686_s24 }
  0xe8   : > { %p5689_p7 = pnand %p5687_p8, %p5571_p10 }
  0xe9   : > { %p5696_p4 = por %p5695_p3, %p5694_p13 }
  0xea   : > { %p5690_p5 = pneg %p5689_p7 }
  0xeb   : > { %4729 = dma.hbm_to_vmem [thread:$0]  (!%p6262_p2), %s6956_s5, 256, %s604_s21, [#allocation10]  }
  0xec   : > { %p5697_p1 = pnand %p5696_p4, %p5690_p5 }
  0xee   : > { %5700 = shalt.err (!%p5697_p1)
}
  0xef   : > { %s5886_s30 = smov 64   ;;  %s5887_s26 = smov 4  }
  0xf0   : > { %4732 = dma.hbm_to_vmem [thread:$0]  (!%p6262_p2), %s6875_s18, 2048, %s620_s19, [#allocation7], %s5886_s30, %s5886_s30, %s5887_s26  }
  0xf1   : > { %s6957_s22 = sld [smem:[#allocation55_spill]]  ;;  %s831_s23 = scalar_lea.vmem [#allocation19], %s4289_s6 }
  0xf2   : > { %s838_s5 = sshll.u32 %s831_s23, 4  ;;  %s5888_s16 = smov [#allocation19]   ;;  %s839_s5 = int_to_ptr.vmem [resolvable:$true] %s838_s5 }
  0xf3   : > { %s5714_s24 = scalar_lea.vmem %s839_s5, 8192  ;;  %s5719_s13 = sshll.u32 %s5888_s16, 4  ;;  %s5720_s13 = int_to_ptr.vmem [resolvable:$false] %s5719_s13 }
  0xf4   : > { %p5715_p7 = scmp.ne.s32.totalorder %s839_s5, %s5714_s24  ;;  %s5721_s8 = scalar_lea.vmem %s5720_s13, 16384 }
  0xf5   : > { %p5722_p10 = scmp.lt.s32.totalorder %s839_s5, %s5720_s13  ;;  %p5723_p2 = scmp.lt.s32.totalorder %s5721_s8, %s5714_s24 }
  0xf6   : > { %p5717_p4 = pnand %p5715_p7, %p6175_p6 }
  0xf7   : > { %s837_s25 = scalar_lea.hbm %s6957_s22, %s4622_s0  ;;  %p5724_p12 = por %p5723_p2, %p5722_p10 }
  0xf8   : > { %p5718_p3 = pneg %p5717_p4 }
  0xfa   : > { %p5725_p9 = pnand %p5724_p12, %p5718_p3 }
  0xfc   : > { %5728 = shalt.err (!%p5725_p9)
}
  0xfd   : > { %p6958_p0 = scmp.ne.s32.totalorder %s6943_s17, 0  ;;  %s6959_s20 = smov 8  }
  0xfe   : > { %s6960_s19 = smov 128   ;;  %p6961_p11 = scmp.ne.s32.totalorder %s6951_s1, 0 }
  0xff   : > { %4763 = dma.hbm_to_vmem [thread:$0]  (!%p6958_p0), %s837_s25, 8192, %s839_s5, %s6155_s28, %s6960_s19, %s6960_s19, %s6959_s20  }
 0x100   : > { %857 = sbr.rel (%p6961_p11) target bundleno = 3283 (0xcd3), region = 100  ;;  %s6962_s14 = sld [smem:[#allocation37_spill]] (!%p6961_p11) }
 0x101   : > { %s859_s16 = sand.u32 (!%p6961_p11), 1, %s6056_s29   ;;  %s6341_s6 = sand.u32 (!%p6961_p11), 1, %s5841_s2  }
 0x102   : > { %s4296_s8 = sshll.u32 (!%p6961_p11), %s6341_s6, 3  ;;  %s860_s0 = scalar_lea.sflag (!%p6961_p11), [#allocation4], %s859_s16 }
 0x103   : > { %s6344_s30 = scalar_lea.vmem (!%p6961_p11), [#allocation3], %s4296_s8 }
 0x106   : > { %p6963_p6 = scmp.ne.s32.totalorder %s6962_s14, 0 }
 0x108   : > { %5800 = dma.done.wait (%p6963_p6), %s860_s0, 128  }
 0x109   : > { %5802 = vsyncadd (%p6963_p6), %s860_s0, 4294967168  ;;  %p6964_p8 = scmp.eq.s32.totalorder %s6056_s29, 0 }
 0x10b   : > { %5804 = dma.done.wait (%p6964_p8), [#allocation7], 3104   ;;  %p6965_p5 = pmov %p6964_p8 }
 0x10d   : > { %5806 = vsyncadd (%p6965_p5), [#allocation7], 4294964192  ;;  %p6966_p13 = pmov %p6965_p5 }
 0x10e   : > { %p6967_p1 = pmov %p6965_p5 }
 0x10f   : > { %5808 = dma.done.wait (%p6966_p13), [#allocation10], 256  }
 0x110   : > { %5810 = vsyncadd (%p6967_p1), [#allocation10], 4294967040  ;;  %s6968_s28 = sld [smem:[#allocation28_spill]] }
 0x111   : > { %s6969_s17 = sld [smem:[#allocation40_spill]] }
 0x116   : > { %s882_s1 = sand.u32 1, %s6968_s28  }
 0x117   : > { %s6359_s26 = sshll.u32 %s882_s1, 1  ;;  %p6970_p7 = scmp.ne.s32.totalorder %s6969_s17, 0 }
 0x119   : > { %5812 = dma.done.wait (%p6970_p7), %s860_s0, 32928  }
 0x11a   : > { %5814 = vsyncadd (%p6970_p7), %s860_s0, 4294934368  ;;  %s4680_s7 = smul.u32 768, %s882_s1  ;;  %s4302_s21 = sshll.u32 %s882_s1, 8 }
 0x11b   : > { %s4306_s3 = sshll.u32 %s882_s1, 9  ;;  %s6369_s23 = scalar_lea.vmem [#allocation14], %s4302_s21 }
 0x11c   : > { %s6367_s25 = scalar_lea.vmem [#allocation13], %s4680_s7  ;;  %s6374_s20 = scalar_lea.vmem [#allocation18], %s4306_s3 }
 0x11d   : > { %s6376_s19 = scalar_lea.vmem [#allocation19], %s4306_s3  ;;  %p6971_p4 = pmov %p6967_p1 }
 0x11e   : > { %p6972_p3 = pmov %p6967_p1 }
 0x11f   : > { %5816 = dma.done.wait (%p6971_p4), [#allocation7], 2048  }
 0x120   : > { %5818 = vsyncadd (%p6972_p3), [#allocation7], 4294965248  ;;  %s6973_s14 = sld [smem:[#allocation32_spill]]  ;;  %s1072_s10 = scalar_lea.vmem [#allocation21], %s6341_s6 }
 0x121   : > { %s6974_s1 = sld [smem:[#allocation54_spill]] }
 0x122   : > { %s6975_s24 = sld [smem:[#allocation50_spill]] }
 0x123   : > { %s6976_s15 = sld [smem:[#allocation56_spill]] }
 0x126   : > { %p1073_p10 = scmp.lt.s32.totalorder %s6973_s14, 1  ;;  %p4311_p2 = scmp.ne.s32.totalorder %s6973_s14, 0 }
 0x128   : > { %s1074_s16 = scalar_select %p1073_p10, %s6973_s14, 1 }
 0x129   : > { %1089 = sbr.rel (%p4311_p2) target bundleno = 553 (0x229), region = 160 }
 0x12a   : > { %s4681_s8 = smul.u32 6, %s1074_s16  ;;  %s4309_s0 = sshll.u32 %s1074_s16, 2 }
 0x12b   : > { %s6387_s7 = scalar_lea.vmem %s6974_s1, %s4309_s0  ;;  %s4310_s21 = sshll.u32 %s1074_s16, 1 }
 0x12c   : > { %s6392_s5 = scalar_lea.vmem %s6975_s24, %s4681_s8  ;;  %s6397_s9 = scalar_lea.vmem %s6976_s15, %s4310_s21 }
 0x12e   : > { %v4883_v0 = vld [vmem:[#allocation6 + $0x74] ss:$8 sps:$4 sm:$0xff]   ;;  %v4885_v1 = vld [vmem:[#allocation6 + $0x70] ss:$8 sps:$4 sm:$0xff]   ;;  %v4886_v2 = vld [vmem:[#allocation6 + $0x64] ss:$8 sps:$4 sm:$0xff]   ;;  %v1122_v28 = vlaneseq }
 0x12f   : > { %1256 = vmatprep.subr.bf16.mxu0 %v4883_v0  ;;  %v4888_v3 = vld [vmem:[#allocation6 + $0x60] ss:$8 sps:$4 sm:$0xff]   ;;  %v4889_v4 = vld [vmem:[#allocation6 + $0x54] ss:$8 sps:$4 sm:$0xff]   ;;  %v4891_v5 = vld [vmem:[#allocation6 + $0x50] ss:$8 sps:$4 sm:$0xff]  }
 0x130   : > { %1257 = vmatpush1.bf16.msra.mxu0 %v4885_v1  ;;  %v4892_v6 = vld [vmem:[#allocation6 + $0x44] ss:$8 sps:$4 sm:$0xff]   ;;  %v4894_v7 = vld [vmem:[#allocation6 + $0x40] ss:$8 sps:$4 sm:$0xff]   ;;  %v4895_v8 = vld [vmem:[#allocation6 + $0x34] ss:$8 sps:$4 sm:$0xff]  }
 0x131   : > { %1258 = vmatprep.subr.bf16.mxu0 %v4886_v2  ;;  %v4897_v9 = vld [vmem:[#allocation6 + $0x30] ss:$8 sps:$4 sm:$0xff]   ;;  %v4898_v10 = vld [vmem:[#allocation6 + $0x24] ss:$8 sps:$4 sm:$0xff]   ;;  %vm1252_vm0 = vcmask 523264   ;;  %v1123_v31 = vshrl.u32 %v1122_v28, 7 }
 0x132   : > { %v1090_v11 = vld [vmem:[%s6344_s30] sm:$0xff]  ;;  %v4900_v13 = vld [vmem:[#allocation6 + $0x20] ss:$8 sps:$4 sm:$0xff]   ;;  %v4904_v17 = vld [vmem:[#allocation6 + $0x4] ss:$8 sps:$4 sm:$0xff]   ;;  %vm1319_vm1 = vcmp.lt.s32.totalorder %v1122_v28, 256 }
 0x133   : > { %v1092_v12 = vcombine.high %v1090_v11, %v1090_v11  ;;  %v4901_v15 = vld [vmem:[#allocation6 + $0x14] ss:$8 sps:$4 sm:$0xff]   ;;  %v4903_v16 = vld [vmem:[#allocation6 + $0x10] ss:$8 sps:$4 sm:$0xff]   ;;  %v4906_v18 = vld [vmem:[#allocation6] ss:$8 sps:$4 sm:$0xff]   ;;  %v1094_v27 = vpack.c.bf16 %v1090_v11, %v1090_v11 }
 0x134   : > { %1259 = vmatpush1.bf16.msra.mxu0 %v4888_v3  ;;  %v4907_v19 = vld [vmem:[#allocation6 + $0xb4] ss:$8 sps:$4 sm:$0xff]   ;;  %v4909_v20 = vld [vmem:[#allocation6 + $0xb0] ss:$8 sps:$4 sm:$0xff]   ;;  %v4910_v21 = vld [vmem:[#allocation6 + $0xa4] ss:$8 sps:$4 sm:$0xff]  }
 0x135   : > { %1260 = vmatprep.subr.bf16.mxu0 %v4889_v4  ;;  %v1095_v14 = vpack.c.bf16 %v1092_v12, %v1092_v12  ;;  %v4912_v22 = vld [vmem:[#allocation6 + $0xa0] ss:$8 sps:$4 sm:$0xff]   ;;  %v4913_v23 = vld [vmem:[#allocation6 + $0x94] ss:$8 sps:$4 sm:$0xff]   ;;  %v4915_v24 = vld [vmem:[#allocation6 + $0x90] ss:$8 sps:$4 sm:$0xff]  }
 0x136   : > { %v4916_v25 = vld [vmem:[#allocation6 + $0x84] ss:$8 sps:$4 sm:$0xff]   ;;  %v4918_v26 = vld [vmem:[#allocation6 + $0x80] ss:$8 sps:$4 sm:$0xff]   ;;  %v5889_v29 = vmov 1966171168  }
 0x137   : > { %4336 = vmatprep.mubr.msk.bf16.mxu0 %vm1252_vm0, %v1095_v14  ;;  %v1303_v30 = vunpack.c.l.s4 %v5889_v29  ;;  %v1297_v33 = vld [vmem:[#allocation9] sm:$0x1f]  ;;  %v1298_v34 = vld [vmem:[#allocation9 + $0x8] sm:$0x1f]  ;;  %v1124_v39 = vsub.s32 0, %v1123_v31  ;;  %v1128_v41 = vsub.s32 1, %v1123_v31 }
 0x138   : > { %1261 = vmatpush1.bf16.msra.mxu0 %v4891_v5  ;;  %v1301_v35 = vcombine.low %v1297_v33, %v1298_v34  ;;  %v1120_v40 = vld [vmem:[#allocation8] sm:$0x3]  ;;  %v1323_v43 = vrot.slane %v1297_v33, 1  ;;  %v1324_v47 = vrot.slane %v1298_v34, 1 }
 0x139   : > { %1262 = vmatprep.subr.bf16.mxu0 %v4892_v6  ;;  %v1304_v32 = vunpack.c.0.s8 %v1303_v30  ;;  %v1125_v42 = vrot.slane %v1120_v40, %v1124_v39  ;;  %v1129_v44 = vrot.slane %v1120_v40, %v1128_v41 }
 0x13b   : > { %v1307_v36 = vsub.s32 %v1304_v32, %v1123_v31 }
 0x13c   : > { %1263 = vmatpush1.bf16.msra.mxu0 %v4894_v7 }
 0x13d   : > { %1264 = vmatprep.subr.bf16.mxu0 %v4895_v8  ;;  %v1308_v37 = vrot.slane %v1301_v35, %v1307_v36 }
 0x13f   : > { %v1315_v38 = vrot.slane %v1308_v37, %v1307_v36 }
 0x140   : > { %1265 = vmatpush1.bf16.msra.mxu0 %v4897_v9 }
 0x141   : > { %1266 = vmatprep.subr.bf16.mxu0 %v4898_v10  ;;  %1321 = vst.msk [vmem:[#allocation2] ss:$8 sm:$0x3] %vm1319_vm1, %v1315_v38 }
 0x144   : > { %1267 = vmatpush1.bf16.msra.mxu0 %v4900_v13 }
 0x145   : > { %1268 = vmatprep.subr.bf16.mxu0 %v4901_v15 }
 0x148   : > { %1269 = vmatpush1.bf16.msra.mxu0 %v4903_v16 }
 0x149   : > { %1270 = vmatprep.subr.bf16.mxu0 %v4904_v17 }
 0x14c   : > { %1271 = vmatpush1.bf16.msra.mxu0 %v4906_v18 }
 0x14d   : > { %1280 = vmatprep.subr.bf16.mxu0 %v4907_v19 }
 0x150   : > { %1281 = vmatpush2.bf16.msra.mxu0 %v4909_v20 }
 0x151   : > { %1282 = vmatprep.subr.bf16.mxu0 %v4910_v21 }
 0x154   : > { %1283 = vmatpush2.bf16.msra.mxu0 %v4912_v22 }
 0x155   : > { %1284 = vmatprep.subr.bf16.mxu0 %v4913_v23 }
 0x158   : > { %1285 = vmatpush2.bf16.msra.mxu0 %v4915_v24 }
 0x159   : > { %1286 = vmatprep.subr.bf16.mxu0 %v4916_v25 }
 0x15c   : > { %1287 = vmatpush2.bf16.msra.mxu0 %v4918_v26 }
 0x15f   : > { %1289 = vmatmul.mubr.bf16.vlgmr.msra.gmra.mxu0 %v1094_v27 }
 0x21f   : > { %v1290_v45 = vpop.f32.mrf.mxu0 }
 0x220   : > { %v1291_v46 = vadd.f32 %v1290_v45, %v1125_v42 }
 0x221   : > { %v1292_v48 = vpop.f32.mrf.mxu0 }
 0x222   : > { %v1327_v49 = vadd.f32 %v1323_v43, %v1291_v46  ;;  %v1293_v50 = vadd.f32 %v1292_v48, %v1129_v44 }
 0x223   : > { %v1294_v51 = vpop.f32.mrf.mxu0 }
 0x224   : > { %v1331_v52 = vrot.slane %v1327_v49, 7  ;;  %v1328_v53 = vadd.f32 %v1324_v47, %v1293_v50 }
 0x225   : > { %v1295_v54 = vpop.f32.mrf.mxu0 }
 0x226   : > { %1335 = vst [vmem:[#allocation2] sm:$0x1e] %v1331_v52  ;;  %v1332_v55 = vrot.slane %v1328_v53, 7 }
 0x228   : > { %1336 = vst [vmem:[#allocation2 + $0x8] sm:$0x1e] %v1332_v55 }
 0x229 PF: > { %vm1341_vm2 = vcmask 1044480   ;;  %v4921_v61 = vld [vmem:[%s6367_s25 + $0x154] ss:$24 sps:$4 sm:$0xff]   ;;  %v4923_v62 = vld [vmem:[%s6367_s25 + $0x150] ss:$24 sps:$4 sm:$0xff]   ;;  %s6977_s30 = scalar_lea.vmem [#allocation11], %s6359_s26 }
 0x22a   : > { %v4924_v63 = vld [vmem:[%s6367_s25 + $0x15c] ss:$24 sps:$4 sm:$0xff]   ;;  %v4926_v0 = vld [vmem:[%s6367_s25 + $0x158] ss:$24 sps:$4 sm:$0xff]   ;;  %1999 = vmatprep.subr.bf16.mxu0 %v4921_v61  ;;  %v4930_v2 = vld [vmem:[%s6367_s25 + $0x12c] ss:$24 sps:$4 sm:$0xff]  }
 0x22b   : > { %v4927_v1 = vld [vmem:[%s6367_s25 + $0x124] ss:$24 sps:$4 sm:$0xff]   ;;  %2040 = vmatprep.subr.bf16.mxu1 %v4924_v63  ;;  %2000 = vmatpush1.bf16.msra.mxu0 %v4923_v62  ;;  %v4929_v3 = vld [vmem:[%s6367_s25 + $0x120] ss:$24 sps:$4 sm:$0xff]   ;;  %v4933_v5 = vld [vmem:[%s6367_s25 + $0xf4] ss:$24 sps:$4 sm:$0xff]  }
 0x22c   : > { %2041 = vmatpush1.bf16.msra.mxu1 %v4926_v0  ;;  %v4932_v4 = vld [vmem:[%s6367_s25 + $0x128] ss:$24 sps:$4 sm:$0xff]   ;;  %2001 = vmatprep.subr.bf16.mxu0 %v4927_v1  ;;  %v4936_v6 = vld [vmem:[%s6367_s25 + $0xfc] ss:$24 sps:$4 sm:$0xff]   ;;  %v4938_v8 = vld [vmem:[%s6367_s25 + $0xf8] ss:$24 sps:$4 sm:$0xff]  }
 0x22d   : > { %v6402_v56 = vld [vmem:[#allocation2] sm:$0x1f]  ;;  %2042 = vmatprep.subr.bf16.mxu1 %v4930_v2  ;;  %v4941_v11 = vld [vmem:[%s6367_s25 + $0xc0] ss:$24 sps:$4 sm:$0xff]   ;;  %v4945_v13 = vld [vmem:[%s6367_s25 + $0x94] ss:$24 sps:$4 sm:$0xff]  }
 0x22e   : > { %v1342_v58 = vsel %vm1341_vm2, %v6402_v56, 0.0  ;;  %v4935_v7 = vld [vmem:[%s6367_s25 + $0xf0] ss:$24 sps:$4 sm:$0xff]   ;;  %v4939_v9 = vld [vmem:[%s6367_s25 + $0xc4] ss:$24 sps:$4 sm:$0xff]   ;;  %s6978_s15 = scalar_lea.vmem [#allocation12], %s6359_s26 }
 0x22f   : > { %v6404_v57 = vld [vmem:[#allocation2 + $0x8] sm:$0x1f]  ;;  %2002 = vmatpush1.bf16.msra.mxu0 %v4929_v3  ;;  %v4944_v12 = vld [vmem:[%s6367_s25 + $0xc8] ss:$24 sps:$4 sm:$0xff]   ;;  %v4948_v14 = vld [vmem:[%s6367_s25 + $0x9c] ss:$24 sps:$4 sm:$0xff]  }
 0x230   : > { %v1343_v59 = vsel %vm1341_vm2, %v6404_v57, 0.0  ;;  %2043 = vmatpush1.bf16.msra.mxu1 %v4932_v4  ;;  %2003 = vmatprep.subr.bf16.mxu0 %v4933_v5  ;;  %v4942_v10 = vld [vmem:[%s6367_s25 + $0xcc] ss:$24 sps:$4 sm:$0xff]   ;;  %v4947_v15 = vld [vmem:[%s6367_s25 + $0x90] ss:$24 sps:$4 sm:$0xff]   ;;  %vm5891_vm3 = vmmov 0  }
 0x231   : > { %v1344_v60 = vadd.f32 %v1343_v59, %v1342_v58  ;;  %2044 = vmatprep.subr.bf16.mxu1 %v4936_v6  ;;  %v4950_v16 = vld [vmem:[%s6367_s25 + $0x98] ss:$24 sps:$4 sm:$0xff]   ;;  %v4951_v17 = vld [vmem:[%s6367_s25 + $0x64] ss:$24 sps:$4 sm:$0xff]   ;;  %v4956_v20 = vld [vmem:[%s6367_s25 + $0x68] ss:$24 sps:$4 sm:$0xff]  }
 0x232   : > { %v4954_v18 = vld [vmem:[%s6367_s25 + $0x6c] ss:$24 sps:$4 sm:$0xff]   ;;  %v4953_v19 = vld [vmem:[%s6367_s25 + $0x60] ss:$24 sps:$4 sm:$0xff]   ;;  %v4960_v22 = vld [vmem:[%s6367_s25 + $0x3c] ss:$24 sps:$4 sm:$0xff]  }
 0x233   : > { %1345 = vadd.xlane.f32.xlu0 %v1344_v60  ;;  %2004 = vmatpush1.bf16.msra.mxu0 %v4935_v7  ;;  %v4957_v21 = vld [vmem:[%s6367_s25 + $0x34] ss:$24 sps:$4 sm:$0xff]   ;;  %v4959_v23 = vld [vmem:[%s6367_s25 + $0x30] ss:$24 sps:$4 sm:$0xff]   ;;  %v4963_v25 = vld [vmem:[%s6367_s25 + $0x4] ss:$24 sps:$4 sm:$0xff]  }
 0x234   : > { %2045 = vmatpush1.bf16.msra.mxu1 %v4938_v8  ;;  %2005 = vmatprep.subr.bf16.mxu0 %v4939_v9  ;;  %v4962_v24 = vld [vmem:[%s6367_s25 + $0x38] ss:$24 sps:$4 sm:$0xff]   ;;  %v4966_v26 = vld [vmem:[%s6367_s25 + $0xc] ss:$24 sps:$4 sm:$0xff]   ;;  %v4968_v28 = vld [vmem:[%s6367_s25 + $0x8] ss:$24 sps:$4 sm:$0xff]  }
 0x235   : > { %2046 = vmatprep.subr.bf16.mxu1 %v4942_v10  ;;  %v4965_v27 = vld [vmem:[%s6367_s25] ss:$24 sps:$4 sm:$0xff]   ;;  %v4969_v29 = vld [vmem:[%s6367_s25 + $0x2d4] ss:$24 sps:$4 sm:$0xff]   ;;  %v4971_v31 = vld [vmem:[%s6367_s25 + $0x2d0] ss:$24 sps:$4 sm:$0xff]   ;;  %v1364_v10 = vlaneseq }
 0x236   : > { %v4972_v30 = vld [vmem:[%s6367_s25 + $0x2dc] ss:$24 sps:$4 sm:$0xff]   ;;  %v4974_v32 = vld [vmem:[%s6367_s25 + $0x2d8] ss:$24 sps:$4 sm:$0xff]   ;;  %v4978_v34 = vld [vmem:[%s6367_s25 + $0x2ac] ss:$24 sps:$4 sm:$0xff]  }
 0x237   : > { %2006 = vmatpush1.bf16.msra.mxu0 %v4941_v11  ;;  %v4975_v33 = vld [vmem:[%s6367_s25 + $0x2a4] ss:$24 sps:$4 sm:$0xff]   ;;  %v4977_v35 = vld [vmem:[%s6367_s25 + $0x2a0] ss:$24 sps:$4 sm:$0xff]   ;;  %v4981_v46 = vld [vmem:[%s6367_s25 + $0x274] ss:$24 sps:$4 sm:$0xff]  }
 0x238   : > { %2047 = vmatpush1.bf16.msra.mxu1 %v4944_v12  ;;  %2007 = vmatprep.subr.bf16.mxu0 %v4945_v13  ;;  %v4980_v45 = vld [vmem:[%s6367_s25 + $0x2a8] ss:$24 sps:$4 sm:$0xff]   ;;  %v4984_v48 = vld [vmem:[%s6367_s25 + $0x27c] ss:$24 sps:$4 sm:$0xff]   ;;  %v4986_v49 = vld [vmem:[%s6367_s25 + $0x278] ss:$24 sps:$4 sm:$0xff]  }
 0x239   : > { %2048 = vmatprep.subr.bf16.mxu1 %v4948_v14  ;;  %v4983_v47 = vld [vmem:[%s6367_s25 + $0x270] ss:$24 sps:$4 sm:$0xff]   ;;  %v4987_v50 = vld [vmem:[%s6367_s25 + $0x244] ss:$24 sps:$4 sm:$0xff]   ;;  %v4989_v51 = vld [vmem:[%s6367_s25 + $0x240] ss:$24 sps:$4 sm:$0xff]  }
 0x23a   : > { %v4990_v52 = vld [vmem:[%s6367_s25 + $0x24c] ss:$24 sps:$4 sm:$0xff]   ;;  %v4992_v53 = vld [vmem:[%s6367_s25 + $0x248] ss:$24 sps:$4 sm:$0xff]   ;;  %v4996_v55 = vld [vmem:[%s6367_s25 + $0x21c] ss:$24 sps:$4 sm:$0xff]  }
 0x23b   : > { %2008 = vmatpush1.bf16.msra.mxu0 %v4947_v15  ;;  %v4993_v54 = vld [vmem:[%s6367_s25 + $0x214] ss:$24 sps:$4 sm:$0xff]   ;;  %v4999_v58 = vld [vmem:[%s6367_s25 + $0x1e4] ss:$24 sps:$4 sm:$0xff]   ;;  %v5001_v60 = vld [vmem:[%s6367_s25 + $0x1e0] ss:$24 sps:$4 sm:$0xff]  }
 0x23c   : > { %2049 = vmatpush1.bf16.msra.mxu1 %v4950_v16  ;;  %2009 = vmatprep.subr.bf16.mxu0 %v4951_v17  ;;  %v5002_v59 = vld [vmem:[%s6367_s25 + $0x1ec] ss:$24 sps:$4 sm:$0xff]   ;;  %v5004_v61 = vld [vmem:[%s6367_s25 + $0x1e8] ss:$24 sps:$4 sm:$0xff]   ;;  %v5008_v63 = vld [vmem:[%s6367_s25 + $0x1bc] ss:$24 sps:$4 sm:$0xff]  }
 0x23d   : > { %2050 = vmatprep.subr.bf16.mxu1 %v4954_v18  ;;  %v5005_v62 = vld [vmem:[%s6367_s25 + $0x1b4] ss:$24 sps:$4 sm:$0xff]   ;;  %v5007_v0 = vld [vmem:[%s6367_s25 + $0x1b0] ss:$24 sps:$4 sm:$0xff]   ;;  %v5011_v2 = vld [vmem:[%s6367_s25 + $0x184] ss:$24 sps:$4 sm:$0xff]  }
 0x23e   : > { %v5010_v1 = vld [vmem:[%s6367_s25 + $0x1b8] ss:$24 sps:$4 sm:$0xff]   ;;  %v5014_v3 = vld [vmem:[%s6367_s25 + $0x18c] ss:$24 sps:$4 sm:$0xff]   ;;  %v5016_v5 = vld [vmem:[%s6367_s25 + $0x188] ss:$24 sps:$4 sm:$0xff]  }
 0x23f   : > { %2010 = vmatpush1.bf16.msra.mxu0 %v4953_v19  ;;  %v5013_v4 = vld [vmem:[%s6367_s25 + $0x180] ss:$24 sps:$4 sm:$0xff]   ;;  %v5019_v6 = vld [vmem:[%s6367_s25 + $0x164] ss:$24 sps:$4 sm:$0xff]   ;;  %v6487_v11 = vshrl.u32 %v1364_v10, 7  ;;  %vm2239_vm4 = vcmask 1041408  }
 0x240   : > { %2051 = vmatpush1.bf16.msra.mxu1 %v4956_v20  ;;  %2011 = vmatprep.subr.bf16.mxu0 %v4957_v21  ;;  %v1339_v14 = vld [vmem:[%s6977_s30] sm:$0x3]  ;;  %v1340_v15 = vld [vmem:[%s6978_s15] sm:$0x3]  ;;  %vm2240_vm5 = vcmask 1042432   ;;  %vm2208_vm6 = vcmask 36864  }
 0x241   : > { %2052 = vmatprep.subr.bf16.mxu1 %v4960_v22  ;;  %v6490_v12 = vsub.s32 1, %v6487_v11  ;;  %v6493_v13 = vsub.s32 0, %v6487_v11  ;;  %vm2235_vm7 = vcmask 39936   ;;  %s6979_s22 = scalar_lea.vmem [#allocation15], %s6359_s26 }
 0x243   : > { %2012 = vmatpush1.bf16.msra.mxu0 %v4959_v23  ;;  %v1371_v16 = vrot.slane %v1339_v14, %v6490_v12  ;;  %v1367_v17 = vrot.slane %v1339_v14, %v6493_v13  ;;  %v1384_v20 = vrot.slane %v1340_v15, %v6490_v12  ;;  %v1380_v22 = vrot.slane %v1340_v15, %v6493_v13 }
 0x244   : > { %2053 = vmatpush1.bf16.msra.mxu1 %v4962_v24  ;;  %2013 = vmatprep.subr.bf16.mxu0 %v4963_v25 }
 0x245   : > { %2054 = vmatprep.subr.bf16.mxu1 %v4966_v26 }
 0x247   : > { %2014 = vmatpush1.bf16.msra.mxu0 %v4965_v27 }
 0x248   : > { %2055 = vmatpush1.bf16.msra.mxu1 %v4968_v28  ;;  %2015 = vmatprep.subr.bf16.mxu0 %v4969_v29  ;;  %v5017_v28 = vld [vmem:[%s6367_s25 + $0x160] ss:$24 sps:$4 sm:$0xff]  }
 0x249   : > { %2056 = vmatprep.subr.bf16.mxu1 %v4972_v30  ;;  %v5022_v30 = vld [vmem:[%s6367_s25 + $0x134] ss:$24 sps:$4 sm:$0xff]  }
 0x24b   : > { %2016 = vmatpush2.bf16.msra.mxu0 %v4971_v31  ;;  %v5020_v31 = vld [vmem:[%s6367_s25 + $0x130] ss:$24 sps:$4 sm:$0xff]  }
 0x24c   : > { %2057 = vmatpush2.bf16.msra.mxu1 %v4974_v32  ;;  %2017 = vmatprep.subr.bf16.mxu0 %v4975_v33  ;;  %v5025_v32 = vld [vmem:[%s6367_s25 + $0x104] ss:$24 sps:$4 sm:$0xff]   ;;  %v5023_v33 = vld [vmem:[%s6367_s25 + $0x100] ss:$24 sps:$4 sm:$0xff]  }
 0x24d   : > { %2058 = vmatprep.subr.bf16.mxu1 %v4978_v34  ;;  %v5028_v34 = vld [vmem:[%s6367_s25 + $0xd4] ss:$24 sps:$4 sm:$0xff]  }
 0x24f   : > { %2018 = vmatpush2.bf16.msra.mxu0 %v4977_v35  ;;  %v5026_v35 = vld [vmem:[%s6367_s25 + $0xd0] ss:$24 sps:$4 sm:$0xff]  }
 0x250   : > { %2059 = vmatpush2.bf16.msra.mxu1 %v4980_v45  ;;  %2019 = vmatprep.subr.bf16.mxu0 %v4981_v46  ;;  %v5041_v45 = vld [vmem:[%s6367_s25 + $0x2e0] ss:$24 sps:$4 sm:$0xff]   ;;  %v5046_v46 = vld [vmem:[%s6367_s25 + $0x2b4] ss:$24 sps:$4 sm:$0xff]  }
 0x251   : > { %2060 = vmatprep.subr.bf16.mxu1 %v4984_v48  ;;  %v5049_v48 = vld [vmem:[%s6367_s25 + $0x284] ss:$24 sps:$4 sm:$0xff]  }
 0x253   : > { %2020 = vmatpush2.bf16.msra.mxu0 %v4983_v47  ;;  %v5044_v47 = vld [vmem:[%s6367_s25 + $0x2b0] ss:$24 sps:$4 sm:$0xff]  }
 0x254   : > { %2061 = vmatpush2.bf16.msra.mxu1 %v4986_v49  ;;  %2021 = vmatprep.subr.bf16.mxu0 %v4987_v50  ;;  %v5047_v49 = vld [vmem:[%s6367_s25 + $0x280] ss:$24 sps:$4 sm:$0xff]   ;;  %v5052_v50 = vld [vmem:[%s6367_s25 + $0x254] ss:$24 sps:$4 sm:$0xff]  }
 0x255   : > { %2062 = vmatprep.subr.bf16.mxu1 %v4990_v52  ;;  %v5055_v52 = vld [vmem:[%s6367_s25 + $0x224] ss:$24 sps:$4 sm:$0xff]  }
 0x257   : > { %2022 = vmatpush2.bf16.msra.mxu0 %v4989_v51  ;;  %v5050_v51 = vld [vmem:[%s6367_s25 + $0x250] ss:$24 sps:$4 sm:$0xff]  }
 0x258   : > { %2063 = vmatpush2.bf16.msra.mxu1 %v4992_v53  ;;  %2023 = vmatprep.subr.bf16.mxu0 %v4993_v54  ;;  %v5053_v53 = vld [vmem:[%s6367_s25 + $0x220] ss:$24 sps:$4 sm:$0xff]   ;;  %v5058_v54 = vld [vmem:[%s6367_s25 + $0x1f4] ss:$24 sps:$4 sm:$0xff]  }
 0x259   : > { %2064 = vmatprep.subr.bf16.mxu1 %v4996_v55  ;;  %v5056_v55 = vld [vmem:[%s6367_s25 + $0x1f0] ss:$24 sps:$4 sm:$0xff]  }
 0x2bc   : > { %v1346_v36 = vpop.xlane.xlu0 %1345 }
 0x2bd   : > { %v1348_v37 = vmul.f32 0.00390625, %v1346_v36  ;;  %v5031_v36 = vld [vmem:[%s6367_s25 + $0xa4] ss:$24 sps:$4 sm:$0xff]  }
 0x2bf   : > { %v6450_v38 = vsub.f32 %v6402_v56, %v1348_v37  ;;  %v6453_v39 = vsub.f32 %v6404_v57, %v1348_v37  ;;  %v4995_v56 = vld [vmem:[%s6367_s25 + $0x210] ss:$24 sps:$4 sm:$0xff]   ;;  %v5029_v37 = vld [vmem:[%s6367_s25 + $0xa0] ss:$24 sps:$4 sm:$0xff]  }
 0x2c0   : > { %v4998_v57 = vld [vmem:[%s6367_s25 + $0x218] ss:$24 sps:$4 sm:$0xff]   ;;  %2024 = vmatpush2.bf16.msra.mxu0 %v4995_v56  ;;  %v5061_v56 = vld [vmem:[%s6367_s25 + $0x1c4] ss:$24 sps:$4 sm:$0xff]  }
 0x2c1   : > { %v1351_v40 = vmul.f32 %v6450_v38, %v6450_v38  ;;  %v1352_v41 = vmul.f32 %v6453_v39, %v6453_v39  ;;  %2065 = vmatpush2.bf16.msra.mxu1 %v4998_v57  ;;  %2025 = vmatprep.subr.bf16.mxu0 %v4999_v58  ;;  %v5059_v57 = vld [vmem:[%s6367_s25 + $0x1c0] ss:$24 sps:$4 sm:$0xff]   ;;  %v5064_v58 = vld [vmem:[%s6367_s25 + $0x194] ss:$24 sps:$4 sm:$0xff]  }
 0x2c2   : > { %2066 = vmatprep.subr.bf16.mxu1 %v5002_v59  ;;  %v5062_v59 = vld [vmem:[%s6367_s25 + $0x190] ss:$24 sps:$4 sm:$0xff]  }
 0x2c3   : > { %v1353_v42 = vsel %vm1341_vm2, %v1351_v40, 0.0  ;;  %v1354_v43 = vsel %vm1341_vm2, %v1352_v41, 0.0  ;;  %v5037_v40 = vld [vmem:[%s6367_s25 + $0x44] ss:$24 sps:$4 sm:$0xff]   ;;  %v5035_v41 = vld [vmem:[%s6367_s25 + $0x40] ss:$24 sps:$4 sm:$0xff]  }
 0x2c4   : > { %v1355_v44 = vadd.f32 %v1354_v43, %v1353_v42  ;;  %2026 = vmatpush2.bf16.msra.mxu0 %v5001_v60  ;;  %v5040_v42 = vld [vmem:[%s6367_s25 + $0x14] ss:$24 sps:$4 sm:$0xff]   ;;  %v5038_v43 = vld [vmem:[%s6367_s25 + $0x10] ss:$24 sps:$4 sm:$0xff]   ;;  %v5890_v60 = vmov 0.0  }
 0x2c5   : > { %2067 = vmatpush2.bf16.msra.mxu1 %v5004_v61  ;;  %2027 = vmatprep.subr.bf16.mxu0 %v5005_v62  ;;  %v1499_v61 = vsub.s32 2, %v6487_v11  ;;  %v1487_v62 = vld [vmem:[%s6392_s5] sm:$0x3f] }
 0x2c6   : > { %1356 = vadd.xlane.f32.xlu0 %v1355_v44  ;;  %2068 = vmatprep.subr.bf16.mxu1 %v5008_v63  ;;  %v5043_v44 = vld [vmem:[%s6367_s25 + $0x2e4] ss:$24 sps:$4 sm:$0xff]  }
 0x2c7   : > { %v1500_v63 = vrot.slane %v1487_v62, %v1499_v61 }
 0x2c8   : > { %2028 = vmatpush2.bf16.msra.mxu0 %v5007_v0  ;;  %v1503_v0 = vsub.s32 3, %v6487_v11 }
 0x2c9   : > { %2069 = vmatpush2.bf16.msra.mxu1 %v5010_v1  ;;  %2029 = vmatprep.subr.bf16.mxu0 %v5011_v2 }
 0x2ca   : > { %2070 = vmatprep.subr.bf16.mxu1 %v5014_v3 }
 0x2cc   : > { %2030 = vmatpush2.bf16.msra.mxu0 %v5013_v4  ;;  %v1492_v4 = vrot.slane %v1487_v62, %v6493_v13 }
 0x2cd   : > { %2071 = vmatpush2.bf16.msra.mxu1 %v5016_v5  ;;  %2081 = vmatprep.subr.bf16.mxu0 %v5019_v6 }
 0x2ce   : > { %4654 = vmatprep.subr.bf16.mxu1 %v5890_v60 }
 0x34f   : > { %v1357_v7 = vpop.xlane.xlu0 %1356 }
 0x350   : > { %v1358_v8 = vmul.f32 0.00390625, %v1357_v7 }
 0x352   : > { %v1359_v9 = vadd.f32 1e-12, %v1358_v8  ;;  %v1504_v8 = vrot.slane %v1487_v62, %v1503_v0 }
 0x354   : > { %5305 = vrsqrt.f32 %v1359_v9 }
 0x361   : > { %v5306_v18 = vpop.eup %5305 }
 0x362   : > { %v1362_v19 = vmul.f32 %v5306_v18, %v6453_v39  ;;  %v1361_v21 = vmul.f32 %v5306_v18, %v6450_v38  ;;  %v5034_v38 = vld [vmem:[%s6367_s25 + $0x74] ss:$24 sps:$4 sm:$0xff]   ;;  %v5032_v39 = vld [vmem:[%s6367_s25 + $0x70] ss:$24 sps:$4 sm:$0xff]   ;;  %s6980_s25 = scalar_lea.vmem [#allocation16], %s6359_s26 }
 0x364   : > { %v1375_v23 = vmul.f32 %v1371_v16, %v1362_v19  ;;  %v1374_v24 = vmul.f32 %v1367_v17, %v1361_v21  ;;  %v1496_v19 = vrot.slane %v1487_v62, %v6490_v12 }
 0x366   : > { %v1388_v25 = vadd.f32 %v1384_v20, %v1375_v23  ;;  %v1387_v26 = vadd.f32 %v1380_v22, %v1374_v24  ;;  %v1507_v23 = vsub.s32 4, %v6487_v11  ;;  %v1511_v24 = vsub.s32 5, %v6487_v11 }
 0x368   : > { %v1390_v27 = vpack.c.bf16 %v1388_v25, %v1388_v25  ;;  %v6506_v29 = vpack.c.bf16 %v1387_v26, %v1387_v26  ;;  %v1508_v25 = vrot.slane %v1487_v62, %v1507_v23  ;;  %v5892_v26 = vmov 65535  }
 0x36a   : > { %2031 = vmatprep.mubr.bf16.mxu0 %v1390_v27  ;;  %2072 = vmatprep.mubr.bf16.mxu1 %v1390_v27 }
 0x36b   : > { %2032 = vmatmul.mubr.bf16.vlgmr.msra.gmra.mxu0 %v6506_v29  ;;  %2073 = vmatmul.mubr.bf16.vlgmr.msra.gmra.mxu1 %v6506_v29 }
 0x36c   : > { %2082 = vmatpush1.bf16.msra.mxu0 %v5017_v28  ;;  %2113 = vmatprep.mubr.bf16.mxu0 %v1390_v27  ;;  %v2241_v27 = vsel %vm2239_vm4, 4294967295, %v5892_v26  ;;  %v1512_v28 = vrot.slane %v1487_v62, %v1511_v24  ;;  %v5065_v24 = vld [vmem:[%s6369_s23 + $0x70] ss:$8 sps:$4 sm:$0xff]   ;;  %v5070_v26 = vld [vmem:[%s6369_s23 + $0x64] ss:$8 sps:$4 sm:$0xff]  }
 0x36d   : > { %2083 = vmatprep.subr.bf16.mxu0 %v5022_v30  ;;  %4656 = vmatprep.mubr.msk.bf16.mxu1 %vm5891_vm3, %v5890_v60 }
 0x370   : > { %2084 = vmatpush1.bf16.msra.mxu0 %v5020_v31  ;;  %v2242_v31 = vsel %vm2240_vm5, %v2241_v27, 0  ;;  %v5068_v27 = vld [vmem:[%s6369_s23 + $0x60] ss:$8 sps:$4 sm:$0xff]  }
 0x371   : > { %2085 = vmatprep.subr.bf16.mxu0 %v5025_v32 }
 0x374   : > { %2086 = vmatpush1.bf16.msra.mxu0 %v5023_v33 }
 0x375   : > { %2087 = vmatprep.subr.bf16.mxu0 %v5028_v34 }
 0x378   : > { %2088 = vmatpush1.bf16.msra.mxu0 %v5026_v35 }
 0x379   : > { %2089 = vmatprep.subr.bf16.mxu0 %v5031_v36 }
 0x37c   : > { %2090 = vmatpush1.bf16.msra.mxu0 %v5029_v37 }
 0x37d   : > { %2091 = vmatprep.subr.bf16.mxu0 %v5034_v38 }
 0x380   : > { %2092 = vmatpush1.bf16.msra.mxu0 %v5032_v39 }
 0x381   : > { %2093 = vmatprep.subr.bf16.mxu0 %v5037_v40 }
 0x384   : > { %2094 = vmatpush1.bf16.msra.mxu0 %v5035_v41 }
 0x385   : > { %2095 = vmatprep.subr.bf16.mxu0 %v5040_v42 }
 0x388   : > { %2096 = vmatpush1.bf16.msra.mxu0 %v5038_v43 }
 0x389   : > { %2097 = vmatprep.subr.bf16.mxu0 %v5043_v44 }
 0x38c   : > { %2098 = vmatpush2.bf16.msra.mxu0 %v5041_v45 }
 0x38d   : > { %2099 = vmatprep.subr.bf16.mxu0 %v5046_v46 }
 0x390   : > { %2100 = vmatpush2.bf16.msra.mxu0 %v5044_v47 }
 0x391   : > { %2101 = vmatprep.subr.bf16.mxu0 %v5049_v48 }
 0x394   : > { %2102 = vmatpush2.bf16.msra.mxu0 %v5047_v49 }
 0x395   : > { %2103 = vmatprep.subr.bf16.mxu0 %v5052_v50 }
 0x398   : > { %2104 = vmatpush2.bf16.msra.mxu0 %v5050_v51 }
 0x399   : > { %2105 = vmatprep.subr.bf16.mxu0 %v5055_v52 }
 0x39c   : > { %2106 = vmatpush2.bf16.msra.mxu0 %v5053_v53 }
 0x39d   : > { %2107 = vmatprep.subr.bf16.mxu0 %v5058_v54 }
 0x3a0   : > { %2108 = vmatpush2.bf16.msra.mxu0 %v5056_v55 }
 0x3a1   : > { %2109 = vmatprep.subr.bf16.mxu0 %v5061_v56 }
 0x3a4   : > { %2110 = vmatpush2.bf16.msra.mxu0 %v5059_v57 }
 0x3a5   : > { %2111 = vmatprep.subr.bf16.mxu0 %v5064_v58 }
 0x3a8   : > { %2112 = vmatpush2.bf16.msra.mxu0 %v5062_v59 }
 0x3ab   : > { %2114 = vmatmul.mubr.bf16.vlgmr.msra.gmra.mxu0 %v6506_v29 }
 0x42b   : > { %v2033_v1 = vpop.f32.mrf.mxu0  ;;  %v2074_v2 = vpop.f32.mrf.mxu1 }
 0x42c   : > { %v2075_v3 = vadd.f32 %v2074_v2, %v1500_v63  ;;  %v2034_v14 = vadd.f32 %v2033_v1, %v1492_v4  ;;  %v5074_v1 = vld [vmem:[%s6369_s23 + $0xf0] ss:$8 sps:$4 sm:$0xff]   ;;  %v5076_v2 = vld [vmem:[%s6369_s23 + $0xf4] ss:$8 sps:$4 sm:$0xff]   ;;  %v5082_v4 = vld [vmem:[%s6369_s23 + $0xe4] ss:$8 sps:$4 sm:$0xff]  }
 0x42d   : > { %v2035_v5 = vpop.f32.mrf.mxu0  ;;  %v2076_v6 = vpop.f32.mrf.mxu1  ;;  %2567 = vmatprep.subr.bf16.mxu0 %v5076_v2 }
 0x42e   : > { %v2124_v7 = vpack.c.bf16 %v2075_v3, %v2075_v3  ;;  %v2077_v17 = vadd.f32 %v2076_v6, %v1504_v8  ;;  %v2122_v18 = vpack.c.bf16 %v2034_v14, %v2034_v14  ;;  %v2036_v21 = vadd.f32 %v2035_v5, %v1496_v19  ;;  %2568 = vmatpush1.bf16.msra.mxu0 %v5074_v1  ;;  %v5080_v3 = vld [vmem:[%s6369_s23 + $0xe0] ss:$8 sps:$4 sm:$0xff]   ;;  %v5086_v5 = vld [vmem:[%s6369_s23 + $0xd0] ss:$8 sps:$4 sm:$0xff]   ;;  %v5088_v6 = vld [vmem:[%s6369_s23 + $0xd4] ss:$8 sps:$4 sm:$0xff]  }
 0x42f   : > { %v2037_v9 = vpop.f32.mrf.mxu0  ;;  %v2078_v10 = vpop.f32.mrf.mxu1  ;;  %2569 = vmatprep.subr.bf16.mxu0 %v5082_v4  ;;  %v5094_v8 = vld [vmem:[%s6369_s23 + $0xc4] ss:$8 sps:$4 sm:$0xff]   ;;  %v5104_v14 = vld [vmem:[%s6369_s23 + $0xa0] ss:$8 sps:$4 sm:$0xff]  }
 0x430   : > { %4655 = vmatpush3.bf16.xpose.msra.mxu1 %v2124_v7  ;;  %v2125_v20 = vpack.c.bf16 %v2077_v17, %v2077_v17  ;;  %v2123_v22 = vpack.c.bf16 %v2036_v21, %v2036_v21  ;;  %v5092_v7 = vld [vmem:[%s6369_s23 + $0xc0] ss:$8 sps:$4 sm:$0xff]   ;;  %v5098_v9 = vld [vmem:[%s6369_s23 + $0xb0] ss:$8 sps:$4 sm:$0xff]   ;;  %v5100_v10 = vld [vmem:[%s6369_s23 + $0xb4] ss:$8 sps:$4 sm:$0xff]  }
 0x431   : > { %v2038_v15 = vpop.f32.mrf.mxu0  ;;  %v2079_v16 = vpop.f32.mrf.mxu1  ;;  %4660 = vmatprep.subr.bf16.mxu1 %v5890_v60  ;;  %v5067_v21 = vld [vmem:[%s6369_s23 + $0x74] ss:$8 sps:$4 sm:$0xff]  }
 0x432   : > { %2570 = vmatpush1.bf16.msra.mxu0 %v5080_v3  ;;  %v5106_v15 = vld [vmem:[%s6369_s23 + $0xa4] ss:$8 sps:$4 sm:$0xff]  }
 0x433   : > { %2571 = vmatprep.subr.bf16.mxu0 %v5088_v6 }
 0x436   : > { %2572 = vmatpush1.bf16.msra.mxu0 %v5086_v5 }
 0x437   : > { %4657 = vmatmul.mubr.bf16.vlgmr.msra.gmra.mxu1 %v2122_v18  ;;  %2573 = vmatprep.subr.bf16.mxu0 %v5094_v8 }
 0x438   : > { %4661 = vmatpush3.bf16.xpose.msra.mxu1 %v2125_v20  ;;  %4662 = vmatprep.mubr.msk.bf16.mxu1 %vm5891_vm3, %v5890_v60 }
 0x439   : > { %4666 = vmatprep.subr.bf16.mxu1 %v5890_v60 }
 0x43a   : > { %2574 = vmatpush1.bf16.msra.mxu0 %v5092_v7 }
 0x43b   : > { %2575 = vmatprep.subr.bf16.mxu0 %v5100_v10  ;;  %v5325_v10 = vld [vmem:[#allocation2] sm:$0x1f] }
 0x43e   : > { %2576 = vmatpush1.bf16.msra.mxu0 %v5098_v9 }
 0x43f   : > { %4663 = vmatmul.mubr.bf16.vlgmr.msra.gmra.mxu1 %v2123_v22  ;;  %2577 = vmatprep.subr.bf16.mxu0 %v5106_v15 }
 0x440   : > { %4668 = vmatprep.mubr.msk.bf16.mxu1 %vm5891_vm3, %v5890_v60 }
 0x442   : > { %2578 = vmatpush1.bf16.msra.mxu0 %v5104_v14 }
 0x46b   : > { %v2115_v29 = vpop.f32.mrf.mxu0 }
 0x46c   : > { %v2116_v30 = vadd.f32 %v2115_v29, %v1508_v25  ;;  %v5071_v29 = vld [vmem:[%s6369_s23 + $0x50] ss:$8 sps:$4 sm:$0xff]  }
 0x46d   : > { %v2117_v32 = vpop.f32.mrf.mxu0 }
 0x46e   : > { %v2233_v33 = vpack.c.bf16 %v2116_v30, %v2116_v30  ;;  %v2118_v34 = vadd.f32 %v2117_v32, %v1512_v28  ;;  %v5073_v28 = vld [vmem:[%s6369_s23 + $0x54] ss:$8 sps:$4 sm:$0xff]   ;;  %v5077_v30 = vld [vmem:[%s6369_s23 + $0x40] ss:$8 sps:$4 sm:$0xff]   ;;  %v5083_v32 = vld [vmem:[%s6369_s23 + $0x30] ss:$8 sps:$4 sm:$0xff]  }
 0x46f   : > { %v2119_v35 = vpop.f32.mrf.mxu0 }
 0x470   : > { %v2244_v36 = vand.u32 %v2242_v31, %v2233_v33  ;;  %v2234_v37 = vpack.c.bf16 %v2118_v34, %v2118_v34  ;;  %v5091_v33 = vld [vmem:[%s6369_s23 + $0x24] ss:$8 sps:$4 sm:$0xff]   ;;  %v5089_v34 = vld [vmem:[%s6369_s23 + $0x20] ss:$8 sps:$4 sm:$0xff]   ;;  %v5097_v35 = vld [vmem:[%s6369_s23 + $0x14] ss:$8 sps:$4 sm:$0xff]  }
 0x471   : > { %v2120_v38 = vpop.f32.mrf.mxu0 }
 0x472   : > { %v6561_v39 = vand.u32 %v2242_v31, %v2234_v37  ;;  %4667 = vmatpush3.bf16.msra.mxu1 %v2244_v36  ;;  %v5085_v31 = vld [vmem:[%s6369_s23 + $0x34] ss:$8 sps:$4 sm:$0xff]   ;;  %v5095_v36 = vld [vmem:[%s6369_s23 + $0x10] ss:$8 sps:$4 sm:$0xff]   ;;  %v5103_v37 = vld [vmem:[%s6369_s23 + $0x4] ss:$8 sps:$4 sm:$0xff]  }
 0x473   : > { %4672 = vmatprep.subr.bf16.mxu1 %v5890_v60  ;;  %v5101_v38 = vld [vmem:[%s6369_s23] ss:$8 sps:$4 sm:$0xff]  }
 0x4f7   : > { %v2160_v40 = vpop.f32.mrf.mxu1 }
 0x4f8   : > { %v2206_v41 = vmul.f32 0.088388346, %v2160_v40  ;;  %v5893_v40 = vmov 0  }
 0x4f9   : > { %v4658_v42 = vpop.f32.mrf.mxu1  ;;  %2599 = vmatprep.mubr.bf16.mxu0 %v5893_v40 }
 0x4fa   : > { %v2209_v43 = vsel %vm2208_vm6, %v2206_v41, -inf  ;;  %v5110_v42 = vld [vmem:[%s6369_s23 + $0x80] ss:$8 sps:$4 sm:$0xff]  }
 0x4fb   : > { %2210 = vmax.xlane.f32.xlu1 %v2209_v43  ;;  %v2163_v44 = vpop.f32.mrf.mxu1  ;;  %v5112_v43 = vld [vmem:[%s6369_s23 + $0x84] ss:$8 sps:$4 sm:$0xff]  }
 0x4fd   : > { %v4659_v45 = vpop.f32.mrf.mxu1 }
 0x4ff   : > { %v2200_v46 = vpop.f32.mrf.mxu1 }
 0x500   : > { %v2207_v47 = vmul.f32 0.088388346, %v2200_v46 }
 0x501   : > { %v4664_v48 = vpop.f32.mrf.mxu1 }
 0x502   : > { %v2212_v49 = vsel %vm2208_vm6, %v2207_v47, -inf }
 0x503   : > { %2213 = vmax.xlane.f32.xlu1 %v2212_v49  ;;  %v2203_v50 = vpop.f32.mrf.mxu1 }
 0x505   : > { %v4665_v51 = vpop.f32.mrf.mxu1 }
 0x584   : > { %v2211_v52 = vpop.xlane.xlu1 %2210 }
 0x585   : > { %v2215_v53 = vsub.f32 %v2206_v41, %v2211_v52  ;;  %v5107_v41 = vld [vmem:[%s6369_s23 + $0x90] ss:$8 sps:$4 sm:$0xff]  }
 0x587   : > { %v2217_v54 = vmul.f32 1.442695, %v2215_v53 }
 0x589   : > { %5307 = vpow2.f32 %v2217_v54 }
 0x58c   : > { %v2214_v55 = vpop.xlane.xlu1 %2213 }
 0x58d   : > { %v2216_v56 = vsub.f32 %v2207_v47, %v2214_v55 }
 0x58f   : > { %v2219_v57 = vmul.f32 1.442695, %v2216_v56 }
 0x591   : > { %5309 = vpow2.f32 %v2219_v57  ;;  %v2614_v57 = vld [vmem:[%s6979_s22] sm:$0x3] }
 0x592   : > { %v2623_v4 = vrot.slane %v2614_v57, %v6490_v12 }
 0x596   : > { %v5308_v58 = vpop.eup %5307 }
 0x597   : > { %v2221_v59 = vsel %vm2208_vm6, %v5308_v58, 0.0 }
 0x598   : > { %2222 = vadd.xlane.f32.xlu0 %v2221_v59 }
 0x59e   : > { %v5310_v62 = vpop.eup %5309 }
 0x59f   : > { %v2224_v63 = vsel %vm2208_vm6, %v5310_v62, 0.0 }
 0x5a0   : > { %2225 = vadd.xlane.f32.xlu1 %v2224_v63 }
 0x621   : > { %v2223_v16 = vpop.xlane.xlu0 %2222 }
 0x622   : > { %5311 = vrcp.f32 %v2223_v16 }
 0x629   : > { %v2226_v17 = vpop.xlane.xlu1 %2225 }
 0x62a   : > { %5313 = vrcp.f32 %v2226_v17  ;;  %v5326_v17 = vld [vmem:[#allocation2 + $0x8] sm:$0x1f] }
 0x62f   : > { %v5312_v18 = vpop.eup %5311 }
 0x630   : > { %v2229_v19 = vmul.f32 %v5312_v18, %v5308_v58 }
 0x632   : > { %v2231_v20 = vpack.c.bf16 %v2229_v19, %v2229_v19 }
 0x634   : > { %4669 = vmatmul.mubr.msk.bf16.vlgmr.msra.gmra.mxu1 %vm2235_vm7, %v2231_v20 }
 0x635   : > { %4673 = vmatpush3.bf16.msra.mxu1 %v6561_v39  ;;  %4674 = vmatprep.mubr.msk.bf16.mxu1 %vm5891_vm3, %v5890_v60  ;;  %v5079_v60 = vld [vmem:[%s6369_s23 + $0x44] ss:$8 sps:$4 sm:$0xff]   ;;  %v5109_v39 = vld [vmem:[%s6369_s23 + $0x94] ss:$8 sps:$4 sm:$0xff]   ;;  %s6981_s23 = scalar_lea.vmem [#allocation17], %s6359_s26 }
 0x636   : > { %2446 = vmatprep.subr.bf16.mxu1 %v5067_v21  ;;  %2579 = vmatprep.subr.bf16.mxu0 %v5109_v39  ;;  %v5137_v39 = vld [vmem:[%s6374_s20 + $0x60] ss:$16 sps:$4 sm:$0xff]  }
 0x637   : > { %v5314_v22 = vpop.eup %5313  ;;  %2580 = vmatpush1.bf16.msra.mxu0 %v5107_v41  ;;  %v5145_v41 = vld [vmem:[%s6374_s20 + $0x44] ss:$16 sps:$4 sm:$0xff]  }
 0x638   : > { %v2230_v23 = vmul.f32 %v5314_v22, %v5310_v62  ;;  %2581 = vmatprep.subr.bf16.mxu0 %v5112_v43  ;;  %v2619_v62 = vrot.slane %v2614_v57, %v6493_v13  ;;  %v5113_v22 = vld [vmem:[%s6374_s20 + $0xe0] ss:$16 sps:$4 sm:$0xff]   ;;  %v5169_v57 = vld [vmem:[%s6374_s20 + $0x1c4] ss:$16 sps:$4 sm:$0xff]  }
 0x639   : > { %v5143_v43 = vld [vmem:[%s6374_s20 + $0x40] ss:$16 sps:$4 sm:$0xff]  }
 0x63a   : > { %v2232_v25 = vpack.c.bf16 %v2230_v23, %v2230_v23  ;;  %v5115_v23 = vld [vmem:[%s6374_s20 + $0xe4] ss:$16 sps:$4 sm:$0xff]  }
 0x63b   : > { %2582 = vmatpush1.bf16.msra.mxu0 %v5110_v42  ;;  %v5148_v42 = vld [vmem:[%s6374_s20 + $0x4c] ss:$16 sps:$4 sm:$0xff]  }
 0x63c   : > { %4675 = vmatmul.mubr.msk.bf16.vlgmr.msra.gmra.mxu1 %vm2235_vm7, %v2232_v25  ;;  %v5118_v25 = vld [vmem:[%s6374_s20 + $0xec] ss:$16 sps:$4 sm:$0xff]  }
 0x63d   : > { %2447 = vmatpush1.bf16.msra.mxu1 %v5065_v24  ;;  %2478 = vmatprep.mubr.bf16.mxu1 %v5893_v40  ;;  %v5116_v24 = vld [vmem:[%s6374_s20 + $0xe8] ss:$16 sps:$4 sm:$0xff]  }
 0x63e   : > { %2448 = vmatprep.subr.bf16.mxu1 %v5070_v26  ;;  %v5121_v26 = vld [vmem:[%s6374_s20 + $0xc4] ss:$16 sps:$4 sm:$0xff]   ;;  %3127 = vmatprep.subr.bf16.mxu0 %v5118_v25  ;;  %v5140_v40 = vld [vmem:[%s6374_s20 + $0x68] ss:$16 sps:$4 sm:$0xff]  }
 0x63f   : > { %v5188_v25 = vld [vmem:[%s6374_s20 + $0x168] ss:$16 sps:$4 sm:$0xff]  }
 0x641   : > { %2449 = vmatpush1.bf16.msra.mxu1 %v5068_v27  ;;  %v5124_v27 = vld [vmem:[%s6374_s20 + $0xcc] ss:$16 sps:$4 sm:$0xff]  }
 0x642   : > { %2450 = vmatprep.subr.bf16.mxu1 %v5073_v28  ;;  %v5119_v28 = vld [vmem:[%s6374_s20 + $0xc0] ss:$16 sps:$4 sm:$0xff]  }
 0x645   : > { %2451 = vmatpush1.bf16.msra.mxu1 %v5071_v29  ;;  %v5122_v29 = vld [vmem:[%s6374_s20 + $0xc8] ss:$16 sps:$4 sm:$0xff]  }
 0x646   : > { %2452 = vmatprep.subr.bf16.mxu1 %v5079_v60  ;;  %v5127_v60 = vld [vmem:[%s6374_s20 + $0xa4] ss:$16 sps:$4 sm:$0xff]  }
 0x649   : > { %2453 = vmatpush1.bf16.msra.mxu1 %v5077_v30  ;;  %v5130_v30 = vld [vmem:[%s6374_s20 + $0xac] ss:$16 sps:$4 sm:$0xff]  }
 0x64a   : > { %2454 = vmatprep.subr.bf16.mxu1 %v5085_v31  ;;  %v5125_v31 = vld [vmem:[%s6374_s20 + $0xa0] ss:$16 sps:$4 sm:$0xff]  }
 0x64d   : > { %2455 = vmatpush1.bf16.msra.mxu1 %v5083_v32  ;;  %v5128_v32 = vld [vmem:[%s6374_s20 + $0xa8] ss:$16 sps:$4 sm:$0xff]  }
 0x64e   : > { %2456 = vmatprep.subr.bf16.mxu1 %v5091_v33  ;;  %v5133_v33 = vld [vmem:[%s6374_s20 + $0x84] ss:$16 sps:$4 sm:$0xff]  }
 0x651   : > { %2457 = vmatpush1.bf16.msra.mxu1 %v5089_v34  ;;  %v5136_v34 = vld [vmem:[%s6374_s20 + $0x8c] ss:$16 sps:$4 sm:$0xff]  }
 0x652   : > { %2458 = vmatprep.subr.bf16.mxu1 %v5097_v35  ;;  %v5131_v35 = vld [vmem:[%s6374_s20 + $0x80] ss:$16 sps:$4 sm:$0xff]  }
 0x655   : > { %2459 = vmatpush1.bf16.msra.mxu1 %v5095_v36  ;;  %v5134_v36 = vld [vmem:[%s6374_s20 + $0x88] ss:$16 sps:$4 sm:$0xff]  }
 0x656   : > { %2460 = vmatprep.subr.bf16.mxu1 %v5103_v37  ;;  %v5139_v37 = vld [vmem:[%s6374_s20 + $0x64] ss:$16 sps:$4 sm:$0xff]  }
 0x659   : > { %2461 = vmatpush1.bf16.msra.mxu1 %v5101_v38  ;;  %v5142_v38 = vld [vmem:[%s6374_s20 + $0x6c] ss:$16 sps:$4 sm:$0xff]  }
 0x65a   : > { %3086 = vmatprep.subr.bf16.mxu1 %v5115_v23  ;;  %v5190_v23 = vld [vmem:[%s6374_s20 + $0x16c] ss:$16 sps:$4 sm:$0xff]  }
 0x6f4   : > { %v2280_v44 = vpop.f32.mrf.mxu1 }
 0x6f5   : > { %v2332_v45 = vpack.c.bf16 %v2280_v44, %v2280_v44  ;;  %v5146_v44 = vld [vmem:[%s6374_s20 + $0x48] ss:$16 sps:$4 sm:$0xff]  }
 0x6f6   : > { %v4670_v46 = vpop.f32.mrf.mxu1 }
 0x6f7   : > { %2479 = vmatmul.mubr.bf16.vlgmr.msra.gmra.mxu1 %v2332_v45  ;;  %v5151_v45 = vld [vmem:[%s6374_s20 + $0x24] ss:$16 sps:$4 sm:$0xff]   ;;  %v5154_v46 = vld [vmem:[%s6374_s20 + $0x2c] ss:$16 sps:$4 sm:$0xff]  }
 0x6f8   : > { %v2283_v47 = vpop.f32.mrf.mxu1  ;;  %3087 = vmatpush1.bf16.msra.mxu1 %v5113_v22  ;;  %v5187_v22 = vld [vmem:[%s6374_s20 + $0x164] ss:$16 sps:$4 sm:$0xff]  }
 0x6f9   : > { %3088 = vmatprep.subr.bf16.mxu1 %v5121_v26  ;;  %v5149_v47 = vld [vmem:[%s6374_s20 + $0x20] ss:$16 sps:$4 sm:$0xff]   ;;  %v5193_v26 = vld [vmem:[%s6374_s20 + $0x144] ss:$16 sps:$4 sm:$0xff]  }
 0x6fa   : > { %v4671_v48 = vpop.f32.mrf.mxu1 }
 0x6fb   : > { %v5152_v48 = vld [vmem:[%s6374_s20 + $0x28] ss:$16 sps:$4 sm:$0xff]  }
 0x6fc   : > { %v2326_v49 = vpop.f32.mrf.mxu1  ;;  %3089 = vmatpush1.bf16.msra.mxu1 %v5119_v28  ;;  %v5191_v28 = vld [vmem:[%s6374_s20 + $0x140] ss:$16 sps:$4 sm:$0xff]  }
 0x6fd   : > { %v2333_v50 = vpack.c.bf16 %v2326_v49, %v2326_v49  ;;  %3090 = vmatprep.subr.bf16.mxu1 %v5127_v60  ;;  %v5157_v49 = vld [vmem:[%s6374_s20 + $0x4] ss:$16 sps:$4 sm:$0xff]  }
 0x6fe   : > { %v4676_v51 = vpop.f32.mrf.mxu1  ;;  %v5199_v60 = vld [vmem:[%s6374_s20 + $0x124] ss:$16 sps:$4 sm:$0xff]  }
 0x6ff   : > { %2600 = vmatmul.mubr.bf16.vlgmr.msra.gmra.mxu0 %v2333_v50  ;;  %v5160_v50 = vld [vmem:[%s6374_s20 + $0xc] ss:$16 sps:$4 sm:$0xff]   ;;  %v5155_v51 = vld [vmem:[%s6374_s20] ss:$16 sps:$4 sm:$0xff]  }
 0x700   : > { %v2329_v52 = vpop.f32.mrf.mxu1  ;;  %3128 = vmatpush1.bf16.msra.mxu0 %v5116_v24  ;;  %3091 = vmatpush1.bf16.msra.mxu1 %v5125_v31  ;;  %v5185_v24 = vld [vmem:[%s6374_s20 + $0x160] ss:$16 sps:$4 sm:$0xff]  }
 0x701   : > { %3129 = vmatprep.subr.bf16.mxu0 %v5124_v27  ;;  %3092 = vmatprep.subr.bf16.mxu1 %v5133_v33  ;;  %v5158_v52 = vld [vmem:[%s6374_s20 + $0x8] ss:$16 sps:$4 sm:$0xff]   ;;  %v5196_v27 = vld [vmem:[%s6374_s20 + $0x14c] ss:$16 sps:$4 sm:$0xff]   ;;  %v5197_v31 = vld [vmem:[%s6374_s20 + $0x120] ss:$16 sps:$4 sm:$0xff]  }
 0x702   : > { %v4677_v53 = vpop.f32.mrf.mxu1  ;;  %v5205_v33 = vld [vmem:[%s6374_s20 + $0x104] ss:$16 sps:$4 sm:$0xff]  }
 0x703   : > { %v5163_v53 = vld [vmem:[%s6374_s20 + $0x1e4] ss:$16 sps:$4 sm:$0xff]  }
 0x704   : > { %3130 = vmatpush1.bf16.msra.mxu0 %v5122_v29  ;;  %3093 = vmatpush1.bf16.msra.mxu1 %v5131_v35  ;;  %v5194_v29 = vld [vmem:[%s6374_s20 + $0x148] ss:$16 sps:$4 sm:$0xff]   ;;  %v5203_v35 = vld [vmem:[%s6374_s20 + $0x100] ss:$16 sps:$4 sm:$0xff]  }
 0x705   : > { %3131 = vmatprep.subr.bf16.mxu0 %v5130_v30  ;;  %3094 = vmatprep.subr.bf16.mxu1 %v5139_v37  ;;  %v5202_v30 = vld [vmem:[%s6374_s20 + $0x12c] ss:$16 sps:$4 sm:$0xff]  }
 0x706   : > { %v5211_v37 = vld [vmem:[%s6376_s19 + $0x74] ss:$8 sps:$4 sm:$0xff]  }
 0x708   : > { %3132 = vmatpush1.bf16.msra.mxu0 %v5128_v32  ;;  %3095 = vmatpush1.bf16.msra.mxu1 %v5137_v39  ;;  %v5200_v32 = vld [vmem:[%s6374_s20 + $0x128] ss:$16 sps:$4 sm:$0xff]  }
 0x709   : > { %3133 = vmatprep.subr.bf16.mxu0 %v5136_v34  ;;  %3096 = vmatprep.subr.bf16.mxu1 %v5145_v41  ;;  %v5208_v34 = vld [vmem:[%s6374_s20 + $0x10c] ss:$16 sps:$4 sm:$0xff]  }
 0x70c   : > { %3134 = vmatpush1.bf16.msra.mxu0 %v5134_v36  ;;  %3097 = vmatpush1.bf16.msra.mxu1 %v5143_v43  ;;  %v5206_v36 = vld [vmem:[%s6374_s20 + $0x108] ss:$16 sps:$4 sm:$0xff]   ;;  %v2631_v43 = vld [vmem:[%s6981_s23] sm:$0x3] }
 0x70d   : > { %3135 = vmatprep.subr.bf16.mxu0 %v5142_v38  ;;  %3098 = vmatprep.subr.bf16.mxu1 %v5151_v45  ;;  %v5214_v38 = vld [vmem:[%s6376_s19 + $0x174] ss:$8 sps:$4 sm:$0xff]  }
 0x710   : > { %3136 = vmatpush1.bf16.msra.mxu0 %v5140_v40  ;;  %3099 = vmatpush1.bf16.msra.mxu1 %v5149_v47 }
 0x711   : > { %3137 = vmatprep.subr.bf16.mxu0 %v5148_v42  ;;  %3100 = vmatprep.subr.bf16.mxu1 %v5157_v49  ;;  %v2630_v42 = vld [vmem:[%s6980_s25] sm:$0x3]  ;;  %v2673_v49 = vrot.slane %v2631_v43, %v6490_v12 }
 0x712   : > { %v2660_v45 = vrot.slane %v2630_v42, %v6490_v12 }
 0x714   : > { %3138 = vmatpush1.bf16.msra.mxu0 %v5146_v44  ;;  %3101 = vmatpush1.bf16.msra.mxu1 %v5155_v51  ;;  %v2656_v44 = vrot.slane %v2630_v42, %v6493_v13  ;;  %v5275_v42 = vld [vmem:[%s6376_s19 + $0xc0] ss:$8 sps:$4 sm:$0xff]  }
 0x715   : > { %3139 = vmatprep.subr.bf16.mxu0 %v5154_v46  ;;  %3102 = vmatprep.subr.bf16.mxu1 %v5163_v53 }
 0x718   : > { %3140 = vmatpush1.bf16.msra.mxu0 %v5152_v48  ;;  %v2669_v48 = vrot.slane %v2631_v43, %v6493_v13  ;;  %v5277_v43 = vld [vmem:[%s6376_s19 + $0xc4] ss:$8 sps:$4 sm:$0xff]  }
 0x719   : > { %3141 = vmatprep.subr.bf16.mxu0 %v5160_v50 }
 0x71c   : > { %3142 = vmatpush1.bf16.msra.mxu0 %v5158_v52 }
 0x7b7   : > { %v2480_v54 = vpop.f32.mrf.mxu1 }
 0x7b8   : > { %v2608_v63 = vsel %vm1341_vm2, %v2480_v54, 0.0  ;;  %v5166_v54 = vld [vmem:[%s6374_s20 + $0x1ec] ss:$16 sps:$4 sm:$0xff]  }
 0x7b9   : > { %v2482_v55 = vpop.f32.mrf.mxu1  ;;  %3143 = vmatprep.subr.bf16.mxu0 %v5166_v54 }
 0x7ba   : > { %v2611_v5 = vsel %vm1341_vm2, %v2482_v55, 0.0  ;;  %v5161_v55 = vld [vmem:[%s6374_s20 + $0x1e0] ss:$16 sps:$4 sm:$0xff]  }
 0x7bb   : > { %v2484_v56 = vpop.f32.mrf.mxu1  ;;  %3103 = vmatpush2.bf16.msra.mxu1 %v5161_v55 }
 0x7bc   : > { %v5164_v56 = vld [vmem:[%s6374_s20 + $0x1e8] ss:$16 sps:$4 sm:$0xff]   ;;  %3104 = vmatprep.subr.bf16.mxu1 %v5169_v57 }
 0x7bd   : > { %v2485_v58 = vpop.f32.mrf.mxu1  ;;  %3144 = vmatpush2.bf16.msra.mxu0 %v5164_v56  ;;  %v5209_v57 = vld [vmem:[%s6376_s19 + $0x70] ss:$8 sps:$4 sm:$0xff]  }
 0x7be   : > { %v5172_v58 = vld [vmem:[%s6374_s20 + $0x1cc] ss:$16 sps:$4 sm:$0xff]  }
 0x7bf   : > { %v2601_v59 = vpop.f32.mrf.mxu0  ;;  %3145 = vmatprep.subr.bf16.mxu0 %v5172_v58  ;;  %v5212_v58 = vld [vmem:[%s6376_s19 + $0x170] ss:$8 sps:$4 sm:$0xff]  }
 0x7c0   : > { %v2609_v1 = vsel %vm1341_vm2, %v2601_v59, 0.0  ;;  %v5167_v59 = vld [vmem:[%s6374_s20 + $0x1c0] ss:$16 sps:$4 sm:$0xff]  }
 0x7c1   : > { %v2610_v2 = vadd.f32 %v2609_v1, %v2608_v63  ;;  %v2603_v3 = vpop.f32.mrf.mxu0  ;;  %3105 = vmatpush2.bf16.msra.mxu1 %v5167_v59  ;;  %v5217_v59 = vld [vmem:[%s6376_s19 + $0x64] ss:$8 sps:$4 sm:$0xff]  }
 0x7c2   : > { %v2612_v6 = vsel %vm1341_vm2, %v2603_v3, 0.0 }
 0x7c3   : > { %v2626_v7 = vadd.f32 %v2619_v62, %v2610_v2  ;;  %v2613_v8 = vadd.f32 %v2612_v6, %v2611_v5  ;;  %v2605_v9 = vpop.f32.mrf.mxu0  ;;  %v5170_v62 = vld [vmem:[%s6374_s20 + $0x1c8] ss:$16 sps:$4 sm:$0xff]  }
 0x7c4   : > { %3146 = vmatpush2.bf16.msra.mxu0 %v5170_v62  ;;  %v5175_v9 = vld [vmem:[%s6374_s20 + $0x1a4] ss:$16 sps:$4 sm:$0xff]  }
 0x7c5   : > { %v6611_v14 = vadd.f32 %v5325_v10, %v2626_v7  ;;  %v2627_v15 = vadd.f32 %v2623_v4, %v2613_v8  ;;  %v2606_v16 = vpop.f32.mrf.mxu0  ;;  %v5178_v10 = vld [vmem:[%s6374_s20 + $0x1ac] ss:$16 sps:$4 sm:$0xff]   ;;  %3106 = vmatprep.subr.bf16.mxu1 %v5175_v9  ;;  %v5230_v9 = vld [vmem:[%s6376_s19 + $0x140] ss:$8 sps:$4 sm:$0xff]  }
 0x7c6   : > { %v5176_v16 = vld [vmem:[%s6374_s20 + $0x1a8] ss:$16 sps:$4 sm:$0xff]   ;;  %3147 = vmatprep.subr.bf16.mxu0 %v5178_v10  ;;  %v5220_v62 = vld [vmem:[%s6376_s19 + $0x164] ss:$8 sps:$4 sm:$0xff]   ;;  %v5235_v10 = vld [vmem:[%s6376_s19 + $0x34] ss:$8 sps:$4 sm:$0xff]  }
 0x7c7   : > { %v6613_v18 = vadd.f32 %v5326_v17, %v2627_v15  ;;  %v2632_v19 = vsel %vm1341_vm2, %v6611_v14, 0.0  ;;  %v5173_v15 = vld [vmem:[%s6374_s20 + $0x1a0] ss:$16 sps:$4 sm:$0xff]   ;;  %v5181_v17 = vld [vmem:[%s6374_s20 + $0x184] ss:$16 sps:$4 sm:$0xff]  }
 0x7c8   : > { %3107 = vmatpush2.bf16.msra.mxu1 %v5173_v15  ;;  %3148 = vmatpush2.bf16.msra.mxu0 %v5176_v16  ;;  %v5238_v15 = vld [vmem:[%s6376_s19 + $0x134] ss:$8 sps:$4 sm:$0xff]   ;;  %v5233_v16 = vld [vmem:[%s6376_s19 + $0x30] ss:$8 sps:$4 sm:$0xff]  }
 0x7c9   : > { %v2633_v20 = vsel %vm1341_vm2, %v6613_v18, 0.0  ;;  %3108 = vmatprep.subr.bf16.mxu1 %v5181_v17  ;;  %v5236_v17 = vld [vmem:[%s6376_s19 + $0x130] ss:$8 sps:$4 sm:$0xff]  }
 0x7ca   : > { %v2634_v21 = vadd.f32 %v2633_v20, %v2632_v19  ;;  %v5179_v19 = vld [vmem:[%s6374_s20 + $0x180] ss:$16 sps:$4 sm:$0xff]   ;;  %v5182_v20 = vld [vmem:[%s6374_s20 + $0x188] ss:$16 sps:$4 sm:$0xff]  }
 0x7cc   : > { %2635 = vadd.xlane.f32.xlu0 %v2634_v21  ;;  %v5184_v21 = vld [vmem:[%s6374_s20 + $0x18c] ss:$16 sps:$4 sm:$0xff]   ;;  %3109 = vmatpush2.bf16.msra.mxu1 %v5179_v19 }
 0x7cd   : > { %3149 = vmatprep.subr.bf16.mxu0 %v5184_v21  ;;  %3110 = vmatprep.subr.bf16.mxu1 %v5187_v22  ;;  %v5241_v19 = vld [vmem:[%s6376_s19 + $0x24] ss:$8 sps:$4 sm:$0xff]   ;;  %v5239_v21 = vld [vmem:[%s6376_s19 + $0x20] ss:$8 sps:$4 sm:$0xff]  }
 0x7ce   : > { %3150 = vmatpush2.bf16.msra.mxu0 %v5182_v20  ;;  %v5244_v20 = vld [vmem:[%s6376_s19 + $0x124] ss:$8 sps:$4 sm:$0xff]   ;;  %v5242_v22 = vld [vmem:[%s6376_s19 + $0x120] ss:$8 sps:$4 sm:$0xff]  }
 0x7cf   : > { %3151 = vmatprep.subr.bf16.mxu0 %v5190_v23  ;;  %v5247_v23 = vld [vmem:[%s6376_s19 + $0x14] ss:$8 sps:$4 sm:$0xff]  }
 0x7d0   : > { %3111 = vmatpush2.bf16.msra.mxu1 %v5185_v24  ;;  %v5250_v24 = vld [vmem:[%s6376_s19 + $0x114] ss:$8 sps:$4 sm:$0xff]  }
 0x7d1   : > { %3112 = vmatprep.subr.bf16.mxu1 %v5193_v26  ;;  %v5248_v26 = vld [vmem:[%s6376_s19 + $0x110] ss:$8 sps:$4 sm:$0xff]  }
 0x7d2   : > { %3152 = vmatpush2.bf16.msra.mxu0 %v5188_v25  ;;  %v5245_v25 = vld [vmem:[%s6376_s19 + $0x10] ss:$8 sps:$4 sm:$0xff]  }
 0x7d3   : > { %3153 = vmatprep.subr.bf16.mxu0 %v5196_v27  ;;  %v5253_v27 = vld [vmem:[%s6376_s19 + $0x4] ss:$8 sps:$4 sm:$0xff]  }
 0x7d4   : > { %3113 = vmatpush2.bf16.msra.mxu1 %v5191_v28  ;;  %v5256_v28 = vld [vmem:[%s6376_s19 + $0x104] ss:$8 sps:$4 sm:$0xff]  }
 0x7d5   : > { %3114 = vmatprep.subr.bf16.mxu1 %v5199_v60  ;;  %v5254_v60 = vld [vmem:[%s6376_s19 + $0x100] ss:$8 sps:$4 sm:$0xff]  }
 0x7d6   : > { %3154 = vmatpush2.bf16.msra.mxu0 %v5194_v29  ;;  %v5251_v29 = vld [vmem:[%s6376_s19] ss:$8 sps:$4 sm:$0xff]  }
 0x7d7   : > { %3155 = vmatprep.subr.bf16.mxu0 %v5202_v30  ;;  %v5259_v30 = vld [vmem:[%s6376_s19 + $0xf4] ss:$8 sps:$4 sm:$0xff]  }
 0x7d8   : > { %3115 = vmatpush2.bf16.msra.mxu1 %v5197_v31  ;;  %v5262_v31 = vld [vmem:[%s6376_s19 + $0x1f4] ss:$8 sps:$4 sm:$0xff]  }
 0x7d9   : > { %3116 = vmatprep.subr.bf16.mxu1 %v5205_v33  ;;  %v5260_v33 = vld [vmem:[%s6376_s19 + $0x1f0] ss:$8 sps:$4 sm:$0xff]  }
 0x7da   : > { %3156 = vmatpush2.bf16.msra.mxu0 %v5200_v32  ;;  %v5257_v32 = vld [vmem:[%s6376_s19 + $0xf0] ss:$8 sps:$4 sm:$0xff]  }
 0x7db   : > { %3157 = vmatprep.subr.bf16.mxu0 %v5208_v34  ;;  %v5265_v34 = vld [vmem:[%s6376_s19 + $0xe4] ss:$8 sps:$4 sm:$0xff]  }
 0x7dc   : > { %3117 = vmatpush2.bf16.msra.mxu1 %v5203_v35  ;;  %v5268_v35 = vld [vmem:[%s6376_s19 + $0x1e4] ss:$8 sps:$4 sm:$0xff]  }
 0x7dd   : > { %3604 = vmatprep.subr.bf16.mxu1 %v5211_v37  ;;  %v5266_v37 = vld [vmem:[%s6376_s19 + $0x1e0] ss:$8 sps:$4 sm:$0xff]  }
 0x7de   : > { %3158 = vmatpush2.bf16.msra.mxu0 %v5206_v36  ;;  %v5263_v36 = vld [vmem:[%s6376_s19 + $0xe0] ss:$8 sps:$4 sm:$0xff]  }
 0x7df   : > { %3645 = vmatprep.subr.bf16.mxu0 %v5214_v38  ;;  %v5271_v38 = vld [vmem:[%s6376_s19 + $0xd4] ss:$8 sps:$4 sm:$0xff]  }
 0x855   : > { %v2636_v63 = vpop.xlane.xlu0 %2635 }
 0x856   : > { %v2637_v1 = vmul.f32 0.00390625, %v2636_v63  ;;  %v5215_v63 = vld [vmem:[%s6376_s19 + $0x60] ss:$8 sps:$4 sm:$0xff]  }
 0x858   : > { %v6660_v2 = vsub.f32 %v6611_v14, %v2637_v1  ;;  %v6663_v3 = vsub.f32 %v6613_v18, %v2637_v1  ;;  %v5218_v1 = vld [vmem:[%s6376_s19 + $0x160] ss:$8 sps:$4 sm:$0xff]  }
 0x85a   : > { %v2640_v4 = vmul.f32 %v6660_v2, %v6660_v2  ;;  %v2641_v5 = vmul.f32 %v6663_v3, %v6663_v3 }
 0x85c   : > { %v2642_v6 = vsel %vm1341_vm2, %v2640_v4, 0.0  ;;  %v2643_v7 = vsel %vm1341_vm2, %v2641_v5, 0.0  ;;  %v5221_v4 = vld [vmem:[%s6376_s19 + $0x50] ss:$8 sps:$4 sm:$0xff]  }
 0x85d   : > { %v2644_v8 = vadd.f32 %v2643_v7, %v2642_v6  ;;  %v5224_v5 = vld [vmem:[%s6376_s19 + $0x150] ss:$8 sps:$4 sm:$0xff]   ;;  %v5229_v6 = vld [vmem:[%s6376_s19 + $0x44] ss:$8 sps:$4 sm:$0xff]  }
 0x85e   : > { %v5232_v7 = vld [vmem:[%s6376_s19 + $0x144] ss:$8 sps:$4 sm:$0xff]  }
 0x85f   : > { %2645 = vadd.xlane.f32.xlu1 %v2644_v8  ;;  %v5227_v8 = vld [vmem:[%s6376_s19 + $0x40] ss:$8 sps:$4 sm:$0xff]  }
 0x8e8   : > { %v2646_v39 = vpop.xlane.xlu1 %2645 }
 0x8e9   : > { %v2647_v40 = vmul.f32 0.00390625, %v2646_v39  ;;  %v5274_v39 = vld [vmem:[%s6376_s19 + $0x1d4] ss:$8 sps:$4 sm:$0xff]  }
 0x8eb   : > { %v2648_v41 = vadd.f32 1e-12, %v2647_v40  ;;  %v5269_v40 = vld [vmem:[%s6376_s19 + $0xd0] ss:$8 sps:$4 sm:$0xff]  }
 0x8ed   : > { %5315 = vrsqrt.f32 %v2648_v41  ;;  %v5272_v41 = vld [vmem:[%s6376_s19 + $0x1d0] ss:$8 sps:$4 sm:$0xff]  }
 0x8fa   : > { %v5316_v46 = vpop.eup %5315 }
 0x8fb   : > { %v2651_v47 = vmul.f32 %v5316_v46, %v6663_v3  ;;  %v2650_v50 = vmul.f32 %v5316_v46, %v6660_v2  ;;  %v5223_v2 = vld [vmem:[%s6376_s19 + $0x54] ss:$8 sps:$4 sm:$0xff]  }
 0x8fc   : > { %v5226_v3 = vld [vmem:[%s6376_s19 + $0x154] ss:$8 sps:$4 sm:$0xff]  }
 0x8fd   : > { %v2664_v51 = vmul.f32 %v2660_v45, %v2651_v47  ;;  %v2663_v52 = vmul.f32 %v2656_v44, %v2650_v50  ;;  %v5278_v44 = vld [vmem:[%s6376_s19 + $0x1c0] ss:$8 sps:$4 sm:$0xff]   ;;  %v5280_v45 = vld [vmem:[%s6376_s19 + $0x1c4] ss:$8 sps:$4 sm:$0xff]   ;;  %v5283_v46 = vld [vmem:[%s6376_s19 + $0xb4] ss:$8 sps:$4 sm:$0xff]  }
 0x8fe   : > { %v5286_v47 = vld [vmem:[%s6376_s19 + $0x1b4] ss:$8 sps:$4 sm:$0xff]   ;;  %v5289_v50 = vld [vmem:[%s6376_s19 + $0xa4] ss:$8 sps:$4 sm:$0xff]  }
 0x8ff   : > { %v2677_v53 = vadd.f32 %v2673_v49, %v2664_v51  ;;  %v2676_v54 = vadd.f32 %v2669_v48, %v2663_v52  ;;  %v5281_v48 = vld [vmem:[%s6376_s19 + $0xb0] ss:$8 sps:$4 sm:$0xff]   ;;  %v5292_v51 = vld [vmem:[%s6376_s19 + $0x1a4] ss:$8 sps:$4 sm:$0xff]   ;;  %v5287_v52 = vld [vmem:[%s6376_s19 + $0xa0] ss:$8 sps:$4 sm:$0xff]  }
 0x900   : > { %v5284_v49 = vld [vmem:[%s6376_s19 + $0x1b0] ss:$8 sps:$4 sm:$0xff]  }
 0x901   : > { %v2679_v55 = vpack.c.bf16 %v2677_v53, %v2677_v53  ;;  %v2678_v56 = vpack.c.bf16 %v2676_v54, %v2676_v54  ;;  %v5290_v53 = vld [vmem:[%s6376_s19 + $0x1a0] ss:$8 sps:$4 sm:$0xff]   ;;  %v5295_v54 = vld [vmem:[%s6376_s19 + $0x94] ss:$8 sps:$4 sm:$0xff]  }
 0x903   : > { %3118 = vmatprep.mubr.bf16.mxu1 %v2679_v55  ;;  %3159 = vmatprep.mubr.bf16.mxu0 %v2679_v55  ;;  %v5298_v55 = vld [vmem:[%s6376_s19 + $0x194] ss:$8 sps:$4 sm:$0xff]  }
 0x904   : > { %3119 = vmatmul.mubr.bf16.vlgmr.msra.gmra.mxu1 %v2678_v56  ;;  %3160 = vmatmul.mubr.bf16.vlgmr.msra.gmra.mxu0 %v2678_v56  ;;  %v5293_v56 = vld [vmem:[%s6376_s19 + $0x90] ss:$8 sps:$4 sm:$0xff]  }
 0x905   : > { %3605 = vmatpush1.bf16.msra.mxu1 %v5209_v57  ;;  %3646 = vmatpush1.bf16.msra.mxu0 %v5212_v58  ;;  %v5296_v57 = vld [vmem:[%s6376_s19 + $0x190] ss:$8 sps:$4 sm:$0xff]   ;;  %v5301_v58 = vld [vmem:[%s6376_s19 + $0x84] ss:$8 sps:$4 sm:$0xff]  }
 0x906   : > { %3606 = vmatprep.subr.bf16.mxu1 %v5217_v59  ;;  %3647 = vmatprep.subr.bf16.mxu0 %v5220_v62  ;;  %v5304_v59 = vld [vmem:[%s6376_s19 + $0x184] ss:$8 sps:$4 sm:$0xff]   ;;  %v5299_v62 = vld [vmem:[%s6376_s19 + $0x80] ss:$8 sps:$4 sm:$0xff]  }
 0x909   : > { %3607 = vmatpush1.bf16.msra.mxu1 %v5215_v63  ;;  %3648 = vmatpush1.bf16.msra.mxu0 %v5218_v1  ;;  %v5302_v63 = vld [vmem:[%s6376_s19 + $0x180] ss:$8 sps:$4 sm:$0xff]   ;;  %v2744_v1 = vld [vmem:[%s6387_s7] sm:$0xf] }
 0x90a   : > { %3608 = vmatprep.subr.bf16.mxu1 %v5223_v2  ;;  %3649 = vmatprep.subr.bf16.mxu0 %v5226_v3  ;;  %v2749_v2 = vrot.slane %v2744_v1, %v6493_v13  ;;  %v2757_v3 = vrot.slane %v2744_v1, %v1499_v61 }
 0x90d   : > { %3609 = vmatpush1.bf16.msra.mxu1 %v5221_v4  ;;  %3650 = vmatpush1.bf16.msra.mxu0 %v5224_v5  ;;  %v2753_v4 = vrot.slane %v2744_v1, %v6490_v12  ;;  %v2761_v5 = vrot.slane %v2744_v1, %v1503_v0 }
 0x90e   : > { %3610 = vmatprep.subr.bf16.mxu1 %v5229_v6  ;;  %3651 = vmatprep.subr.bf16.mxu0 %v5232_v7 }
 0x911   : > { %3611 = vmatpush1.bf16.msra.mxu1 %v5227_v8  ;;  %3652 = vmatpush1.bf16.msra.mxu0 %v5230_v9 }
 0x912   : > { %3612 = vmatprep.subr.bf16.mxu1 %v5235_v10  ;;  %3653 = vmatprep.subr.bf16.mxu0 %v5238_v15 }
 0x915   : > { %3613 = vmatpush1.bf16.msra.mxu1 %v5233_v16  ;;  %3654 = vmatpush1.bf16.msra.mxu0 %v5236_v17 }
 0x916   : > { %3614 = vmatprep.subr.bf16.mxu1 %v5241_v19  ;;  %3655 = vmatprep.subr.bf16.mxu0 %v5244_v20 }
 0x919   : > { %3615 = vmatpush1.bf16.msra.mxu1 %v5239_v21  ;;  %3656 = vmatpush1.bf16.msra.mxu0 %v5242_v22 }
 0x91a   : > { %3616 = vmatprep.subr.bf16.mxu1 %v5247_v23  ;;  %3657 = vmatprep.subr.bf16.mxu0 %v5250_v24 }
 0x91d   : > { %3617 = vmatpush1.bf16.msra.mxu1 %v5245_v25  ;;  %3658 = vmatpush1.bf16.msra.mxu0 %v5248_v26 }
 0x91e   : > { %3618 = vmatprep.subr.bf16.mxu1 %v5253_v27  ;;  %3659 = vmatprep.subr.bf16.mxu0 %v5256_v28 }
 0x921   : > { %3619 = vmatpush1.bf16.msra.mxu1 %v5251_v29  ;;  %3660 = vmatpush1.bf16.msra.mxu0 %v5254_v60 }
 0x922   : > { %3620 = vmatprep.subr.bf16.mxu1 %v5259_v30  ;;  %3661 = vmatprep.subr.bf16.mxu0 %v5262_v31 }
 0x925   : > { %3621 = vmatpush2.bf16.msra.mxu1 %v5257_v32  ;;  %3662 = vmatpush2.bf16.msra.mxu0 %v5260_v33 }
 0x926   : > { %3622 = vmatprep.subr.bf16.mxu1 %v5265_v34  ;;  %3663 = vmatprep.subr.bf16.mxu0 %v5268_v35 }
 0x929   : > { %3623 = vmatpush2.bf16.msra.mxu1 %v5263_v36  ;;  %3664 = vmatpush2.bf16.msra.mxu0 %v5266_v37 }
 0x92a   : > { %3624 = vmatprep.subr.bf16.mxu1 %v5271_v38  ;;  %3665 = vmatprep.subr.bf16.mxu0 %v5274_v39 }
 0x92d   : > { %3625 = vmatpush2.bf16.msra.mxu1 %v5269_v40  ;;  %3666 = vmatpush2.bf16.msra.mxu0 %v5272_v41 }
 0x92e   : > { %3626 = vmatprep.subr.bf16.mxu1 %v5277_v43  ;;  %3667 = vmatprep.subr.bf16.mxu0 %v5280_v45 }
 0x931   : > { %3627 = vmatpush2.bf16.msra.mxu1 %v5275_v42  ;;  %3668 = vmatpush2.bf16.msra.mxu0 %v5278_v44 }
 0x932   : > { %3628 = vmatprep.subr.bf16.mxu1 %v5283_v46  ;;  %3669 = vmatprep.subr.bf16.mxu0 %v5286_v47 }
 0x935   : > { %3629 = vmatpush2.bf16.msra.mxu1 %v5281_v48  ;;  %3670 = vmatpush2.bf16.msra.mxu0 %v5284_v49 }
 0x936   : > { %3630 = vmatprep.subr.bf16.mxu1 %v5289_v50  ;;  %3671 = vmatprep.subr.bf16.mxu0 %v5292_v51 }
 0x939   : > { %3631 = vmatpush2.bf16.msra.mxu1 %v5287_v52  ;;  %3672 = vmatpush2.bf16.msra.mxu0 %v5290_v53 }
 0x93a   : > { %3632 = vmatprep.subr.bf16.mxu1 %v5295_v54  ;;  %3673 = vmatprep.subr.bf16.mxu0 %v5298_v55 }
 0x93d   : > { %3633 = vmatpush2.bf16.msra.mxu1 %v5293_v56  ;;  %3674 = vmatpush2.bf16.msra.mxu0 %v5296_v57 }
 0x93e   : > { %3634 = vmatprep.subr.bf16.mxu1 %v5301_v58  ;;  %3675 = vmatprep.subr.bf16.mxu0 %v5304_v59  ;;  %v3272_v59 = vld [vmem:[%s6397_s9] sm:$0x3]  ;;  %s6982_s9 = sld [smem:[#allocation32_spill]] }
 0x941   : > { %3635 = vmatpush2.bf16.msra.mxu1 %v5299_v62  ;;  %3676 = vmatpush2.bf16.msra.mxu0 %v5302_v63  ;;  %v3277_v62 = vrot.slane %v3272_v59, %v6493_v13  ;;  %v3281_v63 = vrot.slane %v3272_v59, %v6490_v12 }
 0x944   : > { %p4595_p12 = scmp.ne.s32.totalorder %s6982_s9, 1 }
 0x945   : > { %s6983_s24 = sld [smem:[#allocation57_spill]] (!%p4595_p12) }
 0x946   : > { %s6984_s19 = sld [smem:[#allocation58_spill]] (!%p4595_p12) }
 0x947   : > { %s6985_s8 = sld [smem:[#allocation59_spill]] (!%p4595_p12) }
 0x9c4   : > { %v3120_v6 = vpop.f32.mrf.mxu1  ;;  %v3161_v7 = vpop.f32.mrf.mxu0 }
 0x9c5   : > { %v3121_v8 = vadd.f32 %v3120_v6, %v2749_v2  ;;  %v3162_v9 = vadd.f32 %v3161_v7, %v2757_v3 }
 0x9c6   : > { %v3122_v10 = vpop.f32.mrf.mxu1  ;;  %v3163_v15 = vpop.f32.mrf.mxu0 }
 0x9c7   : > { %v3168_v16 = vmul.f32 %v3121_v8, %v3121_v8  ;;  %v3170_v17 = vmul.f32 %v3162_v9, %v3162_v9  ;;  %v3123_v19 = vadd.f32 %v3122_v10, %v2753_v4  ;;  %v3164_v20 = vadd.f32 %v3163_v15, %v2761_v5 }
 0x9c8   : > { %v3124_v21 = vpop.f32.mrf.mxu1  ;;  %v3165_v22 = vpop.f32.mrf.mxu0 }
 0x9c9   : > { %v3172_v23 = vmul.f32 %v3168_v16, %v3121_v8  ;;  %v3174_v24 = vmul.f32 %v3170_v17, %v3162_v9  ;;  %v3169_v61 = vmul.f32 %v3123_v19, %v3123_v19  ;;  %v3171_v25 = vmul.f32 %v3164_v20, %v3164_v20 }
 0x9ca   : > { %v3125_v26 = vpop.f32.mrf.mxu1  ;;  %v3166_v27 = vpop.f32.mrf.mxu0 }
 0x9cb   : > { %v3176_v11 = vmul.f32 0.044715, %v3172_v23  ;;  %v3178_v0 = vmul.f32 0.044715, %v3174_v24  ;;  %v3173_v28 = vmul.f32 %v3169_v61, %v3123_v19  ;;  %v3175_v29 = vmul.f32 %v3171_v25, %v3164_v20 }
 0x9cd   : > { %v3180_v60 = vadd.f32 %v3176_v11, %v3121_v8  ;;  %v3182_v30 = vadd.f32 %v3178_v0, %v3162_v9  ;;  %v3177_v31 = vmul.f32 0.044715, %v3173_v28  ;;  %v3179_v32 = vmul.f32 0.044715, %v3175_v29 }
 0x9cf   : > { %v3184_v33 = vmul.f32 0.7978846, %v3180_v60  ;;  %v3186_v34 = vmul.f32 0.7978846, %v3182_v30  ;;  %v3181_v35 = vadd.f32 %v3177_v31, %v3123_v19  ;;  %v3183_v36 = vadd.f32 %v3179_v32, %v3164_v20 }
 0x9d1   : > { %5317 = vtanh.f32 %v3184_v33  ;;  %v3185_v37 = vmul.f32 0.7978846, %v3181_v35  ;;  %v3187_v38 = vmul.f32 0.7978846, %v3183_v36 }
 0x9d2   : > { %5319 = vtanh.f32 %v3186_v34 }
 0x9d3   : > { %5321 = vtanh.f32 %v3185_v37 }
 0x9d4   : > { %5323 = vtanh.f32 %v3187_v38 }
 0x9de   : > { %v5318_v39 = vpop.eup %5317 }
 0x9df   : > { %v5320_v40 = vpop.eup %5319  ;;  %v3192_v41 = vadd.f32 1.0, %v5318_v39 }
 0x9e0   : > { %v5322_v42 = vpop.eup %5321  ;;  %v3194_v43 = vadd.f32 1.0, %v5320_v40 }
 0x9e1   : > { %v5324_v44 = vpop.eup %5323  ;;  %v3193_v45 = vadd.f32 1.0, %v5322_v42  ;;  %v3196_v46 = vmul.f32 0.5, %v3192_v41 }
 0x9e2   : > { %v3195_v47 = vadd.f32 1.0, %v5324_v44  ;;  %v3198_v48 = vmul.f32 0.5, %v3194_v43 }
 0x9e3   : > { %v3197_v49 = vmul.f32 0.5, %v3193_v45  ;;  %v3200_v51 = vmul.f32 %v3196_v46, %v3121_v8 }
 0x9e4   : > { %v3199_v50 = vmul.f32 0.5, %v3195_v47  ;;  %v3202_v53 = vmul.f32 %v3198_v48, %v3162_v9 }
 0x9e5   : > { %v3201_v52 = vmul.f32 %v3197_v49, %v3123_v19  ;;  %v3204_v57 = vpack.c.bf16 %v3200_v51, %v3200_v51 }
 0x9e6   : > { %v3203_v54 = vmul.f32 %v3199_v50, %v3164_v20  ;;  %v3206_v58 = vpack.c.bf16 %v3202_v53, %v3202_v53 }
 0x9e7   : > { %v3205_v55 = vpack.c.bf16 %v3201_v52, %v3201_v52 }
 0x9e8   : > { %v3207_v56 = vpack.c.bf16 %v3203_v54, %v3203_v54 }
 0x9e9   : > { %3636 = vmatprep.mubr.bf16.mxu1 %v3205_v55 }
 0x9ea   : > { %3677 = vmatprep.mubr.bf16.mxu0 %v3207_v56  ;;  %3637 = vmatmul.mubr.bf16.vlgmr.msra.gmra.mxu1 %v3204_v57 }
 0x9eb   : > { %3678 = vmatmul.mubr.bf16.vlgmr.msra.gmra.mxu0 %v3206_v58 }
 0xaaa   : > { %v3638_v1 = vpop.f32.mrf.mxu1 }
 0xaab   : > { %v3639_v2 = vadd.f32 %v3638_v1, %v3277_v62  ;;  %v3679_v3 = vpop.f32.mrf.mxu0 }
 0xaac   : > { %v3640_v4 = vpop.f32.mrf.mxu1 }
 0xaad   : > { %v3680_v5 = vadd.f32 %v3679_v3, %v3639_v2  ;;  %v3641_v6 = vadd.f32 %v3640_v4, %v3281_v63  ;;  %v3681_v7 = vpop.f32.mrf.mxu0 }
 0xaae   : > { %v3642_v8 = vpop.f32.mrf.mxu1 }
 0xaaf   : > { %v3686_v9 = vadd.f32 %v3680_v5, %v6611_v14  ;;  %v3682_v10 = vadd.f32 %v3681_v7, %v3641_v6  ;;  %v3683_v15 = vpop.f32.mrf.mxu0  ;;  %3693 = sbr.rel (%p4595_p12) target bundleno = 3256 (0xcb8), region = 164 }
 0xab0   : > { %v3643_v16 = vpop.f32.mrf.mxu1 }
 0xab1   : > { %3688 = vst [vmem:[#allocation2] sm:$0x1f] %v3686_v9  ;;  %v3687_v17 = vadd.f32 %v3682_v10, %v6613_v18  ;;  %v3684_v19 = vpop.f32.mrf.mxu0 }
 0xab3   : > { %3689 = vst [vmem:[#allocation2 + $0x8] sm:$0x1f] %v3687_v17 }
 0xab4   : > { %vm3696_vm8 = vcmask 1040384   ;;  %v5327_v23 = vld [vmem:[#allocation20 + $0x78] sm:$0xff]   ;;  %v5329_v24 = vld [vmem:[#allocation20 + $0x70] sm:$0xff]   ;;  %v5331_v30 = vld [vmem:[#allocation20 + $0x68] sm:$0xff]  }
 0xab5   : > { %v3697_v20 = vsel %vm3696_vm8, %v3686_v9, 0.0  ;;  %v3698_v21 = vsel %vm3696_vm8, %v3687_v17, 0.0  ;;  %v5328_v14 = vld [vmem:[#allocation20 + $0x38] sm:$0xff]   ;;  %4632 = vmatprep.subr.bf16.mxu0 %v5327_v23  ;;  %v5330_v60 = vld [vmem:[#allocation20 + $0x30] sm:$0xff]   ;;  %v5332_v31 = vld [vmem:[#allocation20 + $0x28] sm:$0xff]  }
 0xab6   : > { %v3699_v22 = vadd.f32 %v3698_v21, %v3697_v20  ;;  %4633 = vmatpush3.bf16.msra.mxu0 %v5328_v14  ;;  %v5333_v32 = vld [vmem:[#allocation20 + $0x60] sm:$0xff]   ;;  %v5335_v34 = vld [vmem:[#allocation20 + $0x58] sm:$0xff]   ;;  %v5337_v36 = vld [vmem:[#allocation20 + $0x50] sm:$0xff]  }
 0xab7   : > { %4634 = vmatprep.subr.bf16.mxu0 %v5329_v24  ;;  %v5334_v33 = vld [vmem:[#allocation20 + $0x20] sm:$0xff]   ;;  %v5336_v35 = vld [vmem:[#allocation20 + $0x18] sm:$0xff]   ;;  %v5338_v37 = vld [vmem:[#allocation20 + $0x10] sm:$0xff]  }
 0xab8   : > { %3700 = vadd.xlane.f32.xlu0 %v3699_v22  ;;  %v5339_v38 = vld [vmem:[#allocation20 + $0x48] sm:$0xff]   ;;  %v5341_v40 = vld [vmem:[#allocation20 + $0x40] sm:$0xff]   ;;  %v3694_v45 = vld [vmem:[%s6983_s24] sm:$0x3] }
 0xab9   : > { %v5340_v39 = vld [vmem:[#allocation20 + $0x8] sm:$0xff]   ;;  %v5342_v41 = vld [vmem:[#allocation20] sm:$0xff]   ;;  %v3695_v46 = vld [vmem:[%s6984_s19] sm:$0x3]  ;;  %v3721_v47 = vrot.slane %v3694_v45, %v6493_v13  ;;  %v3725_v48 = vrot.slane %v3694_v45, %v6490_v12 }
 0xaba   : > { %4635 = vmatpush3.bf16.msra.mxu0 %v5330_v60  ;;  %v3734_v51 = vrot.slane %v3695_v46, %v6493_v13  ;;  %v3738_v52 = vrot.slane %v3695_v46, %v6490_v12  ;;  %v3777_v63 = vld [vmem:[%s6985_s8] sm:$0x1] }
 0xabb   : > { %4636 = vmatprep.subr.bf16.mxu0 %v5331_v30 }
 0xabe   : > { %4637 = vmatpush3.bf16.msra.mxu0 %v5332_v31 }
 0xabf   : > { %4638 = vmatprep.subr.bf16.mxu0 %v5333_v32 }
 0xac2   : > { %4639 = vmatpush3.bf16.msra.mxu0 %v5334_v33 }
 0xac3   : > { %4640 = vmatprep.subr.bf16.mxu0 %v5335_v34 }
 0xac6   : > { %4641 = vmatpush3.bf16.msra.mxu0 %v5336_v35 }
 0xac7   : > { %4642 = vmatprep.subr.bf16.mxu0 %v5337_v36 }
 0xaca   : > { %4643 = vmatpush3.bf16.msra.mxu0 %v5338_v37 }
 0xacb   : > { %4644 = vmatprep.subr.bf16.mxu0 %v5339_v38 }
 0xace   : > { %4645 = vmatpush3.bf16.msra.mxu0 %v5340_v39 }
 0xacf   : > { %4646 = vmatprep.subr.bf16.mxu0 %v5341_v40 }
 0xad2   : > { %4647 = vmatpush3.bf16.msra.mxu0 %v5342_v41 }
 0xb41   : > { %v3701_v61 = vpop.xlane.xlu0 %3700 }
 0xb42   : > { %v3702_v18 = vmul.f32 0.00390625, %v3701_v61 }
 0xb44   : > { %v3703_v25 = vsub.f32 %v3686_v9, %v3702_v18  ;;  %v3704_v26 = vsub.f32 %v3687_v17, %v3702_v18 }
 0xb46   : > { %v3705_v27 = vmul.f32 %v3703_v25, %v3703_v25  ;;  %v3706_v11 = vmul.f32 %v3704_v26, %v3704_v26 }
 0xb48   : > { %v3707_v0 = vsel %vm3696_vm8, %v3705_v27, 0.0  ;;  %v3708_v28 = vsel %vm3696_vm8, %v3706_v11, 0.0 }
 0xb49   : > { %v3709_v29 = vadd.f32 %v3708_v28, %v3707_v0 }
 0xb4b   : > { %3710 = vadd.xlane.f32.xlu0 %v3709_v29 }
 0xbd4   : > { %v3711_v42 = vpop.xlane.xlu0 %3710 }
 0xbd5   : > { %v3712_v43 = vmul.f32 0.00390625, %v3711_v42 }
 0xbd7   : > { %v3713_v44 = vadd.f32 1e-12, %v3712_v43 }
 0xbd9   : > { %5343 = vrsqrt.f32 %v3713_v44 }
 0xbe6   : > { %v5344_v49 = vpop.eup %5343 }
 0xbe7   : > { %v3716_v50 = vmul.f32 %v5344_v49, %v3704_v26  ;;  %v3715_v53 = vmul.f32 %v5344_v49, %v3703_v25 }
 0xbe9   : > { %v3729_v54 = vmul.f32 %v3725_v48, %v3716_v50  ;;  %v3728_v55 = vmul.f32 %v3721_v47, %v3715_v53 }
 0xbeb   : > { %v3742_v56 = vadd.f32 %v3738_v52, %v3729_v54  ;;  %v3741_v57 = vadd.f32 %v3734_v51, %v3728_v55 }
 0xbed   : > { %v3744_v58 = vpack.c.bf16 %v3742_v56, %v3742_v56  ;;  %v3743_v59 = vpack.c.bf16 %v3741_v57, %v3741_v57 }
 0xbef   : > { %3906 = vmatprep.mubr.bf16.mxu0 %v3744_v58 }
 0xbf0   : > { %3907 = vmatmul.mubr.bf16.vlgmr.msra.gmra.mxu0 %v3743_v59 }
 0xcb0   : > { %v4648_v62 = vpop.f32.mrf.mxu0 }
 0xcb2   : > { %v4649_v1 = vpop.f32.mrf.mxu0 }
 0xcb3   : > { %v4650_v2 = vadd.f32 %v4649_v1, %v4648_v62 }
 0xcb4   : > { %v4651_v13 = vpop.f32.mrf.mxu0 }
 0xcb5   : > { %v3909_v3 = vadd.f32 %v4650_v2, %v3777_v63 }
 0xcb6   : > { %v4652_v12 = vpop.f32.mrf.mxu0 }
 0xcb7   : > { %3914 = vst [vmem:[%s1072_s10] sm:$0x1] %v3909_v3 }
 0xcb8 PF: > { %s6986_s0 = sld [smem:[#allocation33_spill]]  ;;  %s3928_s29 = sshll.u32 %s1072_s10, 4  ;;  %s3929_s29 = int_to_ptr.vmem [resolvable:$true] %s3928_s29 }
 0xcb9   : > { %s6987_s28 = sld [smem:[#allocation41_spill]]  ;;  %s3916_s30 = scalar_lea.sflag [#allocation5], %s6341_s6 }
 0xcba   : > { %s6988_s21 = sld [smem:[#allocation60_spill]]  ;;  %s5729_s15 = scalar_lea.vmem %s3929_s29, 16 }
 0xcbb   : > { %p5730_p9 = scmp.ne.s32.totalorder %s3929_s29, %s5729_s15  ;;  %s5894_s22 = smov [#allocation21]  }
 0xcbc   : > { %s5733_s25 = sshll.u32 %s5894_s22, 4  ;;  %s5734_s25 = int_to_ptr.vmem [resolvable:$false] %s5733_s25 }
 0xcbd   : > { %s5735_s23 = scalar_lea.vmem %s5734_s25, 32  ;;  %p5736_p8 = scmp.lt.s32.totalorder %s3929_s29, %s5734_s25 }
 0xcbe   : > { %s4612_s17 = sshll.u32 %s6986_s0, 4  ;;  %p5737_p5 = scmp.lt.s32.totalorder %s5735_s23, %s5729_s15 }
 0xcbf   : > { %p6989_p0 = scmp.ne.s32.totalorder %s6987_s28, 0 }
 0xcc0   : > { %s3926_s3 = scalar_lea.hbm %s6988_s21, %s4612_s17  ;;  %p5738_p13 = por %p5737_p5, %p5736_p8 }
 0xcc1   : > { %p5731_p11 = pnand %p5730_p9, %p6989_p0 }
 0xcc3   : > { %p5732_p6 = pneg %p5731_p11 }
 0xcc5   : > { %p5739_p1 = pnand %p5738_p13, %p5732_p6 }
 0xcc7   : > { %5742 = shalt.err (!%p5739_p1)
}
 0xcc8   : > { %s5743_s9 = scalar_lea.hbm %s3926_s3, 16  ;;  %s5747_s26 = scalar_lea.hbm %s6988_s21, 32 }
 0xcc9   : > { %p5744_p7 = scmp.ne.s32.totalorder %s3926_s3, %s5743_s9  ;;  %p5748_p10 = scmp.lt.s32.totalorder %s3926_s3, %s6988_s21 }
 0xcca   : > { %p5749_p2 = scmp.lt.s32.totalorder %s5747_s26, %s5743_s9 }
 0xccb   : > { %p5745_p4 = pnand %p5744_p7, %p6989_p0 }
 0xccc   : > { %p5750_p12 = por %p5749_p2, %p5748_p10 }
 0xccd   : > { %p5746_p3 = pneg %p5745_p4 }
 0xccf   : > { %p5751_p9 = pnand %p5750_p12, %p5746_p3 }
 0xcd1   : > { %5754 = shalt.err (!%p5751_p9)
}
 0xcd2   : > { %4718 = dma.vmem_to_hbm [thread:$0]  (%p6989_p0), %s3929_s29, 16, %s3926_s3, %s3916_s30  }
 0xcd3 PF: > { %s6990_s13 = sld [smem:[#allocation30_spill]]  ;;  %p4777_p11 = scmp.ge.s32.totalorder %s5865_s4, 2 }
 0xcd4   : > { %s6991_s20 = sld [smem:[#allocation42_spill]] }
 0xcd9   : > { %s3940_s19 = sand.u32 1, %s6990_s13  }
 0xcda   : > { %p6992_p6 = scmp.ne.s32.totalorder %s6991_s20, 0  ;;  %s3941_s14 = scalar_lea.sflag [#allocation5], %s3940_s19 }
 0xcdc   : > { %p4765_p8 = pnand %p4777_p11, %p6992_p6 }
 0xcde   : > { %p4766_p5 = pneg %p4765_p8 }
 0xce0   : > { %5820 = dma.done.wait (%p4766_p5), %s3941_s14, 16  }
 0xce1   : > { %5822 = vsyncadd (%p4766_p5), %s3941_s14, 4294967280  ;;  %s38_s4 = sadd.s32 1, %s5865_s4   ;;  %s6993_s1 = sld [smem:[#allocation28_spill]] }
 0xce2   : > { %p35_p13 = scmp.ge.s32.totalorder %s38_s4, 6   ;;  %s6994_s22 = sld [smem:[#allocation29_spill]] }
 0xce3   : > { %s6995_s23 = sld [smem:[#allocation38_spill]]  ;;  %s7001_s24 = smov %s5841_s2 }
 0xce4   : > { %s6996_s16 = sld [smem:[#allocation31_spill]]  ;;  %s7003_s3 = smov %s5857_s27 }
 0xce5   : > { %s6997_s25 = sld [smem:[#allocation39_spill]] }
 0xce6   : > { %s6998_s26 = sld [smem:[#allocation34_spill]] }
 0xce7   : > { %s6999_s8 = sld [smem:[#allocation35_spill]] }
 0xce8   : > { %s7000_s28 = sld [smem:[#allocation36_spill]] }
 0xce9   :  { %37 = sbr.rel (!%p35_p13) target bundleno = 30 (0x1e), region = 277 }
 0xcea   : > { %s7002_s2 = smov %s6996_s16 }
 0xced   : > { %s7004_s27 = smov %s6999_s8 }
 0xcee   :  { %3945 = vsyncpa [#allocation4], 1 }
 0xcef   :  { %3947 = vsyncpa [#allocation4 + $0x1], 1 }
 0xcf0   :  { %3948 = vsyncpa [#allocation7], 1 }
 0xcf1   :  { %3949 = vsyncpa [#allocation10], 1 }
 0xcf2   :  { %3950 = vsyncpa [#allocation5], 1 }
 0xcf3   :  { %3952 = vsyncpa [#allocation5 + $0x1], 1 }

</bundles_post_ra>
